<compile_context>
chip_gen: v6e
topology: v6e:2x2x1
jax: 0.10.0
libtpu: 0.0.40
codegen_flags: <defaults>
</compile_context>

<pallas_src>
import math

import jax
import jax.numpy as jnp
from jax import lax
from jax.experimental import pallas as pl
from jax.experimental.pallas import tpu as pltpu

# ----------------------------- model config ---------------------------------
BATCH = 2
SEQ = 8
NTOK = BATCH * SEQ
HIDDEN = 32
NUM_HEADS = 4
HEAD_DIM = HIDDEN // NUM_HEADS
INTERMEDIATE = 64
NUM_LAYERS = 2
VOCAB = 100
VOCAB_PAD = 128            # padded vocab rows for the one-hot gather matmul
TYPE_VOCAB = 2
NUM_LABELS = 3
LOGITS_PAD = 128           # lane-dense padded classifier width
LN_EPS = 1e-12
NEG_INF = -1e9

# Row indices into the consolidated f32 vector-parameter slab [N_VEC_ROWS, 128]
EMB_LN_G = 0
EMB_LN_B = 1
_LAYER_BASE = 2
_ROWS_PER_LAYER = 7
R_BO, R_LN1G, R_LN1B, R_BI, R_BF, R_LN2G, R_LN2B = range(_ROWS_PER_LAYER)
POOL_B = _LAYER_BASE + _ROWS_PER_LAYER * NUM_LAYERS
CLS_B = POOL_B + 1
N_VEC_ROWS = CLS_B + 1


# --------------------------- in-kernel helpers -------------------------------
def _layernorm(v, g, b):
    mu = jnp.mean(v, axis=-1, keepdims=True)
    var = jnp.mean(jnp.square(v - mu), axis=-1, keepdims=True)
    return (v - mu) * lax.rsqrt(var + LN_EPS) * g + b


def _gelu(x):
    # tanh-approx GELU (HF "gelu_new"), close to the erf-based reference.
    # TODO(synk): erf-based exact GELU to match bert-base-uncased bit-for-bit.
    c = math.sqrt(2.0 / math.pi)
    return 0.5 * x * (1.0 + jnp.tanh(c * (x + 0.044715 * x * x * x)))


# ----------------------------- fused kernel ----------------------------------
def fused_bert_kernel(ids_ref, amask_ref,          # SMEM int32 [B, S]
                      word_ref, pos_type_ref,      # bf16 [VOCAB_PAD,H], f32 [S,H]
                      wqkv_ref, bqkv_ref, wo_ref,  # bf16 [L*3*NH,H,Hd], f32 [L*3*NH,1,Hd], bf16 [L*NH,Hd,H]
                      wi_ref, wf_ref,              # bf16 [L,H,I], bf16 [L,I,H]
                      vec_ref,                     # f32 [N_VEC_ROWS, 128] (all small vectors)
                      pool_w_ref, cls_w_ref,       # bf16 [H,H], bf16 [H,LOGITS_PAD]
                      logits_ref):                 # f32 [B, LOGITS_PAD]

    def vrow(r, width=HIDDEN):
        return vec_ref[r:r + 1, 0:width]           # [1, width] f32, static slice

    # ---- embeddings: one-hot gather via MXU matmul (ids read from SMEM) ----
    row_i = lax.broadcasted_iota(jnp.int32, (NTOK, VOCAB_PAD), 0)
    voc_i = lax.broadcasted_iota(jnp.int32, (NTOK, VOCAB_PAD), 1)
    id_mat = jnp.zeros((NTOK, VOCAB_PAD), jnp.int32)
    for t in range(NTOK):                          # static unroll, 16 selects
        tok = ids_ref[t // SEQ, t % SEQ]
        id_mat = jnp.where(row_i == t, tok, id_mat)
    onehot = jnp.where(id_mat == voc_i, 1.0, 0.0).astype(jnp.bfloat16)
    word_part = jnp.dot(onehot, word_ref[...],
                        preferred_element_type=jnp.float32)        # [NTOK, H]
    # token_type_ids assumed all-zero (single segment); pos+type precombined.
    # TODO(synk): general token_type_ids support (second embedding gather).
    pos_type = jnp.concatenate([pos_type_ref[...]] * BATCH, axis=0)
    h = _layernorm(word_part + pos_type, vrow(EMB_LN_G), vrow(EMB_LN_B))

    # ---- additive attention mask, built once from SMEM scalars -------------
    # [NTOK, NTOK]: 0 where query row may attend key column (same example AND
    # key not padded), else -1e9.  Cross-example blocks are masked so both
    # batch examples share a single score tile per head.
    r16 = lax.broadcasted_iota(jnp.int32, (NTOK, NTOK), 0)
    c16 = lax.broadcasted_iota(jnp.int32, (NTOK, NTOK), 1)
    madd = jnp.full((NTOK, NTOK), NEG_INF, jnp.float32)
    for t in range(NTOK):                          # static unroll
        b = t // SEQ
        allow = jnp.where(amask_ref[b, t % SEQ] > 0, 0.0, NEG_INF)  # scalar
        in_col = (c16 == t) & (r16 >= b * SEQ) & (r16 < (b + 1) * SEQ)
        madd = jnp.where(in_col, allow, madd)
    mask_slab = jnp.concatenate([madd] * NUM_HEADS, axis=0)   # [NH*NTOK, NTOK]

    # ---- transformer layers (statically unrolled) ---------------------------
    for l in range(NUM_LAYERS):
        x_bf = h.astype(jnp.bfloat16)
        scores, vs = [], []
        for hd in range(NUM_HEADS):
            def proj(i, l=l, hd=hd):
                w_idx = (l * 3 + i) * NUM_HEADS + hd
                p = jnp.dot(x_bf, wqkv_ref[w_idx],
                            preferred_element_type=jnp.float32)   # [NTOK, Hd]
                return p + bqkv_ref[w_idx]
            qh = proj(0)                     # 1/sqrt(head_dim) folded into Wq
            kh = proj(1)
            vh = proj(2)
            s = lax.dot_general(qh.astype(jnp.bfloat16), kh.astype(jnp.bfloat16),
                                (((1,), (1,)), ((), ())),
                                preferred_element_type=jnp.float32)  # [NTOK, NTOK]
            scores.append(s)
            vs.append(vh.astype(jnp.bfloat16))

        # batched softmax over all (batch, head) pairs: one slab, one pass
        slab = jnp.concatenate(scores, axis=0) + mask_slab      # [NH*NTOK, NTOK]
        slab = slab - jnp.max(slab, axis=-1, keepdims=True)
        p = jnp.exp(slab)
        p = p * pl.reciprocal(jnp.sum(p, axis=-1, keepdims=True), approx=True)
        p_bf = p.astype(jnp.bfloat16)

        # merge heads by accumulating per-head output projections (no concat)
        attn = jnp.zeros((NTOK, HIDDEN), jnp.float32)
        for hd in range(NUM_HEADS):
            ph = p_bf[hd * NTOK:(hd + 1) * NTOK, :]             # sublane slice
            ctx = jnp.dot(ph, vs[hd], preferred_element_type=jnp.float32)
            attn = attn + jnp.dot(ctx.astype(jnp.bfloat16),
                                  wo_ref[l * NUM_HEADS + hd],
                                  preferred_element_type=jnp.float32)
        base = _LAYER_BASE + _ROWS_PER_LAYER * l
        attn = attn + vrow(base + R_BO)
        h1 = _layernorm(attn + h, vrow(base + R_LN1G), vrow(base + R_LN1B))

        # feed-forward (GELU) + residual LayerNorm
        ff = _gelu(jnp.dot(h1.astype(jnp.bfloat16), wi_ref[l],
                           preferred_element_type=jnp.float32)
                   + vrow(base + R_BI, INTERMEDIATE))
        ff2 = jnp.dot(ff.astype(jnp.bfloat16), wf_ref[l],
                      preferred_element_type=jnp.float32) + vrow(base + R_BF)
        h = _layernorm(ff2 + h1, vrow(base + R_LN2G), vrow(base + R_LN2B))

    # ---- pooler on [CLS] tokens + classifier --------------------------------
    # Dropout(0.1) is identity in eval mode.
    # TODO(synk): training-mode dropout (stateful PRNG mask) not implemented.
    cls_tok = jnp.concatenate([h[b * SEQ:b * SEQ + 1, :] for b in range(BATCH)],
                              axis=0)                               # [B, H]
    pooled = jnp.tanh(jnp.dot(cls_tok.astype(jnp.bfloat16), pool_w_ref[...],
                              preferred_element_type=jnp.float32) + vrow(POOL_B))
    logits = jnp.dot(pooled.astype(jnp.bfloat16), cls_w_ref[...],
                     preferred_element_type=jnp.float32) + vrow(CLS_B, LOGITS_PAD)
    logits_ref[...] = logits.astype(logits_ref.dtype)               # [B, 128]


# --------------------------- parameter init ----------------------------------
def init_params(key):
    std = 0.02
    keys = iter(jax.random.split(key, 32))

    def w(shape):
        return std * jax.random.normal(next(keys), shape, jnp.float32)

    scale = 1.0 / math.sqrt(HEAD_DIM)

    # embeddings (word table zero-padded to 128 rows for the one-hot matmul)
    word_emb = w((VOCAB, HIDDEN))
    word_pad = jnp.zeros((VOCAB_PAD, HIDDEN), jnp.float32).at[:VOCAB].set(word_emb)
    pos_emb = w((SEQ, HIDDEN))
    type_emb = w((TYPE_VOCAB, HIDDEN))
    pos_type = pos_emb + type_emb[0:1]          # token_type_ids are all zero

    wqkv_heads, bqkv_heads, wo_heads, wi_l, wf_l = [], [], [], [], []
    vec_rows = [jnp.ones((HIDDEN,), jnp.float32),      # emb LN gamma
                jnp.zeros((HIDDEN,), jnp.float32)]     # emb LN beta
    for _ in range(NUM_LAYERS):
        wq = w((HIDDEN, HIDDEN)) * scale        # fold 1/sqrt(head_dim) into Q
        wk = w((HIDDEN, HIDDEN))
        wv = w((HIDDEN, HIDDEN))
        for m in (wq, wk, wv):
            # [H, H] -> per-head [NH, H, HEAD_DIM] (output-column split)
            wqkv_heads.append(m.reshape(HIDDEN, NUM_HEADS, HEAD_DIM)
                               .transpose(1, 0, 2))
            bqkv_heads.append(jnp.zeros((NUM_HEADS, 1, HEAD_DIM), jnp.float32))
        wo = w((HIDDEN, HIDDEN))
        # [H, H] -> per-head [NH, HEAD_DIM, H] (input-row split)
        wo_heads.append(wo.reshape(NUM_HEADS, HEAD_DIM, HIDDEN))
        wi_l.append(w((HIDDEN, INTERMEDIATE)))
        wf_l.append(w((INTERMEDIATE, HIDDEN)))
        vec_rows += [jnp.zeros((HIDDEN,), jnp.float32),        # attn out bias
                     jnp.ones((HIDDEN,), jnp.float32),         # LN1 gamma
                     jnp.zeros((HIDDEN,), jnp.float32),        # LN1 beta
                     jnp.zeros((INTERMEDIATE,), jnp.float32),  # FFN bias (in)
                     jnp.zeros((HIDDEN,), jnp.float32),        # FFN bias (out)
                     jnp.ones((HIDDEN,), jnp.float32),         # LN2 gamma
                     jnp.zeros((HIDDEN,), jnp.float32)]        # LN2 beta
    vec_rows.append(jnp.zeros((HIDDEN,), jnp.float32))         # pooler bias
    vec_rows.append(jnp.zeros((LOGITS_PAD,), jnp.float32))     # classifier bias

    pool_w = w((HIDDEN, HIDDEN))
    cls_w = w((HIDDEN, NUM_LABELS))
    cls_w_pad = (jnp.zeros((HIDDEN, LOGITS_PAD), jnp.float32)
                 .at[:, :NUM_LABELS].set(cls_w))

    def pad128(v):
        return jnp.pad(v, (0, 128 - v.shape[0]))

    vec_slab = jnp.stack([pad128(r) for r in vec_rows])        # [N_VEC_ROWS,128]
    assert vec_slab.shape[0] == N_VEC_ROWS

    return {
        "word_emb_pad": word_pad.astype(jnp.bfloat16),
        "pos_type_emb": pos_type,                                        # f32
        "wqkv_heads": jnp.concatenate(wqkv_heads, 0).astype(jnp.bfloat16),
        "bqkv_heads": jnp.concatenate(bqkv_heads, 0),                    # f32
        "wo_heads": jnp.concatenate(wo_heads, 0).astype(jnp.bfloat16),
        "wi": jnp.stack(wi_l).astype(jnp.bfloat16),
        "wf": jnp.stack(wf_l).astype(jnp.bfloat16),
        "vec_slab": vec_slab,                                            # f32
        "pool_w": pool_w.astype(jnp.bfloat16),
        "cls_w_pad": cls_w_pad.astype(jnp.bfloat16),
    }


# ------------------------------ forward pass ---------------------------------
@jax.jit
def baseline_bert_classifier(params, input_ids, attention_mask):
    smem = pl.BlockSpec(memory_space=pltpu.MemorySpace.SMEM)
    vmem = pl.BlockSpec(memory_space=pltpu.MemorySpace.VMEM)
    logits_pad = pl.pallas_call(
        fused_bert_kernel,
        out_shape=jax.ShapeDtypeStruct((BATCH, LOGITS_PAD), jnp.float32),
        in_specs=[smem, smem] + [vmem] * 10,
        out_specs=vmem,
    )(input_ids.astype(jnp.int32), attention_mask.astype(jnp.int32),
      params["word_emb_pad"], params["pos_type_emb"],
      params["wqkv_heads"], params["bqkv_heads"], params["wo_heads"],
      params["wi"], params["wf"],
      params["vec_slab"], params["pool_w"], params["cls_w_pad"])
    return logits_pad[:, :NUM_LABELS]                         # [B, NUM_LABELS]


# --------------------------------- main ---------------------------------------
if __name__ == "__main__":
    key = jax.random.PRNGKey(0)
    kp, kid = jax.random.split(key)

    params = init_params(kp)
    input_ids = jax.random.randint(kid, (BATCH, SEQ), 0, VOCAB, dtype=jnp.int32)
    # mask out the last two tokens of the second example
    attention_mask = jnp.array(
        [[1, 1, 1, 1, 1, 1, 1, 1],
         [1, 1, 1, 1, 1, 1, 0, 0]], dtype=jnp.int32)

    logits = baseline_bert_classifier(params, input_ids, attention_mask)
    jax.block_until_ready(logits)
    assert logits.shape == (BATCH, NUM_LABELS)
    assert bool(jnp.all(jnp.isfinite(logits)))
    print("KERNEL_OK")
</pallas_src>

<mosaic_0001>
module attributes {stable_mosaic.version = 11 : i64} {
  func.func @fused_bert_kernel(%arg0: memref<2x8xi32, #tpu.memory_space<smem>>, %arg1: memref<2x8xi32, #tpu.memory_space<smem>>, %arg2: memref<128x32xbf16, #tpu.memory_space<vmem>>, %arg3: memref<8x32xf32, #tpu.memory_space<vmem>>, %arg4: memref<24x32x8xbf16, #tpu.memory_space<vmem>>, %arg5: memref<24x1x8xf32, #tpu.memory_space<vmem>>, %arg6: memref<8x8x32xbf16, #tpu.memory_space<vmem>>, %arg7: memref<2x32x64xbf16, #tpu.memory_space<vmem>>, %arg8: memref<2x64x32xbf16, #tpu.memory_space<vmem>>, %arg9: memref<18x128xf32, #tpu.memory_space<vmem>>, %arg10: memref<32x32xbf16, #tpu.memory_space<vmem>>, %arg11: memref<32x128xbf16, #tpu.memory_space<vmem>>, %arg12: memref<2x128xf32, #tpu.memory_space<vmem>>) attributes {dimension_semantics = [], scalar_prefetch = 0 : i64, scratch_operands = 0 : i64, tpu.core_type = #tpu.core_type<tc>} {
    %0 = tpu.iota {dimensions = array<i32: 0>} : vector<16x128xi32>
    %1 = tpu.iota {dimensions = array<i32: 1>} : vector<16x128xi32>
    %c0_i32 = arith.constant 0 : i32
    %2 = vector.broadcast %c0_i32 : i32 to vector<16x128xi32>
    %c0 = arith.constant 0 : index
    %c0_0 = arith.constant 0 : index
    %3 = memref.load %arg0[%c0, %c0_0] : memref<2x8xi32, #tpu.memory_space<smem>>
    %c0_i32_1 = arith.constant 0 : i32
    %4 = vector.broadcast %c0_i32_1 : i32 to vector<16x128xi32>
    %5 = arith.cmpi eq, %0, %4 : vector<16x128xi32>
    %6 = vector.broadcast %3 : i32 to vector<16x128xi32>
    %7 = arith.select %5, %6, %2 : vector<16x128xi1>, vector<16x128xi32>
    %c0_2 = arith.constant 0 : index
    %c1 = arith.constant 1 : index
    %8 = memref.load %arg0[%c0_2, %c1] : memref<2x8xi32, #tpu.memory_space<smem>>
    %c1_i32 = arith.constant 1 : i32
    %9 = vector.broadcast %c1_i32 : i32 to vector<16x128xi32>
    %10 = arith.cmpi eq, %0, %9 : vector<16x128xi32>
    %11 = vector.broadcast %8 : i32 to vector<16x128xi32>
    %12 = arith.select %10, %11, %7 : vector<16x128xi1>, vector<16x128xi32>
    %c0_3 = arith.constant 0 : index
    %c2 = arith.constant 2 : index
    %13 = memref.load %arg0[%c0_3, %c2] : memref<2x8xi32, #tpu.memory_space<smem>>
    %c2_i32 = arith.constant 2 : i32
    %14 = vector.broadcast %c2_i32 : i32 to vector<16x128xi32>
    %15 = arith.cmpi eq, %0, %14 : vector<16x128xi32>
    %16 = vector.broadcast %13 : i32 to vector<16x128xi32>
    %17 = arith.select %15, %16, %12 : vector<16x128xi1>, vector<16x128xi32>
    %c0_4 = arith.constant 0 : index
    %c3 = arith.constant 3 : index
    %18 = memref.load %arg0[%c0_4, %c3] : memref<2x8xi32, #tpu.memory_space<smem>>
    %c3_i32 = arith.constant 3 : i32
    %19 = vector.broadcast %c3_i32 : i32 to vector<16x128xi32>
    %20 = arith.cmpi eq, %0, %19 : vector<16x128xi32>
    %21 = vector.broadcast %18 : i32 to vector<16x128xi32>
    %22 = arith.select %20, %21, %17 : vector<16x128xi1>, vector<16x128xi32>
    %c0_5 = arith.constant 0 : index
    %c4 = arith.constant 4 : index
    %23 = memref.load %arg0[%c0_5, %c4] : memref<2x8xi32, #tpu.memory_space<smem>>
    %c4_i32 = arith.constant 4 : i32
    %24 = vector.broadcast %c4_i32 : i32 to vector<16x128xi32>
    %25 = arith.cmpi eq, %0, %24 : vector<16x128xi32>
    %26 = vector.broadcast %23 : i32 to vector<16x128xi32>
    %27 = arith.select %25, %26, %22 : vector<16x128xi1>, vector<16x128xi32>
    %c0_6 = arith.constant 0 : index
    %c5 = arith.constant 5 : index
    %28 = memref.load %arg0[%c0_6, %c5] : memref<2x8xi32, #tpu.memory_space<smem>>
    %c5_i32 = arith.constant 5 : i32
    %29 = vector.broadcast %c5_i32 : i32 to vector<16x128xi32>
    %30 = arith.cmpi eq, %0, %29 : vector<16x128xi32>
    %31 = vector.broadcast %28 : i32 to vector<16x128xi32>
    %32 = arith.select %30, %31, %27 : vector<16x128xi1>, vector<16x128xi32>
    %c0_7 = arith.constant 0 : index
    %c6 = arith.constant 6 : index
    %33 = memref.load %arg0[%c0_7, %c6] : memref<2x8xi32, #tpu.memory_space<smem>>
    %c6_i32 = arith.constant 6 : i32
    %34 = vector.broadcast %c6_i32 : i32 to vector<16x128xi32>
    %35 = arith.cmpi eq, %0, %34 : vector<16x128xi32>
    %36 = vector.broadcast %33 : i32 to vector<16x128xi32>
    %37 = arith.select %35, %36, %32 : vector<16x128xi1>, vector<16x128xi32>
    %c0_8 = arith.constant 0 : index
    %c7 = arith.constant 7 : index
    %38 = memref.load %arg0[%c0_8, %c7] : memref<2x8xi32, #tpu.memory_space<smem>>
    %c7_i32 = arith.constant 7 : i32
    %39 = vector.broadcast %c7_i32 : i32 to vector<16x128xi32>
    %40 = arith.cmpi eq, %0, %39 : vector<16x128xi32>
    %41 = vector.broadcast %38 : i32 to vector<16x128xi32>
    %42 = arith.select %40, %41, %37 : vector<16x128xi1>, vector<16x128xi32>
    %c1_9 = arith.constant 1 : index
    %c0_10 = arith.constant 0 : index
    %43 = memref.load %arg0[%c1_9, %c0_10] : memref<2x8xi32, #tpu.memory_space<smem>>
    %c8_i32 = arith.constant 8 : i32
    %44 = vector.broadcast %c8_i32 : i32 to vector<16x128xi32>
    %45 = arith.cmpi eq, %0, %44 : vector<16x128xi32>
    %46 = vector.broadcast %43 : i32 to vector<16x128xi32>
    %47 = arith.select %45, %46, %42 : vector<16x128xi1>, vector<16x128xi32>
    %c1_11 = arith.constant 1 : index
    %c1_12 = arith.constant 1 : index
    %48 = memref.load %arg0[%c1_11, %c1_12] : memref<2x8xi32, #tpu.memory_space<smem>>
    %c9_i32 = arith.constant 9 : i32
    %49 = vector.broadcast %c9_i32 : i32 to vector<16x128xi32>
    %50 = arith.cmpi eq, %0, %49 : vector<16x128xi32>
    %51 = vector.broadcast %48 : i32 to vector<16x128xi32>
    %52 = arith.select %50, %51, %47 : vector<16x128xi1>, vector<16x128xi32>
    %c1_13 = arith.constant 1 : index
    %c2_14 = arith.constant 2 : index
    %53 = memref.load %arg0[%c1_13, %c2_14] : memref<2x8xi32, #tpu.memory_space<smem>>
    %c10_i32 = arith.constant 10 : i32
    %54 = vector.broadcast %c10_i32 : i32 to vector<16x128xi32>
    %55 = arith.cmpi eq, %0, %54 : vector<16x128xi32>
    %56 = vector.broadcast %53 : i32 to vector<16x128xi32>
    %57 = arith.select %55, %56, %52 : vector<16x128xi1>, vector<16x128xi32>
    %c1_15 = arith.constant 1 : index
    %c3_16 = arith.constant 3 : index
    %58 = memref.load %arg0[%c1_15, %c3_16] : memref<2x8xi32, #tpu.memory_space<smem>>
    %c11_i32 = arith.constant 11 : i32
    %59 = vector.broadcast %c11_i32 : i32 to vector<16x128xi32>
    %60 = arith.cmpi eq, %0, %59 : vector<16x128xi32>
    %61 = vector.broadcast %58 : i32 to vector<16x128xi32>
    %62 = arith.select %60, %61, %57 : vector<16x128xi1>, vector<16x128xi32>
    %c1_17 = arith.constant 1 : index
    %c4_18 = arith.constant 4 : index
    %63 = memref.load %arg0[%c1_17, %c4_18] : memref<2x8xi32, #tpu.memory_space<smem>>
    %c12_i32 = arith.constant 12 : i32
    %64 = vector.broadcast %c12_i32 : i32 to vector<16x128xi32>
    %65 = arith.cmpi eq, %0, %64 : vector<16x128xi32>
    %66 = vector.broadcast %63 : i32 to vector<16x128xi32>
    %67 = arith.select %65, %66, %62 : vector<16x128xi1>, vector<16x128xi32>
    %c1_19 = arith.constant 1 : index
    %c5_20 = arith.constant 5 : index
    %68 = memref.load %arg0[%c1_19, %c5_20] : memref<2x8xi32, #tpu.memory_space<smem>>
    %c13_i32 = arith.constant 13 : i32
    %69 = vector.broadcast %c13_i32 : i32 to vector<16x128xi32>
    %70 = arith.cmpi eq, %0, %69 : vector<16x128xi32>
    %71 = vector.broadcast %68 : i32 to vector<16x128xi32>
    %72 = arith.select %70, %71, %67 : vector<16x128xi1>, vector<16x128xi32>
    %c1_21 = arith.constant 1 : index
    %c6_22 = arith.constant 6 : index
    %73 = memref.load %arg0[%c1_21, %c6_22] : memref<2x8xi32, #tpu.memory_space<smem>>
    %c14_i32 = arith.constant 14 : i32
    %74 = vector.broadcast %c14_i32 : i32 to vector<16x128xi32>
    %75 = arith.cmpi eq, %0, %74 : vector<16x128xi32>
    %76 = vector.broadcast %73 : i32 to vector<16x128xi32>
    %77 = arith.select %75, %76, %72 : vector<16x128xi1>, vector<16x128xi32>
    %c1_23 = arith.constant 1 : index
    %c7_24 = arith.constant 7 : index
    %78 = memref.load %arg0[%c1_23, %c7_24] : memref<2x8xi32, #tpu.memory_space<smem>>
    %c15_i32 = arith.constant 15 : i32
    %79 = vector.broadcast %c15_i32 : i32 to vector<16x128xi32>
    %80 = arith.cmpi eq, %0, %79 : vector<16x128xi32>
    %81 = vector.broadcast %78 : i32 to vector<16x128xi32>
    %82 = arith.select %80, %81, %77 : vector<16x128xi1>, vector<16x128xi32>
    %83 = arith.cmpi eq, %82, %1 : vector<16x128xi32>
    %cst = arith.constant 1.000000e+00 : f32
    %cst_25 = arith.constant 0.000000e+00 : f32
    %84 = vector.broadcast %cst : f32 to vector<16x128xf32>
    %85 = vector.broadcast %cst_25 : f32 to vector<16x128xf32>
    %86 = arith.select %83, %84, %85 : vector<16x128xi1>, vector<16x128xf32>
    %87 = arith.truncf %86 : vector<16x128xf32> to vector<16x128xbf16>
    %c0_26 = arith.constant 0 : index
    %c0_27 = arith.constant 0 : index
    %88 = vector.load %arg2[%c0_26, %c0_27] : memref<128x32xbf16, #tpu.memory_space<vmem>>, vector<128x32xbf16>
    %cst_28 = arith.constant dense<0.000000e+00> : vector<16x32xf32>
    %89 = tpu.matmul %87, %88, %cst_28 {dimension_numbers = #tpu.dot_dimension_numbers<[1], [0], [0], [1], [0, 0, 1, 1], [], []>} : vector<16x128xbf16>, vector<128x32xbf16>, vector<16x32xf32> -> vector<16x32xf32>
    %c0_29 = arith.constant 0 : index
    %c0_30 = arith.constant 0 : index
    %90 = vector.load %arg3[%c0_29, %c0_30] : memref<8x32xf32, #tpu.memory_space<vmem>>, vector<8x32xf32>
    %91 = tpu.concatenate %90, %90 in 0 : vector<8x32xf32>, vector<8x32xf32> -> vector<16x32xf32>
    %92 = arith.addf %89, %91 : vector<16x32xf32>
    %c0_31 = arith.constant 0 : index
    %c0_32 = arith.constant 0 : index
    %93 = vector.load %arg9[%c0_31, %c0_32] : memref<18x128xf32, #tpu.memory_space<vmem>>, vector<1x32xf32>
    %c1_33 = arith.constant 1 : index
    %c0_34 = arith.constant 0 : index
    %94 = vector.load %arg9[%c1_33, %c0_34] : memref<18x128xf32, #tpu.memory_space<vmem>>, vector<1x32xf32>
    %cst_35 = arith.constant dense<0.000000e+00> : vector<16xf32>
    %95 = vector.multi_reduction <add>, %92, %cst_35 [1] : vector<16x32xf32> to vector<16xf32>
    %96 = vector.shape_cast %95 : vector<16xf32> to vector<16x1xf32>
    %cst_36 = arith.constant 3.200000e+01 : f32
    %97 = vector.broadcast %cst_36 : f32 to vector<16x1xf32>
    %98 = arith.divf %96, %97 : vector<16x1xf32>
    %99 = vector.broadcast %98 : vector<16x1xf32> to vector<16x32xf32>
    %100 = arith.subf %92, %99 : vector<16x32xf32>
    %101 = arith.mulf %100, %100 : vector<16x32xf32>
    %cst_37 = arith.constant dense<0.000000e+00> : vector<16xf32>
    %102 = vector.multi_reduction <add>, %101, %cst_37 [1] : vector<16x32xf32> to vector<16xf32>
    %103 = vector.shape_cast %102 : vector<16xf32> to vector<16x1xf32>
    %cst_38 = arith.constant 3.200000e+01 : f32
    %104 = vector.broadcast %cst_38 : f32 to vector<16x1xf32>
    %105 = arith.divf %103, %104 : vector<16x1xf32>
    %106 = vector.broadcast %98 : vector<16x1xf32> to vector<16x32xf32>
    %107 = arith.subf %92, %106 : vector<16x32xf32>
    %cst_39 = arith.constant 9.99999996E-13 : f32
    %108 = vector.broadcast %cst_39 : f32 to vector<16x1xf32>
    %109 = arith.addf %105, %108 : vector<16x1xf32>
    %110 = math.rsqrt %109 : vector<16x1xf32>
    %111 = vector.broadcast %110 : vector<16x1xf32> to vector<16x32xf32>
    %112 = arith.mulf %107, %111 : vector<16x32xf32>
    %113 = vector.broadcast %93 : vector<1x32xf32> to vector<16x32xf32>
    %114 = arith.mulf %112, %113 : vector<16x32xf32>
    %115 = vector.broadcast %94 : vector<1x32xf32> to vector<16x32xf32>
    %116 = arith.addf %114, %115 : vector<16x32xf32>
    %117 = tpu.iota {dimensions = array<i32: 0>} : vector<16x16xi32>
    %118 = tpu.iota {dimensions = array<i32: 1>} : vector<16x16xi32>
    %cst_40 = arith.constant -1.000000e+09 : f32
    %119 = vector.broadcast %cst_40 : f32 to vector<16x16xf32>
    %c0_41 = arith.constant 0 : index
    %c0_42 = arith.constant 0 : index
    %120 = memref.load %arg1[%c0_41, %c0_42] : memref<2x8xi32, #tpu.memory_space<smem>>
    %c0_i32_43 = arith.constant 0 : i32
    %121 = arith.cmpi sgt, %120, %c0_i32_43 : i32
    %cst_44 = arith.constant 0.000000e+00 : f32
    %cst_45 = arith.constant -1.000000e+09 : f32
    %122 = arith.select %121, %cst_44, %cst_45 : f32
    %c0_i32_46 = arith.constant 0 : i32
    %123 = vector.broadcast %c0_i32_46 : i32 to vector<16x16xi32>
    %124 = arith.cmpi eq, %118, %123 : vector<16x16xi32>
    %c0_i32_47 = arith.constant 0 : i32
    %125 = vector.broadcast %c0_i32_47 : i32 to vector<16x16xi32>
    %126 = arith.cmpi sge, %117, %125 : vector<16x16xi32>
    %127 = arith.andi %124, %126 : vector<16x16xi1>
    %c8_i32_48 = arith.constant 8 : i32
    %128 = vector.broadcast %c8_i32_48 : i32 to vector<16x16xi32>
    %129 = arith.cmpi slt, %117, %128 : vector<16x16xi32>
    %130 = arith.andi %127, %129 : vector<16x16xi1>
    %131 = vector.broadcast %122 : f32 to vector<16x16xf32>
    %132 = arith.select %130, %131, %119 : vector<16x16xi1>, vector<16x16xf32>
    %c0_49 = arith.constant 0 : index
    %c1_50 = arith.constant 1 : index
    %133 = memref.load %arg1[%c0_49, %c1_50] : memref<2x8xi32, #tpu.memory_space<smem>>
    %c0_i32_51 = arith.constant 0 : i32
    %134 = arith.cmpi sgt, %133, %c0_i32_51 : i32
    %cst_52 = arith.constant 0.000000e+00 : f32
    %cst_53 = arith.constant -1.000000e+09 : f32
    %135 = arith.select %134, %cst_52, %cst_53 : f32
    %c1_i32_54 = arith.constant 1 : i32
    %136 = vector.broadcast %c1_i32_54 : i32 to vector<16x16xi32>
    %137 = arith.cmpi eq, %118, %136 : vector<16x16xi32>
    %c0_i32_55 = arith.constant 0 : i32
    %138 = vector.broadcast %c0_i32_55 : i32 to vector<16x16xi32>
    %139 = arith.cmpi sge, %117, %138 : vector<16x16xi32>
    %140 = arith.andi %137, %139 : vector<16x16xi1>
    %c8_i32_56 = arith.constant 8 : i32
    %141 = vector.broadcast %c8_i32_56 : i32 to vector<16x16xi32>
    %142 = arith.cmpi slt, %117, %141 : vector<16x16xi32>
    %143 = arith.andi %140, %142 : vector<16x16xi1>
    %144 = vector.broadcast %135 : f32 to vector<16x16xf32>
    %145 = arith.select %143, %144, %132 : vector<16x16xi1>, vector<16x16xf32>
    %c0_57 = arith.constant 0 : index
    %c2_58 = arith.constant 2 : index
    %146 = memref.load %arg1[%c0_57, %c2_58] : memref<2x8xi32, #tpu.memory_space<smem>>
    %c0_i32_59 = arith.constant 0 : i32
    %147 = arith.cmpi sgt, %146, %c0_i32_59 : i32
    %cst_60 = arith.constant 0.000000e+00 : f32
    %cst_61 = arith.constant -1.000000e+09 : f32
    %148 = arith.select %147, %cst_60, %cst_61 : f32
    %c2_i32_62 = arith.constant 2 : i32
    %149 = vector.broadcast %c2_i32_62 : i32 to vector<16x16xi32>
    %150 = arith.cmpi eq, %118, %149 : vector<16x16xi32>
    %c0_i32_63 = arith.constant 0 : i32
    %151 = vector.broadcast %c0_i32_63 : i32 to vector<16x16xi32>
    %152 = arith.cmpi sge, %117, %151 : vector<16x16xi32>
    %153 = arith.andi %150, %152 : vector<16x16xi1>
    %c8_i32_64 = arith.constant 8 : i32
    %154 = vector.broadcast %c8_i32_64 : i32 to vector<16x16xi32>
    %155 = arith.cmpi slt, %117, %154 : vector<16x16xi32>
    %156 = arith.andi %153, %155 : vector<16x16xi1>
    %157 = vector.broadcast %148 : f32 to vector<16x16xf32>
    %158 = arith.select %156, %157, %145 : vector<16x16xi1>, vector<16x16xf32>
    %c0_65 = arith.constant 0 : index
    %c3_66 = arith.constant 3 : index
    %159 = memref.load %arg1[%c0_65, %c3_66] : memref<2x8xi32, #tpu.memory_space<smem>>
    %c0_i32_67 = arith.constant 0 : i32
    %160 = arith.cmpi sgt, %159, %c0_i32_67 : i32
    %cst_68 = arith.constant 0.000000e+00 : f32
    %cst_69 = arith.constant -1.000000e+09 : f32
    %161 = arith.select %160, %cst_68, %cst_69 : f32
    %c3_i32_70 = arith.constant 3 : i32
    %162 = vector.broadcast %c3_i32_70 : i32 to vector<16x16xi32>
    %163 = arith.cmpi eq, %118, %162 : vector<16x16xi32>
    %c0_i32_71 = arith.constant 0 : i32
    %164 = vector.broadcast %c0_i32_71 : i32 to vector<16x16xi32>
    %165 = arith.cmpi sge, %117, %164 : vector<16x16xi32>
    %166 = arith.andi %163, %165 : vector<16x16xi1>
    %c8_i32_72 = arith.constant 8 : i32
    %167 = vector.broadcast %c8_i32_72 : i32 to vector<16x16xi32>
    %168 = arith.cmpi slt, %117, %167 : vector<16x16xi32>
    %169 = arith.andi %166, %168 : vector<16x16xi1>
    %170 = vector.broadcast %161 : f32 to vector<16x16xf32>
    %171 = arith.select %169, %170, %158 : vector<16x16xi1>, vector<16x16xf32>
    %c0_73 = arith.constant 0 : index
    %c4_74 = arith.constant 4 : index
    %172 = memref.load %arg1[%c0_73, %c4_74] : memref<2x8xi32, #tpu.memory_space<smem>>
    %c0_i32_75 = arith.constant 0 : i32
    %173 = arith.cmpi sgt, %172, %c0_i32_75 : i32
    %cst_76 = arith.constant 0.000000e+00 : f32
    %cst_77 = arith.constant -1.000000e+09 : f32
    %174 = arith.select %173, %cst_76, %cst_77 : f32
    %c4_i32_78 = arith.constant 4 : i32
    %175 = vector.broadcast %c4_i32_78 : i32 to vector<16x16xi32>
    %176 = arith.cmpi eq, %118, %175 : vector<16x16xi32>
    %c0_i32_79 = arith.constant 0 : i32
    %177 = vector.broadcast %c0_i32_79 : i32 to vector<16x16xi32>
    %178 = arith.cmpi sge, %117, %177 : vector<16x16xi32>
    %179 = arith.andi %176, %178 : vector<16x16xi1>
    %c8_i32_80 = arith.constant 8 : i32
    %180 = vector.broadcast %c8_i32_80 : i32 to vector<16x16xi32>
    %181 = arith.cmpi slt, %117, %180 : vector<16x16xi32>
    %182 = arith.andi %179, %181 : vector<16x16xi1>
    %183 = vector.broadcast %174 : f32 to vector<16x16xf32>
    %184 = arith.select %182, %183, %171 : vector<16x16xi1>, vector<16x16xf32>
    %c0_81 = arith.constant 0 : index
    %c5_82 = arith.constant 5 : index
    %185 = memref.load %arg1[%c0_81, %c5_82] : memref<2x8xi32, #tpu.memory_space<smem>>
    %c0_i32_83 = arith.constant 0 : i32
    %186 = arith.cmpi sgt, %185, %c0_i32_83 : i32
    %cst_84 = arith.constant 0.000000e+00 : f32
    %cst_85 = arith.constant -1.000000e+09 : f32
    %187 = arith.select %186, %cst_84, %cst_85 : f32
    %c5_i32_86 = arith.constant 5 : i32
    %188 = vector.broadcast %c5_i32_86 : i32 to vector<16x16xi32>
    %189 = arith.cmpi eq, %118, %188 : vector<16x16xi32>
    %c0_i32_87 = arith.constant 0 : i32
    %190 = vector.broadcast %c0_i32_87 : i32 to vector<16x16xi32>
    %191 = arith.cmpi sge, %117, %190 : vector<16x16xi32>
    %192 = arith.andi %189, %191 : vector<16x16xi1>
    %c8_i32_88 = arith.constant 8 : i32
    %193 = vector.broadcast %c8_i32_88 : i32 to vector<16x16xi32>
    %194 = arith.cmpi slt, %117, %193 : vector<16x16xi32>
    %195 = arith.andi %192, %194 : vector<16x16xi1>
    %196 = vector.broadcast %187 : f32 to vector<16x16xf32>
    %197 = arith.select %195, %196, %184 : vector<16x16xi1>, vector<16x16xf32>
    %c0_89 = arith.constant 0 : index
    %c6_90 = arith.constant 6 : index
    %198 = memref.load %arg1[%c0_89, %c6_90] : memref<2x8xi32, #tpu.memory_space<smem>>
    %c0_i32_91 = arith.constant 0 : i32
    %199 = arith.cmpi sgt, %198, %c0_i32_91 : i32
    %cst_92 = arith.constant 0.000000e+00 : f32
    %cst_93 = arith.constant -1.000000e+09 : f32
    %200 = arith.select %199, %cst_92, %cst_93 : f32
    %c6_i32_94 = arith.constant 6 : i32
    %201 = vector.broadcast %c6_i32_94 : i32 to vector<16x16xi32>
    %202 = arith.cmpi eq, %118, %201 : vector<16x16xi32>
    %c0_i32_95 = arith.constant 0 : i32
    %203 = vector.broadcast %c0_i32_95 : i32 to vector<16x16xi32>
    %204 = arith.cmpi sge, %117, %203 : vector<16x16xi32>
    %205 = arith.andi %202, %204 : vector<16x16xi1>
    %c8_i32_96 = arith.constant 8 : i32
    %206 = vector.broadcast %c8_i32_96 : i32 to vector<16x16xi32>
    %207 = arith.cmpi slt, %117, %206 : vector<16x16xi32>
    %208 = arith.andi %205, %207 : vector<16x16xi1>
    %209 = vector.broadcast %200 : f32 to vector<16x16xf32>
    %210 = arith.select %208, %209, %197 : vector<16x16xi1>, vector<16x16xf32>
    %c0_97 = arith.constant 0 : index
    %c7_98 = arith.constant 7 : index
    %211 = memref.load %arg1[%c0_97, %c7_98] : memref<2x8xi32, #tpu.memory_space<smem>>
    %c0_i32_99 = arith.constant 0 : i32
    %212 = arith.cmpi sgt, %211, %c0_i32_99 : i32
    %cst_100 = arith.constant 0.000000e+00 : f32
    %cst_101 = arith.constant -1.000000e+09 : f32
    %213 = arith.select %212, %cst_100, %cst_101 : f32
    %c7_i32_102 = arith.constant 7 : i32
    %214 = vector.broadcast %c7_i32_102 : i32 to vector<16x16xi32>
    %215 = arith.cmpi eq, %118, %214 : vector<16x16xi32>
    %c0_i32_103 = arith.constant 0 : i32
    %216 = vector.broadcast %c0_i32_103 : i32 to vector<16x16xi32>
    %217 = arith.cmpi sge, %117, %216 : vector<16x16xi32>
    %218 = arith.andi %215, %217 : vector<16x16xi1>
    %c8_i32_104 = arith.constant 8 : i32
    %219 = vector.broadcast %c8_i32_104 : i32 to vector<16x16xi32>
    %220 = arith.cmpi slt, %117, %219 : vector<16x16xi32>
    %221 = arith.andi %218, %220 : vector<16x16xi1>
    %222 = vector.broadcast %213 : f32 to vector<16x16xf32>
    %223 = arith.select %221, %222, %210 : vector<16x16xi1>, vector<16x16xf32>
    %c1_105 = arith.constant 1 : index
    %c0_106 = arith.constant 0 : index
    %224 = memref.load %arg1[%c1_105, %c0_106] : memref<2x8xi32, #tpu.memory_space<smem>>
    %c0_i32_107 = arith.constant 0 : i32
    %225 = arith.cmpi sgt, %224, %c0_i32_107 : i32
    %cst_108 = arith.constant 0.000000e+00 : f32
    %cst_109 = arith.constant -1.000000e+09 : f32
    %226 = arith.select %225, %cst_108, %cst_109 : f32
    %c8_i32_110 = arith.constant 8 : i32
    %227 = vector.broadcast %c8_i32_110 : i32 to vector<16x16xi32>
    %228 = arith.cmpi eq, %118, %227 : vector<16x16xi32>
    %c8_i32_111 = arith.constant 8 : i32
    %229 = vector.broadcast %c8_i32_111 : i32 to vector<16x16xi32>
    %230 = arith.cmpi sge, %117, %229 : vector<16x16xi32>
    %231 = arith.andi %228, %230 : vector<16x16xi1>
    %c16_i32 = arith.constant 16 : i32
    %232 = vector.broadcast %c16_i32 : i32 to vector<16x16xi32>
    %233 = arith.cmpi slt, %117, %232 : vector<16x16xi32>
    %234 = arith.andi %231, %233 : vector<16x16xi1>
    %235 = vector.broadcast %226 : f32 to vector<16x16xf32>
    %236 = arith.select %234, %235, %223 : vector<16x16xi1>, vector<16x16xf32>
    %c1_112 = arith.constant 1 : index
    %c1_113 = arith.constant 1 : index
    %237 = memref.load %arg1[%c1_112, %c1_113] : memref<2x8xi32, #tpu.memory_space<smem>>
    %c0_i32_114 = arith.constant 0 : i32
    %238 = arith.cmpi sgt, %237, %c0_i32_114 : i32
    %cst_115 = arith.constant 0.000000e+00 : f32
    %cst_116 = arith.constant -1.000000e+09 : f32
    %239 = arith.select %238, %cst_115, %cst_116 : f32
    %c9_i32_117 = arith.constant 9 : i32
    %240 = vector.broadcast %c9_i32_117 : i32 to vector<16x16xi32>
    %241 = arith.cmpi eq, %118, %240 : vector<16x16xi32>
    %c8_i32_118 = arith.constant 8 : i32
    %242 = vector.broadcast %c8_i32_118 : i32 to vector<16x16xi32>
    %243 = arith.cmpi sge, %117, %242 : vector<16x16xi32>
    %244 = arith.andi %241, %243 : vector<16x16xi1>
    %c16_i32_119 = arith.constant 16 : i32
    %245 = vector.broadcast %c16_i32_119 : i32 to vector<16x16xi32>
    %246 = arith.cmpi slt, %117, %245 : vector<16x16xi32>
    %247 = arith.andi %244, %246 : vector<16x16xi1>
    %248 = vector.broadcast %239 : f32 to vector<16x16xf32>
    %249 = arith.select %247, %248, %236 : vector<16x16xi1>, vector<16x16xf32>
    %c1_120 = arith.constant 1 : index
    %c2_121 = arith.constant 2 : index
    %250 = memref.load %arg1[%c1_120, %c2_121] : memref<2x8xi32, #tpu.memory_space<smem>>
    %c0_i32_122 = arith.constant 0 : i32
    %251 = arith.cmpi sgt, %250, %c0_i32_122 : i32
    %cst_123 = arith.constant 0.000000e+00 : f32
    %cst_124 = arith.constant -1.000000e+09 : f32
    %252 = arith.select %251, %cst_123, %cst_124 : f32
    %c10_i32_125 = arith.constant 10 : i32
    %253 = vector.broadcast %c10_i32_125 : i32 to vector<16x16xi32>
    %254 = arith.cmpi eq, %118, %253 : vector<16x16xi32>
    %c8_i32_126 = arith.constant 8 : i32
    %255 = vector.broadcast %c8_i32_126 : i32 to vector<16x16xi32>
    %256 = arith.cmpi sge, %117, %255 : vector<16x16xi32>
    %257 = arith.andi %254, %256 : vector<16x16xi1>
    %c16_i32_127 = arith.constant 16 : i32
    %258 = vector.broadcast %c16_i32_127 : i32 to vector<16x16xi32>
    %259 = arith.cmpi slt, %117, %258 : vector<16x16xi32>
    %260 = arith.andi %257, %259 : vector<16x16xi1>
    %261 = vector.broadcast %252 : f32 to vector<16x16xf32>
    %262 = arith.select %260, %261, %249 : vector<16x16xi1>, vector<16x16xf32>
    %c1_128 = arith.constant 1 : index
    %c3_129 = arith.constant 3 : index
    %263 = memref.load %arg1[%c1_128, %c3_129] : memref<2x8xi32, #tpu.memory_space<smem>>
    %c0_i32_130 = arith.constant 0 : i32
    %264 = arith.cmpi sgt, %263, %c0_i32_130 : i32
    %cst_131 = arith.constant 0.000000e+00 : f32
    %cst_132 = arith.constant -1.000000e+09 : f32
    %265 = arith.select %264, %cst_131, %cst_132 : f32
    %c11_i32_133 = arith.constant 11 : i32
    %266 = vector.broadcast %c11_i32_133 : i32 to vector<16x16xi32>
    %267 = arith.cmpi eq, %118, %266 : vector<16x16xi32>
    %c8_i32_134 = arith.constant 8 : i32
    %268 = vector.broadcast %c8_i32_134 : i32 to vector<16x16xi32>
    %269 = arith.cmpi sge, %117, %268 : vector<16x16xi32>
    %270 = arith.andi %267, %269 : vector<16x16xi1>
    %c16_i32_135 = arith.constant 16 : i32
    %271 = vector.broadcast %c16_i32_135 : i32 to vector<16x16xi32>
    %272 = arith.cmpi slt, %117, %271 : vector<16x16xi32>
    %273 = arith.andi %270, %272 : vector<16x16xi1>
    %274 = vector.broadcast %265 : f32 to vector<16x16xf32>
    %275 = arith.select %273, %274, %262 : vector<16x16xi1>, vector<16x16xf32>
    %c1_136 = arith.constant 1 : index
    %c4_137 = arith.constant 4 : index
    %276 = memref.load %arg1[%c1_136, %c4_137] : memref<2x8xi32, #tpu.memory_space<smem>>
    %c0_i32_138 = arith.constant 0 : i32
    %277 = arith.cmpi sgt, %276, %c0_i32_138 : i32
    %cst_139 = arith.constant 0.000000e+00 : f32
    %cst_140 = arith.constant -1.000000e+09 : f32
    %278 = arith.select %277, %cst_139, %cst_140 : f32
    %c12_i32_141 = arith.constant 12 : i32
    %279 = vector.broadcast %c12_i32_141 : i32 to vector<16x16xi32>
    %280 = arith.cmpi eq, %118, %279 : vector<16x16xi32>
    %c8_i32_142 = arith.constant 8 : i32
    %281 = vector.broadcast %c8_i32_142 : i32 to vector<16x16xi32>
    %282 = arith.cmpi sge, %117, %281 : vector<16x16xi32>
    %283 = arith.andi %280, %282 : vector<16x16xi1>
    %c16_i32_143 = arith.constant 16 : i32
    %284 = vector.broadcast %c16_i32_143 : i32 to vector<16x16xi32>
    %285 = arith.cmpi slt, %117, %284 : vector<16x16xi32>
    %286 = arith.andi %283, %285 : vector<16x16xi1>
    %287 = vector.broadcast %278 : f32 to vector<16x16xf32>
    %288 = arith.select %286, %287, %275 : vector<16x16xi1>, vector<16x16xf32>
    %c1_144 = arith.constant 1 : index
    %c5_145 = arith.constant 5 : index
    %289 = memref.load %arg1[%c1_144, %c5_145] : memref<2x8xi32, #tpu.memory_space<smem>>
    %c0_i32_146 = arith.constant 0 : i32
    %290 = arith.cmpi sgt, %289, %c0_i32_146 : i32
    %cst_147 = arith.constant 0.000000e+00 : f32
    %cst_148 = arith.constant -1.000000e+09 : f32
    %291 = arith.select %290, %cst_147, %cst_148 : f32
    %c13_i32_149 = arith.constant 13 : i32
    %292 = vector.broadcast %c13_i32_149 : i32 to vector<16x16xi32>
    %293 = arith.cmpi eq, %118, %292 : vector<16x16xi32>
    %c8_i32_150 = arith.constant 8 : i32
    %294 = vector.broadcast %c8_i32_150 : i32 to vector<16x16xi32>
    %295 = arith.cmpi sge, %117, %294 : vector<16x16xi32>
    %296 = arith.andi %293, %295 : vector<16x16xi1>
    %c16_i32_151 = arith.constant 16 : i32
    %297 = vector.broadcast %c16_i32_151 : i32 to vector<16x16xi32>
    %298 = arith.cmpi slt, %117, %297 : vector<16x16xi32>
    %299 = arith.andi %296, %298 : vector<16x16xi1>
    %300 = vector.broadcast %291 : f32 to vector<16x16xf32>
    %301 = arith.select %299, %300, %288 : vector<16x16xi1>, vector<16x16xf32>
    %c1_152 = arith.constant 1 : index
    %c6_153 = arith.constant 6 : index
    %302 = memref.load %arg1[%c1_152, %c6_153] : memref<2x8xi32, #tpu.memory_space<smem>>
    %c0_i32_154 = arith.constant 0 : i32
    %303 = arith.cmpi sgt, %302, %c0_i32_154 : i32
    %cst_155 = arith.constant 0.000000e+00 : f32
    %cst_156 = arith.constant -1.000000e+09 : f32
    %304 = arith.select %303, %cst_155, %cst_156 : f32
    %c14_i32_157 = arith.constant 14 : i32
    %305 = vector.broadcast %c14_i32_157 : i32 to vector<16x16xi32>
    %306 = arith.cmpi eq, %118, %305 : vector<16x16xi32>
    %c8_i32_158 = arith.constant 8 : i32
    %307 = vector.broadcast %c8_i32_158 : i32 to vector<16x16xi32>
    %308 = arith.cmpi sge, %117, %307 : vector<16x16xi32>
    %309 = arith.andi %306, %308 : vector<16x16xi1>
    %c16_i32_159 = arith.constant 16 : i32
    %310 = vector.broadcast %c16_i32_159 : i32 to vector<16x16xi32>
    %311 = arith.cmpi slt, %117, %310 : vector<16x16xi32>
    %312 = arith.andi %309, %311 : vector<16x16xi1>
    %313 = vector.broadcast %304 : f32 to vector<16x16xf32>
    %314 = arith.select %312, %313, %301 : vector<16x16xi1>, vector<16x16xf32>
    %c1_160 = arith.constant 1 : index
    %c7_161 = arith.constant 7 : index
    %315 = memref.load %arg1[%c1_160, %c7_161] : memref<2x8xi32, #tpu.memory_space<smem>>
    %c0_i32_162 = arith.constant 0 : i32
    %316 = arith.cmpi sgt, %315, %c0_i32_162 : i32
    %cst_163 = arith.constant 0.000000e+00 : f32
    %cst_164 = arith.constant -1.000000e+09 : f32
    %317 = arith.select %316, %cst_163, %cst_164 : f32
    %c15_i32_165 = arith.constant 15 : i32
    %318 = vector.broadcast %c15_i32_165 : i32 to vector<16x16xi32>
    %319 = arith.cmpi eq, %118, %318 : vector<16x16xi32>
    %c8_i32_166 = arith.constant 8 : i32
    %320 = vector.broadcast %c8_i32_166 : i32 to vector<16x16xi32>
    %321 = arith.cmpi sge, %117, %320 : vector<16x16xi32>
    %322 = arith.andi %319, %321 : vector<16x16xi1>
    %c16_i32_167 = arith.constant 16 : i32
    %323 = vector.broadcast %c16_i32_167 : i32 to vector<16x16xi32>
    %324 = arith.cmpi slt, %117, %323 : vector<16x16xi32>
    %325 = arith.andi %322, %324 : vector<16x16xi1>
    %326 = vector.broadcast %317 : f32 to vector<16x16xf32>
    %327 = arith.select %325, %326, %314 : vector<16x16xi1>, vector<16x16xf32>
    %328 = tpu.concatenate %327, %327, %327, %327 in 0 : vector<16x16xf32>, vector<16x16xf32>, vector<16x16xf32>, vector<16x16xf32> -> vector<64x16xf32>
    %329 = arith.truncf %116 : vector<16x32xf32> to vector<16x32xbf16>
    %c0_168 = arith.constant 0 : index
    %c0_169 = arith.constant 0 : index
    %c0_170 = arith.constant 0 : index
    %330 = vector.load %arg4[%c0_168, %c0_169, %c0_170] : memref<24x32x8xbf16, #tpu.memory_space<vmem>>, vector<1x32x8xbf16>
    %331 = vector.shape_cast %330 : vector<1x32x8xbf16> to vector<32x8xbf16>
    %cst_171 = arith.constant dense<0.000000e+00> : vector<16x8xf32>
    %332 = tpu.matmul %329, %331, %cst_171 {dimension_numbers = #tpu.dot_dimension_numbers<[1], [0], [0], [1], [0, 0, 1, 1], [], []>} : vector<16x32xbf16>, vector<32x8xbf16>, vector<16x8xf32> -> vector<16x8xf32>
    %c0_172 = arith.constant 0 : index
    %c0_173 = arith.constant 0 : index
    %c0_174 = arith.constant 0 : index
    %333 = vector.load %arg5[%c0_172, %c0_173, %c0_174] : memref<24x1x8xf32, #tpu.memory_space<vmem>>, vector<1x1x8xf32>
    %334 = vector.shape_cast %333 : vector<1x1x8xf32> to vector<1x8xf32>
    %335 = vector.broadcast %334 : vector<1x8xf32> to vector<16x8xf32>
    %336 = arith.addf %332, %335 : vector<16x8xf32>
    %c4_175 = arith.constant 4 : index
    %c0_176 = arith.constant 0 : index
    %c0_177 = arith.constant 0 : index
    %337 = vector.load %arg4[%c4_175, %c0_176, %c0_177] : memref<24x32x8xbf16, #tpu.memory_space<vmem>>, vector<1x32x8xbf16>
    %338 = vector.shape_cast %337 : vector<1x32x8xbf16> to vector<32x8xbf16>
    %cst_178 = arith.constant dense<0.000000e+00> : vector<16x8xf32>
    %339 = tpu.matmul %329, %338, %cst_178 {dimension_numbers = #tpu.dot_dimension_numbers<[1], [0], [0], [1], [0, 0, 1, 1], [], []>} : vector<16x32xbf16>, vector<32x8xbf16>, vector<16x8xf32> -> vector<16x8xf32>
    %c4_179 = arith.constant 4 : index
    %c0_180 = arith.constant 0 : index
    %c0_181 = arith.constant 0 : index
    %340 = vector.load %arg5[%c4_179, %c0_180, %c0_181] : memref<24x1x8xf32, #tpu.memory_space<vmem>>, vector<1x1x8xf32>
    %341 = vector.shape_cast %340 : vector<1x1x8xf32> to vector<1x8xf32>
    %342 = vector.broadcast %341 : vector<1x8xf32> to vector<16x8xf32>
    %343 = arith.addf %339, %342 : vector<16x8xf32>
    %c8 = arith.constant 8 : index
    %c0_182 = arith.constant 0 : index
    %c0_183 = arith.constant 0 : index
    %344 = vector.load %arg4[%c8, %c0_182, %c0_183] : memref<24x32x8xbf16, #tpu.memory_space<vmem>>, vector<1x32x8xbf16>
    %345 = vector.shape_cast %344 : vector<1x32x8xbf16> to vector<32x8xbf16>
    %cst_184 = arith.constant dense<0.000000e+00> : vector<16x8xf32>
    %346 = tpu.matmul %329, %345, %cst_184 {dimension_numbers = #tpu.dot_dimension_numbers<[1], [0], [0], [1], [0, 0, 1, 1], [], []>} : vector<16x32xbf16>, vector<32x8xbf16>, vector<16x8xf32> -> vector<16x8xf32>
    %c8_185 = arith.constant 8 : index
    %c0_186 = arith.constant 0 : index
    %c0_187 = arith.constant 0 : index
    %347 = vector.load %arg5[%c8_185, %c0_186, %c0_187] : memref<24x1x8xf32, #tpu.memory_space<vmem>>, vector<1x1x8xf32>
    %348 = vector.shape_cast %347 : vector<1x1x8xf32> to vector<1x8xf32>
    %349 = vector.broadcast %348 : vector<1x8xf32> to vector<16x8xf32>
    %350 = arith.addf %346, %349 : vector<16x8xf32>
    %351 = arith.truncf %336 : vector<16x8xf32> to vector<16x8xbf16>
    %352 = arith.truncf %343 : vector<16x8xf32> to vector<16x8xbf16>
    %cst_188 = arith.constant dense<0.000000e+00> : vector<16x16xf32>
    %353 = tpu.matmul %351, %352, %cst_188 {dimension_numbers = #tpu.dot_dimension_numbers<[1], [1], [0], [0], [0, 0, 1, 0], [], []>} : vector<16x8xbf16>, vector<16x8xbf16>, vector<16x16xf32> -> vector<16x16xf32>
    %354 = arith.truncf %350 : vector<16x8xf32> to vector<16x8xbf16>
    %c1_189 = arith.constant 1 : index
    %c0_190 = arith.constant 0 : index
    %c0_191 = arith.constant 0 : index
    %355 = vector.load %arg4[%c1_189, %c0_190, %c0_191] : memref<24x32x8xbf16, #tpu.memory_space<vmem>>, vector<1x32x8xbf16>
    %356 = vector.shape_cast %355 : vector<1x32x8xbf16> to vector<32x8xbf16>
    %cst_192 = arith.constant dense<0.000000e+00> : vector<16x8xf32>
    %357 = tpu.matmul %329, %356, %cst_192 {dimension_numbers = #tpu.dot_dimension_numbers<[1], [0], [0], [1], [0, 0, 1, 1], [], []>} : vector<16x32xbf16>, vector<32x8xbf16>, vector<16x8xf32> -> vector<16x8xf32>
    %c1_193 = arith.constant 1 : index
    %c0_194 = arith.constant 0 : index
    %c0_195 = arith.constant 0 : index
    %358 = vector.load %arg5[%c1_193, %c0_194, %c0_195] : memref<24x1x8xf32, #tpu.memory_space<vmem>>, vector<1x1x8xf32>
    %359 = vector.shape_cast %358 : vector<1x1x8xf32> to vector<1x8xf32>
    %360 = vector.broadcast %359 : vector<1x8xf32> to vector<16x8xf32>
    %361 = arith.addf %357, %360 : vector<16x8xf32>
    %c5_196 = arith.constant 5 : index
    %c0_197 = arith.constant 0 : index
    %c0_198 = arith.constant 0 : index
    %362 = vector.load %arg4[%c5_196, %c0_197, %c0_198] : memref<24x32x8xbf16, #tpu.memory_space<vmem>>, vector<1x32x8xbf16>
    %363 = vector.shape_cast %362 : vector<1x32x8xbf16> to vector<32x8xbf16>
    %cst_199 = arith.constant dense<0.000000e+00> : vector<16x8xf32>
    %364 = tpu.matmul %329, %363, %cst_199 {dimension_numbers = #tpu.dot_dimension_numbers<[1], [0], [0], [1], [0, 0, 1, 1], [], []>} : vector<16x32xbf16>, vector<32x8xbf16>, vector<16x8xf32> -> vector<16x8xf32>
    %c5_200 = arith.constant 5 : index
    %c0_201 = arith.constant 0 : index
    %c0_202 = arith.constant 0 : index
    %365 = vector.load %arg5[%c5_200, %c0_201, %c0_202] : memref<24x1x8xf32, #tpu.memory_space<vmem>>, vector<1x1x8xf32>
    %366 = vector.shape_cast %365 : vector<1x1x8xf32> to vector<1x8xf32>
    %367 = vector.broadcast %366 : vector<1x8xf32> to vector<16x8xf32>
    %368 = arith.addf %364, %367 : vector<16x8xf32>
    %c9 = arith.constant 9 : index
    %c0_203 = arith.constant 0 : index
    %c0_204 = arith.constant 0 : index
    %369 = vector.load %arg4[%c9, %c0_203, %c0_204] : memref<24x32x8xbf16, #tpu.memory_space<vmem>>, vector<1x32x8xbf16>
    %370 = vector.shape_cast %369 : vector<1x32x8xbf16> to vector<32x8xbf16>
    %cst_205 = arith.constant dense<0.000000e+00> : vector<16x8xf32>
    %371 = tpu.matmul %329, %370, %cst_205 {dimension_numbers = #tpu.dot_dimension_numbers<[1], [0], [0], [1], [0, 0, 1, 1], [], []>} : vector<16x32xbf16>, vector<32x8xbf16>, vector<16x8xf32> -> vector<16x8xf32>
    %c9_206 = arith.constant 9 : index
    %c0_207 = arith.constant 0 : index
    %c0_208 = arith.constant 0 : index
    %372 = vector.load %arg5[%c9_206, %c0_207, %c0_208] : memref<24x1x8xf32, #tpu.memory_space<vmem>>, vector<1x1x8xf32>
    %373 = vector.shape_cast %372 : vector<1x1x8xf32> to vector<1x8xf32>
    %374 = vector.broadcast %373 : vector<1x8xf32> to vector<16x8xf32>
    %375 = arith.addf %371, %374 : vector<16x8xf32>
    %376 = arith.truncf %361 : vector<16x8xf32> to vector<16x8xbf16>
    %377 = arith.truncf %368 : vector<16x8xf32> to vector<16x8xbf16>
    %cst_209 = arith.constant dense<0.000000e+00> : vector<16x16xf32>
    %378 = tpu.matmul %376, %377, %cst_209 {dimension_numbers = #tpu.dot_dimension_numbers<[1], [1], [0], [0], [0, 0, 1, 0], [], []>} : vector<16x8xbf16>, vector<16x8xbf16>, vector<16x16xf32> -> vector<16x16xf32>
    %379 = arith.truncf %375 : vector<16x8xf32> to vector<16x8xbf16>
    %c2_210 = arith.constant 2 : index
    %c0_211 = arith.constant 0 : index
    %c0_212 = arith.constant 0 : index
    %380 = vector.load %arg4[%c2_210, %c0_211, %c0_212] : memref<24x32x8xbf16, #tpu.memory_space<vmem>>, vector<1x32x8xbf16>
    %381 = vector.shape_cast %380 : vector<1x32x8xbf16> to vector<32x8xbf16>
    %cst_213 = arith.constant dense<0.000000e+00> : vector<16x8xf32>
    %382 = tpu.matmul %329, %381, %cst_213 {dimension_numbers = #tpu.dot_dimension_numbers<[1], [0], [0], [1], [0, 0, 1, 1], [], []>} : vector<16x32xbf16>, vector<32x8xbf16>, vector<16x8xf32> -> vector<16x8xf32>
    %c2_214 = arith.constant 2 : index
    %c0_215 = arith.constant 0 : index
    %c0_216 = arith.constant 0 : index
    %383 = vector.load %arg5[%c2_214, %c0_215, %c0_216] : memref<24x1x8xf32, #tpu.memory_space<vmem>>, vector<1x1x8xf32>
    %384 = vector.shape_cast %383 : vector<1x1x8xf32> to vector<1x8xf32>
    %385 = vector.broadcast %384 : vector<1x8xf32> to vector<16x8xf32>
    %386 = arith.addf %382, %385 : vector<16x8xf32>
    %c6_217 = arith.constant 6 : index
    %c0_218 = arith.constant 0 : index
    %c0_219 = arith.constant 0 : index
    %387 = vector.load %arg4[%c6_217, %c0_218, %c0_219] : memref<24x32x8xbf16, #tpu.memory_space<vmem>>, vector<1x32x8xbf16>
    %388 = vector.shape_cast %387 : vector<1x32x8xbf16> to vector<32x8xbf16>
    %cst_220 = arith.constant dense<0.000000e+00> : vector<16x8xf32>
    %389 = tpu.matmul %329, %388, %cst_220 {dimension_numbers = #tpu.dot_dimension_numbers<[1], [0], [0], [1], [0, 0, 1, 1], [], []>} : vector<16x32xbf16>, vector<32x8xbf16>, vector<16x8xf32> -> vector<16x8xf32>
    %c6_221 = arith.constant 6 : index
    %c0_222 = arith.constant 0 : index
    %c0_223 = arith.constant 0 : index
    %390 = vector.load %arg5[%c6_221, %c0_222, %c0_223] : memref<24x1x8xf32, #tpu.memory_space<vmem>>, vector<1x1x8xf32>
    %391 = vector.shape_cast %390 : vector<1x1x8xf32> to vector<1x8xf32>
    %392 = vector.broadcast %391 : vector<1x8xf32> to vector<16x8xf32>
    %393 = arith.addf %389, %392 : vector<16x8xf32>
    %c10 = arith.constant 10 : index
    %c0_224 = arith.constant 0 : index
    %c0_225 = arith.constant 0 : index
    %394 = vector.load %arg4[%c10, %c0_224, %c0_225] : memref<24x32x8xbf16, #tpu.memory_space<vmem>>, vector<1x32x8xbf16>
    %395 = vector.shape_cast %394 : vector<1x32x8xbf16> to vector<32x8xbf16>
    %cst_226 = arith.constant dense<0.000000e+00> : vector<16x8xf32>
    %396 = tpu.matmul %329, %395, %cst_226 {dimension_numbers = #tpu.dot_dimension_numbers<[1], [0], [0], [1], [0, 0, 1, 1], [], []>} : vector<16x32xbf16>, vector<32x8xbf16>, vector<16x8xf32> -> vector<16x8xf32>
    %c10_227 = arith.constant 10 : index
    %c0_228 = arith.constant 0 : index
    %c0_229 = arith.constant 0 : index
    %397 = vector.load %arg5[%c10_227, %c0_228, %c0_229] : memref<24x1x8xf32, #tpu.memory_space<vmem>>, vector<1x1x8xf32>
    %398 = vector.shape_cast %397 : vector<1x1x8xf32> to vector<1x8xf32>
    %399 = vector.broadcast %398 : vector<1x8xf32> to vector<16x8xf32>
    %400 = arith.addf %396, %399 : vector<16x8xf32>
    %401 = arith.truncf %386 : vector<16x8xf32> to vector<16x8xbf16>
    %402 = arith.truncf %393 : vector<16x8xf32> to vector<16x8xbf16>
    %cst_230 = arith.constant dense<0.000000e+00> : vector<16x16xf32>
    %403 = tpu.matmul %401, %402, %cst_230 {dimension_numbers = #tpu.dot_dimension_numbers<[1], [1], [0], [0], [0, 0, 1, 0], [], []>} : vector<16x8xbf16>, vector<16x8xbf16>, vector<16x16xf32> -> vector<16x16xf32>
    %404 = arith.truncf %400 : vector<16x8xf32> to vector<16x8xbf16>
    %c3_231 = arith.constant 3 : index
    %c0_232 = arith.constant 0 : index
    %c0_233 = arith.constant 0 : index
    %405 = vector.load %arg4[%c3_231, %c0_232, %c0_233] : memref<24x32x8xbf16, #tpu.memory_space<vmem>>, vector<1x32x8xbf16>
    %406 = vector.shape_cast %405 : vector<1x32x8xbf16> to vector<32x8xbf16>
    %cst_234 = arith.constant dense<0.000000e+00> : vector<16x8xf32>
    %407 = tpu.matmul %329, %406, %cst_234 {dimension_numbers = #tpu.dot_dimension_numbers<[1], [0], [0], [1], [0, 0, 1, 1], [], []>} : vector<16x32xbf16>, vector<32x8xbf16>, vector<16x8xf32> -> vector<16x8xf32>
    %c3_235 = arith.constant 3 : index
    %c0_236 = arith.constant 0 : index
    %c0_237 = arith.constant 0 : index
    %408 = vector.load %arg5[%c3_235, %c0_236, %c0_237] : memref<24x1x8xf32, #tpu.memory_space<vmem>>, vector<1x1x8xf32>
    %409 = vector.shape_cast %408 : vector<1x1x8xf32> to vector<1x8xf32>
    %410 = vector.broadcast %409 : vector<1x8xf32> to vector<16x8xf32>
    %411 = arith.addf %407, %410 : vector<16x8xf32>
    %c7_238 = arith.constant 7 : index
    %c0_239 = arith.constant 0 : index
    %c0_240 = arith.constant 0 : index
    %412 = vector.load %arg4[%c7_238, %c0_239, %c0_240] : memref<24x32x8xbf16, #tpu.memory_space<vmem>>, vector<1x32x8xbf16>
    %413 = vector.shape_cast %412 : vector<1x32x8xbf16> to vector<32x8xbf16>
    %cst_241 = arith.constant dense<0.000000e+00> : vector<16x8xf32>
    %414 = tpu.matmul %329, %413, %cst_241 {dimension_numbers = #tpu.dot_dimension_numbers<[1], [0], [0], [1], [0, 0, 1, 1], [], []>} : vector<16x32xbf16>, vector<32x8xbf16>, vector<16x8xf32> -> vector<16x8xf32>
    %c7_242 = arith.constant 7 : index
    %c0_243 = arith.constant 0 : index
    %c0_244 = arith.constant 0 : index
    %415 = vector.load %arg5[%c7_242, %c0_243, %c0_244] : memref<24x1x8xf32, #tpu.memory_space<vmem>>, vector<1x1x8xf32>
    %416 = vector.shape_cast %415 : vector<1x1x8xf32> to vector<1x8xf32>
    %417 = vector.broadcast %416 : vector<1x8xf32> to vector<16x8xf32>
    %418 = arith.addf %414, %417 : vector<16x8xf32>
    %c11 = arith.constant 11 : index
    %c0_245 = arith.constant 0 : index
    %c0_246 = arith.constant 0 : index
    %419 = vector.load %arg4[%c11, %c0_245, %c0_246] : memref<24x32x8xbf16, #tpu.memory_space<vmem>>, vector<1x32x8xbf16>
    %420 = vector.shape_cast %419 : vector<1x32x8xbf16> to vector<32x8xbf16>
    %cst_247 = arith.constant dense<0.000000e+00> : vector<16x8xf32>
    %421 = tpu.matmul %329, %420, %cst_247 {dimension_numbers = #tpu.dot_dimension_numbers<[1], [0], [0], [1], [0, 0, 1, 1], [], []>} : vector<16x32xbf16>, vector<32x8xbf16>, vector<16x8xf32> -> vector<16x8xf32>
    %c11_248 = arith.constant 11 : index
    %c0_249 = arith.constant 0 : index
    %c0_250 = arith.constant 0 : index
    %422 = vector.load %arg5[%c11_248, %c0_249, %c0_250] : memref<24x1x8xf32, #tpu.memory_space<vmem>>, vector<1x1x8xf32>
    %423 = vector.shape_cast %422 : vector<1x1x8xf32> to vector<1x8xf32>
    %424 = vector.broadcast %423 : vector<1x8xf32> to vector<16x8xf32>
    %425 = arith.addf %421, %424 : vector<16x8xf32>
    %426 = arith.truncf %411 : vector<16x8xf32> to vector<16x8xbf16>
    %427 = arith.truncf %418 : vector<16x8xf32> to vector<16x8xbf16>
    %cst_251 = arith.constant dense<0.000000e+00> : vector<16x16xf32>
    %428 = tpu.matmul %426, %427, %cst_251 {dimension_numbers = #tpu.dot_dimension_numbers<[1], [1], [0], [0], [0, 0, 1, 0], [], []>} : vector<16x8xbf16>, vector<16x8xbf16>, vector<16x16xf32> -> vector<16x16xf32>
    %429 = arith.truncf %425 : vector<16x8xf32> to vector<16x8xbf16>
    %430 = tpu.concatenate %353, %378, %403, %428 in 0 : vector<16x16xf32>, vector<16x16xf32>, vector<16x16xf32>, vector<16x16xf32> -> vector<64x16xf32>
    %431 = arith.addf %430, %328 : vector<64x16xf32>
    %cst_252 = arith.constant dense<0xFF800000> : vector<64xf32>
    %432 = vector.multi_reduction <maximumf>, %431, %cst_252 [1] : vector<64x16xf32> to vector<64xf32>
    %433 = vector.shape_cast %432 : vector<64xf32> to vector<64x1xf32>
    %434 = vector.broadcast %433 : vector<64x1xf32> to vector<64x16xf32>
    %435 = arith.subf %431, %434 : vector<64x16xf32>
    %436 = math.exp %435 : vector<64x16xf32>
    %cst_253 = arith.constant dense<0.000000e+00> : vector<64xf32>
    %437 = vector.multi_reduction <add>, %436, %cst_253 [1] : vector<64x16xf32> to vector<64xf32>
    %438 = vector.shape_cast %437 : vector<64xf32> to vector<64x1xf32>
    %439 = tpu.reciprocal %438 {approx = true} : vector<64x1xf32> -> vector<64x1xf32>
    %440 = vector.broadcast %439 : vector<64x1xf32> to vector<64x16xf32>
    %441 = arith.mulf %436, %440 : vector<64x16xf32>
    %442 = arith.truncf %441 : vector<64x16xf32> to vector<64x16xbf16>
    %cst_254 = arith.constant 0.000000e+00 : f32
    %443 = vector.broadcast %cst_254 : f32 to vector<16x32xf32>
    %444 = vector.extract_strided_slice %442 {offsets = [0, 0], sizes = [16, 16], strides = [1, 1]} : vector<64x16xbf16> to vector<16x16xbf16>
    %cst_255 = arith.constant dense<0.000000e+00> : vector<16x8xf32>
    %445 = tpu.matmul %444, %354, %cst_255 {dimension_numbers = #tpu.dot_dimension_numbers<[1], [0], [0], [1], [0, 0, 1, 1], [], []>} : vector<16x16xbf16>, vector<16x8xbf16>, vector<16x8xf32> -> vector<16x8xf32>
    %446 = arith.truncf %445 : vector<16x8xf32> to vector<16x8xbf16>
    %c0_256 = arith.constant 0 : index
    %c0_257 = arith.constant 0 : index
    %c0_258 = arith.constant 0 : index
    %447 = vector.load %arg6[%c0_256, %c0_257, %c0_258] : memref<8x8x32xbf16, #tpu.memory_space<vmem>>, vector<1x8x32xbf16>
    %448 = vector.shape_cast %447 : vector<1x8x32xbf16> to vector<8x32xbf16>
    %cst_259 = arith.constant dense<0.000000e+00> : vector<16x32xf32>
    %449 = tpu.matmul %446, %448, %cst_259 {dimension_numbers = #tpu.dot_dimension_numbers<[1], [0], [0], [1], [0, 0, 1, 1], [], []>} : vector<16x8xbf16>, vector<8x32xbf16>, vector<16x32xf32> -> vector<16x32xf32>
    %450 = arith.addf %443, %449 : vector<16x32xf32>
    %451 = vector.extract_strided_slice %442 {offsets = [16, 0], sizes = [16, 16], strides = [1, 1]} : vector<64x16xbf16> to vector<16x16xbf16>
    %cst_260 = arith.constant dense<0.000000e+00> : vector<16x8xf32>
    %452 = tpu.matmul %451, %379, %cst_260 {dimension_numbers = #tpu.dot_dimension_numbers<[1], [0], [0], [1], [0, 0, 1, 1], [], []>} : vector<16x16xbf16>, vector<16x8xbf16>, vector<16x8xf32> -> vector<16x8xf32>
    %453 = arith.truncf %452 : vector<16x8xf32> to vector<16x8xbf16>
    %c1_261 = arith.constant 1 : index
    %c0_262 = arith.constant 0 : index
    %c0_263 = arith.constant 0 : index
    %454 = vector.load %arg6[%c1_261, %c0_262, %c0_263] : memref<8x8x32xbf16, #tpu.memory_space<vmem>>, vector<1x8x32xbf16>
    %455 = vector.shape_cast %454 : vector<1x8x32xbf16> to vector<8x32xbf16>
    %cst_264 = arith.constant dense<0.000000e+00> : vector<16x32xf32>
    %456 = tpu.matmul %453, %455, %cst_264 {dimension_numbers = #tpu.dot_dimension_numbers<[1], [0], [0], [1], [0, 0, 1, 1], [], []>} : vector<16x8xbf16>, vector<8x32xbf16>, vector<16x32xf32> -> vector<16x32xf32>
    %457 = arith.addf %450, %456 : vector<16x32xf32>
    %458 = vector.extract_strided_slice %442 {offsets = [32, 0], sizes = [16, 16], strides = [1, 1]} : vector<64x16xbf16> to vector<16x16xbf16>
    %cst_265 = arith.constant dense<0.000000e+00> : vector<16x8xf32>
    %459 = tpu.matmul %458, %404, %cst_265 {dimension_numbers = #tpu.dot_dimension_numbers<[1], [0], [0], [1], [0, 0, 1, 1], [], []>} : vector<16x16xbf16>, vector<16x8xbf16>, vector<16x8xf32> -> vector<16x8xf32>
    %460 = arith.truncf %459 : vector<16x8xf32> to vector<16x8xbf16>
    %c2_266 = arith.constant 2 : index
    %c0_267 = arith.constant 0 : index
    %c0_268 = arith.constant 0 : index
    %461 = vector.load %arg6[%c2_266, %c0_267, %c0_268] : memref<8x8x32xbf16, #tpu.memory_space<vmem>>, vector<1x8x32xbf16>
    %462 = vector.shape_cast %461 : vector<1x8x32xbf16> to vector<8x32xbf16>
    %cst_269 = arith.constant dense<0.000000e+00> : vector<16x32xf32>
    %463 = tpu.matmul %460, %462, %cst_269 {dimension_numbers = #tpu.dot_dimension_numbers<[1], [0], [0], [1], [0, 0, 1, 1], [], []>} : vector<16x8xbf16>, vector<8x32xbf16>, vector<16x32xf32> -> vector<16x32xf32>
    %464 = arith.addf %457, %463 : vector<16x32xf32>
    %465 = vector.extract_strided_slice %442 {offsets = [48, 0], sizes = [16, 16], strides = [1, 1]} : vector<64x16xbf16> to vector<16x16xbf16>
    %cst_270 = arith.constant dense<0.000000e+00> : vector<16x8xf32>
    %466 = tpu.matmul %465, %429, %cst_270 {dimension_numbers = #tpu.dot_dimension_numbers<[1], [0], [0], [1], [0, 0, 1, 1], [], []>} : vector<16x16xbf16>, vector<16x8xbf16>, vector<16x8xf32> -> vector<16x8xf32>
    %467 = arith.truncf %466 : vector<16x8xf32> to vector<16x8xbf16>
    %c3_271 = arith.constant 3 : index
    %c0_272 = arith.constant 0 : index
    %c0_273 = arith.constant 0 : index
    %468 = vector.load %arg6[%c3_271, %c0_272, %c0_273] : memref<8x8x32xbf16, #tpu.memory_space<vmem>>, vector<1x8x32xbf16>
    %469 = vector.shape_cast %468 : vector<1x8x32xbf16> to vector<8x32xbf16>
    %cst_274 = arith.constant dense<0.000000e+00> : vector<16x32xf32>
    %470 = tpu.matmul %467, %469, %cst_274 {dimension_numbers = #tpu.dot_dimension_numbers<[1], [0], [0], [1], [0, 0, 1, 1], [], []>} : vector<16x8xbf16>, vector<8x32xbf16>, vector<16x32xf32> -> vector<16x32xf32>
    %471 = arith.addf %464, %470 : vector<16x32xf32>
    %c2_275 = arith.constant 2 : index
    %c0_276 = arith.constant 0 : index
    %472 = vector.load %arg9[%c2_275, %c0_276] : memref<18x128xf32, #tpu.memory_space<vmem>>, vector<1x32xf32>
    %473 = vector.broadcast %472 : vector<1x32xf32> to vector<16x32xf32>
    %474 = arith.addf %471, %473 : vector<16x32xf32>
    %475 = arith.addf %474, %116 : vector<16x32xf32>
    %c3_277 = arith.constant 3 : index
    %c0_278 = arith.constant 0 : index
    %476 = vector.load %arg9[%c3_277, %c0_278] : memref<18x128xf32, #tpu.memory_space<vmem>>, vector<1x32xf32>
    %c4_279 = arith.constant 4 : index
    %c0_280 = arith.constant 0 : index
    %477 = vector.load %arg9[%c4_279, %c0_280] : memref<18x128xf32, #tpu.memory_space<vmem>>, vector<1x32xf32>
    %cst_281 = arith.constant dense<0.000000e+00> : vector<16xf32>
    %478 = vector.multi_reduction <add>, %475, %cst_281 [1] : vector<16x32xf32> to vector<16xf32>
    %479 = vector.shape_cast %478 : vector<16xf32> to vector<16x1xf32>
    %cst_282 = arith.constant 3.200000e+01 : f32
    %480 = vector.broadcast %cst_282 : f32 to vector<16x1xf32>
    %481 = arith.divf %479, %480 : vector<16x1xf32>
    %482 = vector.broadcast %481 : vector<16x1xf32> to vector<16x32xf32>
    %483 = arith.subf %475, %482 : vector<16x32xf32>
    %484 = arith.mulf %483, %483 : vector<16x32xf32>
    %cst_283 = arith.constant dense<0.000000e+00> : vector<16xf32>
    %485 = vector.multi_reduction <add>, %484, %cst_283 [1] : vector<16x32xf32> to vector<16xf32>
    %486 = vector.shape_cast %485 : vector<16xf32> to vector<16x1xf32>
    %cst_284 = arith.constant 3.200000e+01 : f32
    %487 = vector.broadcast %cst_284 : f32 to vector<16x1xf32>
    %488 = arith.divf %486, %487 : vector<16x1xf32>
    %489 = vector.broadcast %481 : vector<16x1xf32> to vector<16x32xf32>
    %490 = arith.subf %475, %489 : vector<16x32xf32>
    %cst_285 = arith.constant 9.99999996E-13 : f32
    %491 = vector.broadcast %cst_285 : f32 to vector<16x1xf32>
    %492 = arith.addf %488, %491 : vector<16x1xf32>
    %493 = math.rsqrt %492 : vector<16x1xf32>
    %494 = vector.broadcast %493 : vector<16x1xf32> to vector<16x32xf32>
    %495 = arith.mulf %490, %494 : vector<16x32xf32>
    %496 = vector.broadcast %476 : vector<1x32xf32> to vector<16x32xf32>
    %497 = arith.mulf %495, %496 : vector<16x32xf32>
    %498 = vector.broadcast %477 : vector<1x32xf32> to vector<16x32xf32>
    %499 = arith.addf %497, %498 : vector<16x32xf32>
    %500 = arith.truncf %499 : vector<16x32xf32> to vector<16x32xbf16>
    %c0_286 = arith.constant 0 : index
    %c0_287 = arith.constant 0 : index
    %c0_288 = arith.constant 0 : index
    %501 = vector.load %arg7[%c0_286, %c0_287, %c0_288] : memref<2x32x64xbf16, #tpu.memory_space<vmem>>, vector<1x32x64xbf16>
    %502 = vector.shape_cast %501 : vector<1x32x64xbf16> to vector<32x64xbf16>
    %cst_289 = arith.constant dense<0.000000e+00> : vector<16x64xf32>
    %503 = tpu.matmul %500, %502, %cst_289 {dimension_numbers = #tpu.dot_dimension_numbers<[1], [0], [0], [1], [0, 0, 1, 1], [], []>} : vector<16x32xbf16>, vector<32x64xbf16>, vector<16x64xf32> -> vector<16x64xf32>
    %c5_290 = arith.constant 5 : index
    %c0_291 = arith.constant 0 : index
    %504 = vector.load %arg9[%c5_290, %c0_291] : memref<18x128xf32, #tpu.memory_space<vmem>>, vector<1x64xf32>
    %505 = vector.broadcast %504 : vector<1x64xf32> to vector<16x64xf32>
    %506 = arith.addf %503, %505 : vector<16x64xf32>
    %cst_292 = arith.constant 5.000000e-01 : f32
    %507 = vector.broadcast %cst_292 : f32 to vector<16x64xf32>
    %508 = arith.mulf %507, %506 : vector<16x64xf32>
    %cst_293 = arith.constant 4.471500e-02 : f32
    %509 = vector.broadcast %cst_293 : f32 to vector<16x64xf32>
    %510 = arith.mulf %509, %506 : vector<16x64xf32>
    %511 = arith.mulf %510, %506 : vector<16x64xf32>
    %512 = arith.mulf %511, %506 : vector<16x64xf32>
    %513 = arith.addf %506, %512 : vector<16x64xf32>
    %cst_294 = arith.constant 0.797884583 : f32
    %514 = vector.broadcast %cst_294 : f32 to vector<16x64xf32>
    %515 = arith.mulf %514, %513 : vector<16x64xf32>
    %516 = math.tanh %515 : vector<16x64xf32>
    %cst_295 = arith.constant 1.000000e+00 : f32
    %517 = vector.broadcast %cst_295 : f32 to vector<16x64xf32>
    %518 = arith.addf %517, %516 : vector<16x64xf32>
    %519 = arith.mulf %508, %518 : vector<16x64xf32>
    %520 = arith.truncf %519 : vector<16x64xf32> to vector<16x64xbf16>
    %c0_296 = arith.constant 0 : index
    %c0_297 = arith.constant 0 : index
    %c0_298 = arith.constant 0 : index
    %521 = vector.load %arg8[%c0_296, %c0_297, %c0_298] : memref<2x64x32xbf16, #tpu.memory_space<vmem>>, vector<1x64x32xbf16>
    %522 = vector.shape_cast %521 : vector<1x64x32xbf16> to vector<64x32xbf16>
    %cst_299 = arith.constant dense<0.000000e+00> : vector<16x32xf32>
    %523 = tpu.matmul %520, %522, %cst_299 {dimension_numbers = #tpu.dot_dimension_numbers<[1], [0], [0], [1], [0, 0, 1, 1], [], []>} : vector<16x64xbf16>, vector<64x32xbf16>, vector<16x32xf32> -> vector<16x32xf32>
    %c6_300 = arith.constant 6 : index
    %c0_301 = arith.constant 0 : index
    %524 = vector.load %arg9[%c6_300, %c0_301] : memref<18x128xf32, #tpu.memory_space<vmem>>, vector<1x32xf32>
    %525 = vector.broadcast %524 : vector<1x32xf32> to vector<16x32xf32>
    %526 = arith.addf %523, %525 : vector<16x32xf32>
    %527 = arith.addf %526, %499 : vector<16x32xf32>
    %c7_302 = arith.constant 7 : index
    %c0_303 = arith.constant 0 : index
    %528 = vector.load %arg9[%c7_302, %c0_303] : memref<18x128xf32, #tpu.memory_space<vmem>>, vector<1x32xf32>
    %c8_304 = arith.constant 8 : index
    %c0_305 = arith.constant 0 : index
    %529 = vector.load %arg9[%c8_304, %c0_305] : memref<18x128xf32, #tpu.memory_space<vmem>>, vector<1x32xf32>
    %cst_306 = arith.constant dense<0.000000e+00> : vector<16xf32>
    %530 = vector.multi_reduction <add>, %527, %cst_306 [1] : vector<16x32xf32> to vector<16xf32>
    %531 = vector.shape_cast %530 : vector<16xf32> to vector<16x1xf32>
    %cst_307 = arith.constant 3.200000e+01 : f32
    %532 = vector.broadcast %cst_307 : f32 to vector<16x1xf32>
    %533 = arith.divf %531, %532 : vector<16x1xf32>
    %534 = vector.broadcast %533 : vector<16x1xf32> to vector<16x32xf32>
    %535 = arith.subf %527, %534 : vector<16x32xf32>
    %536 = arith.mulf %535, %535 : vector<16x32xf32>
    %cst_308 = arith.constant dense<0.000000e+00> : vector<16xf32>
    %537 = vector.multi_reduction <add>, %536, %cst_308 [1] : vector<16x32xf32> to vector<16xf32>
    %538 = vector.shape_cast %537 : vector<16xf32> to vector<16x1xf32>
    %cst_309 = arith.constant 3.200000e+01 : f32
    %539 = vector.broadcast %cst_309 : f32 to vector<16x1xf32>
    %540 = arith.divf %538, %539 : vector<16x1xf32>
    %541 = vector.broadcast %533 : vector<16x1xf32> to vector<16x32xf32>
    %542 = arith.subf %527, %541 : vector<16x32xf32>
    %cst_310 = arith.constant 9.99999996E-13 : f32
    %543 = vector.broadcast %cst_310 : f32 to vector<16x1xf32>
    %544 = arith.addf %540, %543 : vector<16x1xf32>
    %545 = math.rsqrt %544 : vector<16x1xf32>
    %546 = vector.broadcast %545 : vector<16x1xf32> to vector<16x32xf32>
    %547 = arith.mulf %542, %546 : vector<16x32xf32>
    %548 = vector.broadcast %528 : vector<1x32xf32> to vector<16x32xf32>
    %549 = arith.mulf %547, %548 : vector<16x32xf32>
    %550 = vector.broadcast %529 : vector<1x32xf32> to vector<16x32xf32>
    %551 = arith.addf %549, %550 : vector<16x32xf32>
    %552 = arith.truncf %551 : vector<16x32xf32> to vector<16x32xbf16>
    %c12 = arith.constant 12 : index
    %c0_311 = arith.constant 0 : index
    %c0_312 = arith.constant 0 : index
    %553 = vector.load %arg4[%c12, %c0_311, %c0_312] : memref<24x32x8xbf16, #tpu.memory_space<vmem>>, vector<1x32x8xbf16>
    %554 = vector.shape_cast %553 : vector<1x32x8xbf16> to vector<32x8xbf16>
    %cst_313 = arith.constant dense<0.000000e+00> : vector<16x8xf32>
    %555 = tpu.matmul %552, %554, %cst_313 {dimension_numbers = #tpu.dot_dimension_numbers<[1], [0], [0], [1], [0, 0, 1, 1], [], []>} : vector<16x32xbf16>, vector<32x8xbf16>, vector<16x8xf32> -> vector<16x8xf32>
    %c12_314 = arith.constant 12 : index
    %c0_315 = arith.constant 0 : index
    %c0_316 = arith.constant 0 : index
    %556 = vector.load %arg5[%c12_314, %c0_315, %c0_316] : memref<24x1x8xf32, #tpu.memory_space<vmem>>, vector<1x1x8xf32>
    %557 = vector.shape_cast %556 : vector<1x1x8xf32> to vector<1x8xf32>
    %558 = vector.broadcast %557 : vector<1x8xf32> to vector<16x8xf32>
    %559 = arith.addf %555, %558 : vector<16x8xf32>
    %c16 = arith.constant 16 : index
    %c0_317 = arith.constant 0 : index
    %c0_318 = arith.constant 0 : index
    %560 = vector.load %arg4[%c16, %c0_317, %c0_318] : memref<24x32x8xbf16, #tpu.memory_space<vmem>>, vector<1x32x8xbf16>
    %561 = vector.shape_cast %560 : vector<1x32x8xbf16> to vector<32x8xbf16>
    %cst_319 = arith.constant dense<0.000000e+00> : vector<16x8xf32>
    %562 = tpu.matmul %552, %561, %cst_319 {dimension_numbers = #tpu.dot_dimension_numbers<[1], [0], [0], [1], [0, 0, 1, 1], [], []>} : vector<16x32xbf16>, vector<32x8xbf16>, vector<16x8xf32> -> vector<16x8xf32>
    %c16_320 = arith.constant 16 : index
    %c0_321 = arith.constant 0 : index
    %c0_322 = arith.constant 0 : index
    %563 = vector.load %arg5[%c16_320, %c0_321, %c0_322] : memref<24x1x8xf32, #tpu.memory_space<vmem>>, vector<1x1x8xf32>
    %564 = vector.shape_cast %563 : vector<1x1x8xf32> to vector<1x8xf32>
    %565 = vector.broadcast %564 : vector<1x8xf32> to vector<16x8xf32>
    %566 = arith.addf %562, %565 : vector<16x8xf32>
    %c20 = arith.constant 20 : index
    %c0_323 = arith.constant 0 : index
    %c0_324 = arith.constant 0 : index
    %567 = vector.load %arg4[%c20, %c0_323, %c0_324] : memref<24x32x8xbf16, #tpu.memory_space<vmem>>, vector<1x32x8xbf16>
    %568 = vector.shape_cast %567 : vector<1x32x8xbf16> to vector<32x8xbf16>
    %cst_325 = arith.constant dense<0.000000e+00> : vector<16x8xf32>
    %569 = tpu.matmul %552, %568, %cst_325 {dimension_numbers = #tpu.dot_dimension_numbers<[1], [0], [0], [1], [0, 0, 1, 1], [], []>} : vector<16x32xbf16>, vector<32x8xbf16>, vector<16x8xf32> -> vector<16x8xf32>
    %c20_326 = arith.constant 20 : index
    %c0_327 = arith.constant 0 : index
    %c0_328 = arith.constant 0 : index
    %570 = vector.load %arg5[%c20_326, %c0_327, %c0_328] : memref<24x1x8xf32, #tpu.memory_space<vmem>>, vector<1x1x8xf32>
    %571 = vector.shape_cast %570 : vector<1x1x8xf32> to vector<1x8xf32>
    %572 = vector.broadcast %571 : vector<1x8xf32> to vector<16x8xf32>
    %573 = arith.addf %569, %572 : vector<16x8xf32>
    %574 = arith.truncf %559 : vector<16x8xf32> to vector<16x8xbf16>
    %575 = arith.truncf %566 : vector<16x8xf32> to vector<16x8xbf16>
    %cst_329 = arith.constant dense<0.000000e+00> : vector<16x16xf32>
    %576 = tpu.matmul %574, %575, %cst_329 {dimension_numbers = #tpu.dot_dimension_numbers<[1], [1], [0], [0], [0, 0, 1, 0], [], []>} : vector<16x8xbf16>, vector<16x8xbf16>, vector<16x16xf32> -> vector<16x16xf32>
    %577 = arith.truncf %573 : vector<16x8xf32> to vector<16x8xbf16>
    %c13 = arith.constant 13 : index
    %c0_330 = arith.constant 0 : index
    %c0_331 = arith.constant 0 : index
    %578 = vector.load %arg4[%c13, %c0_330, %c0_331] : memref<24x32x8xbf16, #tpu.memory_space<vmem>>, vector<1x32x8xbf16>
    %579 = vector.shape_cast %578 : vector<1x32x8xbf16> to vector<32x8xbf16>
    %cst_332 = arith.constant dense<0.000000e+00> : vector<16x8xf32>
    %580 = tpu.matmul %552, %579, %cst_332 {dimension_numbers = #tpu.dot_dimension_numbers<[1], [0], [0], [1], [0, 0, 1, 1], [], []>} : vector<16x32xbf16>, vector<32x8xbf16>, vector<16x8xf32> -> vector<16x8xf32>
    %c13_333 = arith.constant 13 : index
    %c0_334 = arith.constant 0 : index
    %c0_335 = arith.constant 0 : index
    %581 = vector.load %arg5[%c13_333, %c0_334, %c0_335] : memref<24x1x8xf32, #tpu.memory_space<vmem>>, vector<1x1x8xf32>
    %582 = vector.shape_cast %581 : vector<1x1x8xf32> to vector<1x8xf32>
    %583 = vector.broadcast %582 : vector<1x8xf32> to vector<16x8xf32>
    %584 = arith.addf %580, %583 : vector<16x8xf32>
    %c17 = arith.constant 17 : index
    %c0_336 = arith.constant 0 : index
    %c0_337 = arith.constant 0 : index
    %585 = vector.load %arg4[%c17, %c0_336, %c0_337] : memref<24x32x8xbf16, #tpu.memory_space<vmem>>, vector<1x32x8xbf16>
    %586 = vector.shape_cast %585 : vector<1x32x8xbf16> to vector<32x8xbf16>
    %cst_338 = arith.constant dense<0.000000e+00> : vector<16x8xf32>
    %587 = tpu.matmul %552, %586, %cst_338 {dimension_numbers = #tpu.dot_dimension_numbers<[1], [0], [0], [1], [0, 0, 1, 1], [], []>} : vector<16x32xbf16>, vector<32x8xbf16>, vector<16x8xf32> -> vector<16x8xf32>
    %c17_339 = arith.constant 17 : index
    %c0_340 = arith.constant 0 : index
    %c0_341 = arith.constant 0 : index
    %588 = vector.load %arg5[%c17_339, %c0_340, %c0_341] : memref<24x1x8xf32, #tpu.memory_space<vmem>>, vector<1x1x8xf32>
    %589 = vector.shape_cast %588 : vector<1x1x8xf32> to vector<1x8xf32>
    %590 = vector.broadcast %589 : vector<1x8xf32> to vector<16x8xf32>
    %591 = arith.addf %587, %590 : vector<16x8xf32>
    %c21 = arith.constant 21 : index
    %c0_342 = arith.constant 0 : index
    %c0_343 = arith.constant 0 : index
    %592 = vector.load %arg4[%c21, %c0_342, %c0_343] : memref<24x32x8xbf16, #tpu.memory_space<vmem>>, vector<1x32x8xbf16>
    %593 = vector.shape_cast %592 : vector<1x32x8xbf16> to vector<32x8xbf16>
    %cst_344 = arith.constant dense<0.000000e+00> : vector<16x8xf32>
    %594 = tpu.matmul %552, %593, %cst_344 {dimension_numbers = #tpu.dot_dimension_numbers<[1], [0], [0], [1], [0, 0, 1, 1], [], []>} : vector<16x32xbf16>, vector<32x8xbf16>, vector<16x8xf32> -> vector<16x8xf32>
    %c21_345 = arith.constant 21 : index
    %c0_346 = arith.constant 0 : index
    %c0_347 = arith.constant 0 : index
    %595 = vector.load %arg5[%c21_345, %c0_346, %c0_347] : memref<24x1x8xf32, #tpu.memory_space<vmem>>, vector<1x1x8xf32>
    %596 = vector.shape_cast %595 : vector<1x1x8xf32> to vector<1x8xf32>
    %597 = vector.broadcast %596 : vector<1x8xf32> to vector<16x8xf32>
    %598 = arith.addf %594, %597 : vector<16x8xf32>
    %599 = arith.truncf %584 : vector<16x8xf32> to vector<16x8xbf16>
    %600 = arith.truncf %591 : vector<16x8xf32> to vector<16x8xbf16>
    %cst_348 = arith.constant dense<0.000000e+00> : vector<16x16xf32>
    %601 = tpu.matmul %599, %600, %cst_348 {dimension_numbers = #tpu.dot_dimension_numbers<[1], [1], [0], [0], [0, 0, 1, 0], [], []>} : vector<16x8xbf16>, vector<16x8xbf16>, vector<16x16xf32> -> vector<16x16xf32>
    %602 = arith.truncf %598 : vector<16x8xf32> to vector<16x8xbf16>
    %c14 = arith.constant 14 : index
    %c0_349 = arith.constant 0 : index
    %c0_350 = arith.constant 0 : index
    %603 = vector.load %arg4[%c14, %c0_349, %c0_350] : memref<24x32x8xbf16, #tpu.memory_space<vmem>>, vector<1x32x8xbf16>
    %604 = vector.shape_cast %603 : vector<1x32x8xbf16> to vector<32x8xbf16>
    %cst_351 = arith.constant dense<0.000000e+00> : vector<16x8xf32>
    %605 = tpu.matmul %552, %604, %cst_351 {dimension_numbers = #tpu.dot_dimension_numbers<[1], [0], [0], [1], [0, 0, 1, 1], [], []>} : vector<16x32xbf16>, vector<32x8xbf16>, vector<16x8xf32> -> vector<16x8xf32>
    %c14_352 = arith.constant 14 : index
    %c0_353 = arith.constant 0 : index
    %c0_354 = arith.constant 0 : index
    %606 = vector.load %arg5[%c14_352, %c0_353, %c0_354] : memref<24x1x8xf32, #tpu.memory_space<vmem>>, vector<1x1x8xf32>
    %607 = vector.shape_cast %606 : vector<1x1x8xf32> to vector<1x8xf32>
    %608 = vector.broadcast %607 : vector<1x8xf32> to vector<16x8xf32>
    %609 = arith.addf %605, %608 : vector<16x8xf32>
    %c18 = arith.constant 18 : index
    %c0_355 = arith.constant 0 : index
    %c0_356 = arith.constant 0 : index
    %610 = vector.load %arg4[%c18, %c0_355, %c0_356] : memref<24x32x8xbf16, #tpu.memory_space<vmem>>, vector<1x32x8xbf16>
    %611 = vector.shape_cast %610 : vector<1x32x8xbf16> to vector<32x8xbf16>
    %cst_357 = arith.constant dense<0.000000e+00> : vector<16x8xf32>
    %612 = tpu.matmul %552, %611, %cst_357 {dimension_numbers = #tpu.dot_dimension_numbers<[1], [0], [0], [1], [0, 0, 1, 1], [], []>} : vector<16x32xbf16>, vector<32x8xbf16>, vector<16x8xf32> -> vector<16x8xf32>
    %c18_358 = arith.constant 18 : index
    %c0_359 = arith.constant 0 : index
    %c0_360 = arith.constant 0 : index
    %613 = vector.load %arg5[%c18_358, %c0_359, %c0_360] : memref<24x1x8xf32, #tpu.memory_space<vmem>>, vector<1x1x8xf32>
    %614 = vector.shape_cast %613 : vector<1x1x8xf32> to vector<1x8xf32>
    %615 = vector.broadcast %614 : vector<1x8xf32> to vector<16x8xf32>
    %616 = arith.addf %612, %615 : vector<16x8xf32>
    %c22 = arith.constant 22 : index
    %c0_361 = arith.constant 0 : index
    %c0_362 = arith.constant 0 : index
    %617 = vector.load %arg4[%c22, %c0_361, %c0_362] : memref<24x32x8xbf16, #tpu.memory_space<vmem>>, vector<1x32x8xbf16>
    %618 = vector.shape_cast %617 : vector<1x32x8xbf16> to vector<32x8xbf16>
    %cst_363 = arith.constant dense<0.000000e+00> : vector<16x8xf32>
    %619 = tpu.matmul %552, %618, %cst_363 {dimension_numbers = #tpu.dot_dimension_numbers<[1], [0], [0], [1], [0, 0, 1, 1], [], []>} : vector<16x32xbf16>, vector<32x8xbf16>, vector<16x8xf32> -> vector<16x8xf32>
    %c22_364 = arith.constant 22 : index
    %c0_365 = arith.constant 0 : index
    %c0_366 = arith.constant 0 : index
    %620 = vector.load %arg5[%c22_364, %c0_365, %c0_366] : memref<24x1x8xf32, #tpu.memory_space<vmem>>, vector<1x1x8xf32>
    %621 = vector.shape_cast %620 : vector<1x1x8xf32> to vector<1x8xf32>
    %622 = vector.broadcast %621 : vector<1x8xf32> to vector<16x8xf32>
    %623 = arith.addf %619, %622 : vector<16x8xf32>
    %624 = arith.truncf %609 : vector<16x8xf32> to vector<16x8xbf16>
    %625 = arith.truncf %616 : vector<16x8xf32> to vector<16x8xbf16>
    %cst_367 = arith.constant dense<0.000000e+00> : vector<16x16xf32>
    %626 = tpu.matmul %624, %625, %cst_367 {dimension_numbers = #tpu.dot_dimension_numbers<[1], [1], [0], [0], [0, 0, 1, 0], [], []>} : vector<16x8xbf16>, vector<16x8xbf16>, vector<16x16xf32> -> vector<16x16xf32>
    %627 = arith.truncf %623 : vector<16x8xf32> to vector<16x8xbf16>
    %c15 = arith.constant 15 : index
    %c0_368 = arith.constant 0 : index
    %c0_369 = arith.constant 0 : index
    %628 = vector.load %arg4[%c15, %c0_368, %c0_369] : memref<24x32x8xbf16, #tpu.memory_space<vmem>>, vector<1x32x8xbf16>
    %629 = vector.shape_cast %628 : vector<1x32x8xbf16> to vector<32x8xbf16>
    %cst_370 = arith.constant dense<0.000000e+00> : vector<16x8xf32>
    %630 = tpu.matmul %552, %629, %cst_370 {dimension_numbers = #tpu.dot_dimension_numbers<[1], [0], [0], [1], [0, 0, 1, 1], [], []>} : vector<16x32xbf16>, vector<32x8xbf16>, vector<16x8xf32> -> vector<16x8xf32>
    %c15_371 = arith.constant 15 : index
    %c0_372 = arith.constant 0 : index
    %c0_373 = arith.constant 0 : index
    %631 = vector.load %arg5[%c15_371, %c0_372, %c0_373] : memref<24x1x8xf32, #tpu.memory_space<vmem>>, vector<1x1x8xf32>
    %632 = vector.shape_cast %631 : vector<1x1x8xf32> to vector<1x8xf32>
    %633 = vector.broadcast %632 : vector<1x8xf32> to vector<16x8xf32>
    %634 = arith.addf %630, %633 : vector<16x8xf32>
    %c19 = arith.constant 19 : index
    %c0_374 = arith.constant 0 : index
    %c0_375 = arith.constant 0 : index
    %635 = vector.load %arg4[%c19, %c0_374, %c0_375] : memref<24x32x8xbf16, #tpu.memory_space<vmem>>, vector<1x32x8xbf16>
    %636 = vector.shape_cast %635 : vector<1x32x8xbf16> to vector<32x8xbf16>
    %cst_376 = arith.constant dense<0.000000e+00> : vector<16x8xf32>
    %637 = tpu.matmul %552, %636, %cst_376 {dimension_numbers = #tpu.dot_dimension_numbers<[1], [0], [0], [1], [0, 0, 1, 1], [], []>} : vector<16x32xbf16>, vector<32x8xbf16>, vector<16x8xf32> -> vector<16x8xf32>
    %c19_377 = arith.constant 19 : index
    %c0_378 = arith.constant 0 : index
    %c0_379 = arith.constant 0 : index
    %638 = vector.load %arg5[%c19_377, %c0_378, %c0_379] : memref<24x1x8xf32, #tpu.memory_space<vmem>>, vector<1x1x8xf32>
    %639 = vector.shape_cast %638 : vector<1x1x8xf32> to vector<1x8xf32>
    %640 = vector.broadcast %639 : vector<1x8xf32> to vector<16x8xf32>
    %641 = arith.addf %637, %640 : vector<16x8xf32>
    %c23 = arith.constant 23 : index
    %c0_380 = arith.constant 0 : index
    %c0_381 = arith.constant 0 : index
    %642 = vector.load %arg4[%c23, %c0_380, %c0_381] : memref<24x32x8xbf16, #tpu.memory_space<vmem>>, vector<1x32x8xbf16>
    %643 = vector.shape_cast %642 : vector<1x32x8xbf16> to vector<32x8xbf16>
    %cst_382 = arith.constant dense<0.000000e+00> : vector<16x8xf32>
    %644 = tpu.matmul %552, %643, %cst_382 {dimension_numbers = #tpu.dot_dimension_numbers<[1], [0], [0], [1], [0, 0, 1, 1], [], []>} : vector<16x32xbf16>, vector<32x8xbf16>, vector<16x8xf32> -> vector<16x8xf32>
    %c23_383 = arith.constant 23 : index
    %c0_384 = arith.constant 0 : index
    %c0_385 = arith.constant 0 : index
    %645 = vector.load %arg5[%c23_383, %c0_384, %c0_385] : memref<24x1x8xf32, #tpu.memory_space<vmem>>, vector<1x1x8xf32>
    %646 = vector.shape_cast %645 : vector<1x1x8xf32> to vector<1x8xf32>
    %647 = vector.broadcast %646 : vector<1x8xf32> to vector<16x8xf32>
    %648 = arith.addf %644, %647 : vector<16x8xf32>
    %649 = arith.truncf %634 : vector<16x8xf32> to vector<16x8xbf16>
    %650 = arith.truncf %641 : vector<16x8xf32> to vector<16x8xbf16>
    %cst_386 = arith.constant dense<0.000000e+00> : vector<16x16xf32>
    %651 = tpu.matmul %649, %650, %cst_386 {dimension_numbers = #tpu.dot_dimension_numbers<[1], [1], [0], [0], [0, 0, 1, 0], [], []>} : vector<16x8xbf16>, vector<16x8xbf16>, vector<16x16xf32> -> vector<16x16xf32>
    %652 = arith.truncf %648 : vector<16x8xf32> to vector<16x8xbf16>
    %653 = tpu.concatenate %576, %601, %626, %651 in 0 : vector<16x16xf32>, vector<16x16xf32>, vector<16x16xf32>, vector<16x16xf32> -> vector<64x16xf32>
    %654 = arith.addf %653, %328 : vector<64x16xf32>
    %cst_387 = arith.constant dense<0xFF800000> : vector<64xf32>
    %655 = vector.multi_reduction <maximumf>, %654, %cst_387 [1] : vector<64x16xf32> to vector<64xf32>
    %656 = vector.shape_cast %655 : vector<64xf32> to vector<64x1xf32>
    %657 = vector.broadcast %656 : vector<64x1xf32> to vector<64x16xf32>
    %658 = arith.subf %654, %657 : vector<64x16xf32>
    %659 = math.exp %658 : vector<64x16xf32>
    %cst_388 = arith.constant dense<0.000000e+00> : vector<64xf32>
    %660 = vector.multi_reduction <add>, %659, %cst_388 [1] : vector<64x16xf32> to vector<64xf32>
    %661 = vector.shape_cast %660 : vector<64xf32> to vector<64x1xf32>
    %662 = tpu.reciprocal %661 {approx = true} : vector<64x1xf32> -> vector<64x1xf32>
    %663 = vector.broadcast %662 : vector<64x1xf32> to vector<64x16xf32>
    %664 = arith.mulf %659, %663 : vector<64x16xf32>
    %665 = arith.truncf %664 : vector<64x16xf32> to vector<64x16xbf16>
    %cst_389 = arith.constant 0.000000e+00 : f32
    %666 = vector.broadcast %cst_389 : f32 to vector<16x32xf32>
    %667 = vector.extract_strided_slice %665 {offsets = [0, 0], sizes = [16, 16], strides = [1, 1]} : vector<64x16xbf16> to vector<16x16xbf16>
    %cst_390 = arith.constant dense<0.000000e+00> : vector<16x8xf32>
    %668 = tpu.matmul %667, %577, %cst_390 {dimension_numbers = #tpu.dot_dimension_numbers<[1], [0], [0], [1], [0, 0, 1, 1], [], []>} : vector<16x16xbf16>, vector<16x8xbf16>, vector<16x8xf32> -> vector<16x8xf32>
    %669 = arith.truncf %668 : vector<16x8xf32> to vector<16x8xbf16>
    %c4_391 = arith.constant 4 : index
    %c0_392 = arith.constant 0 : index
    %c0_393 = arith.constant 0 : index
    %670 = vector.load %arg6[%c4_391, %c0_392, %c0_393] : memref<8x8x32xbf16, #tpu.memory_space<vmem>>, vector<1x8x32xbf16>
    %671 = vector.shape_cast %670 : vector<1x8x32xbf16> to vector<8x32xbf16>
    %cst_394 = arith.constant dense<0.000000e+00> : vector<16x32xf32>
    %672 = tpu.matmul %669, %671, %cst_394 {dimension_numbers = #tpu.dot_dimension_numbers<[1], [0], [0], [1], [0, 0, 1, 1], [], []>} : vector<16x8xbf16>, vector<8x32xbf16>, vector<16x32xf32> -> vector<16x32xf32>
    %673 = arith.addf %666, %672 : vector<16x32xf32>
    %674 = vector.extract_strided_slice %665 {offsets = [16, 0], sizes = [16, 16], strides = [1, 1]} : vector<64x16xbf16> to vector<16x16xbf16>
    %cst_395 = arith.constant dense<0.000000e+00> : vector<16x8xf32>
    %675 = tpu.matmul %674, %602, %cst_395 {dimension_numbers = #tpu.dot_dimension_numbers<[1], [0], [0], [1], [0, 0, 1, 1], [], []>} : vector<16x16xbf16>, vector<16x8xbf16>, vector<16x8xf32> -> vector<16x8xf32>
    %676 = arith.truncf %675 : vector<16x8xf32> to vector<16x8xbf16>
    %c5_396 = arith.constant 5 : index
    %c0_397 = arith.constant 0 : index
    %c0_398 = arith.constant 0 : index
    %677 = vector.load %arg6[%c5_396, %c0_397, %c0_398] : memref<8x8x32xbf16, #tpu.memory_space<vmem>>, vector<1x8x32xbf16>
    %678 = vector.shape_cast %677 : vector<1x8x32xbf16> to vector<8x32xbf16>
    %cst_399 = arith.constant dense<0.000000e+00> : vector<16x32xf32>
    %679 = tpu.matmul %676, %678, %cst_399 {dimension_numbers = #tpu.dot_dimension_numbers<[1], [0], [0], [1], [0, 0, 1, 1], [], []>} : vector<16x8xbf16>, vector<8x32xbf16>, vector<16x32xf32> -> vector<16x32xf32>
    %680 = arith.addf %673, %679 : vector<16x32xf32>
    %681 = vector.extract_strided_slice %665 {offsets = [32, 0], sizes = [16, 16], strides = [1, 1]} : vector<64x16xbf16> to vector<16x16xbf16>
    %cst_400 = arith.constant dense<0.000000e+00> : vector<16x8xf32>
    %682 = tpu.matmul %681, %627, %cst_400 {dimension_numbers = #tpu.dot_dimension_numbers<[1], [0], [0], [1], [0, 0, 1, 1], [], []>} : vector<16x16xbf16>, vector<16x8xbf16>, vector<16x8xf32> -> vector<16x8xf32>
    %683 = arith.truncf %682 : vector<16x8xf32> to vector<16x8xbf16>
    %c6_401 = arith.constant 6 : index
    %c0_402 = arith.constant 0 : index
    %c0_403 = arith.constant 0 : index
    %684 = vector.load %arg6[%c6_401, %c0_402, %c0_403] : memref<8x8x32xbf16, #tpu.memory_space<vmem>>, vector<1x8x32xbf16>
    %685 = vector.shape_cast %684 : vector<1x8x32xbf16> to vector<8x32xbf16>
    %cst_404 = arith.constant dense<0.000000e+00> : vector<16x32xf32>
    %686 = tpu.matmul %683, %685, %cst_404 {dimension_numbers = #tpu.dot_dimension_numbers<[1], [0], [0], [1], [0, 0, 1, 1], [], []>} : vector<16x8xbf16>, vector<8x32xbf16>, vector<16x32xf32> -> vector<16x32xf32>
    %687 = arith.addf %680, %686 : vector<16x32xf32>
    %688 = vector.extract_strided_slice %665 {offsets = [48, 0], sizes = [16, 16], strides = [1, 1]} : vector<64x16xbf16> to vector<16x16xbf16>
    %cst_405 = arith.constant dense<0.000000e+00> : vector<16x8xf32>
    %689 = tpu.matmul %688, %652, %cst_405 {dimension_numbers = #tpu.dot_dimension_numbers<[1], [0], [0], [1], [0, 0, 1, 1], [], []>} : vector<16x16xbf16>, vector<16x8xbf16>, vector<16x8xf32> -> vector<16x8xf32>
    %690 = arith.truncf %689 : vector<16x8xf32> to vector<16x8xbf16>
    %c7_406 = arith.constant 7 : index
    %c0_407 = arith.constant 0 : index
    %c0_408 = arith.constant 0 : index
    %691 = vector.load %arg6[%c7_406, %c0_407, %c0_408] : memref<8x8x32xbf16, #tpu.memory_space<vmem>>, vector<1x8x32xbf16>
    %692 = vector.shape_cast %691 : vector<1x8x32xbf16> to vector<8x32xbf16>
    %cst_409 = arith.constant dense<0.000000e+00> : vector<16x32xf32>
    %693 = tpu.matmul %690, %692, %cst_409 {dimension_numbers = #tpu.dot_dimension_numbers<[1], [0], [0], [1], [0, 0, 1, 1], [], []>} : vector<16x8xbf16>, vector<8x32xbf16>, vector<16x32xf32> -> vector<16x32xf32>
    %694 = arith.addf %687, %693 : vector<16x32xf32>
    %c9_410 = arith.constant 9 : index
    %c0_411 = arith.constant 0 : index
    %695 = vector.load %arg9[%c9_410, %c0_411] : memref<18x128xf32, #tpu.memory_space<vmem>>, vector<1x32xf32>
    %696 = vector.broadcast %695 : vector<1x32xf32> to vector<16x32xf32>
    %697 = arith.addf %694, %696 : vector<16x32xf32>
    %698 = arith.addf %697, %551 : vector<16x32xf32>
    %c10_412 = arith.constant 10 : index
    %c0_413 = arith.constant 0 : index
    %699 = vector.load %arg9[%c10_412, %c0_413] : memref<18x128xf32, #tpu.memory_space<vmem>>, vector<1x32xf32>
    %c11_414 = arith.constant 11 : index
    %c0_415 = arith.constant 0 : index
    %700 = vector.load %arg9[%c11_414, %c0_415] : memref<18x128xf32, #tpu.memory_space<vmem>>, vector<1x32xf32>
    %cst_416 = arith.constant dense<0.000000e+00> : vector<16xf32>
    %701 = vector.multi_reduction <add>, %698, %cst_416 [1] : vector<16x32xf32> to vector<16xf32>
    %702 = vector.shape_cast %701 : vector<16xf32> to vector<16x1xf32>
    %cst_417 = arith.constant 3.200000e+01 : f32
    %703 = vector.broadcast %cst_417 : f32 to vector<16x1xf32>
    %704 = arith.divf %702, %703 : vector<16x1xf32>
    %705 = vector.broadcast %704 : vector<16x1xf32> to vector<16x32xf32>
    %706 = arith.subf %698, %705 : vector<16x32xf32>
    %707 = arith.mulf %706, %706 : vector<16x32xf32>
    %cst_418 = arith.constant dense<0.000000e+00> : vector<16xf32>
    %708 = vector.multi_reduction <add>, %707, %cst_418 [1] : vector<16x32xf32> to vector<16xf32>
    %709 = vector.shape_cast %708 : vector<16xf32> to vector<16x1xf32>
    %cst_419 = arith.constant 3.200000e+01 : f32
    %710 = vector.broadcast %cst_419 : f32 to vector<16x1xf32>
    %711 = arith.divf %709, %710 : vector<16x1xf32>
    %712 = vector.broadcast %704 : vector<16x1xf32> to vector<16x32xf32>
    %713 = arith.subf %698, %712 : vector<16x32xf32>
    %cst_420 = arith.constant 9.99999996E-13 : f32
    %714 = vector.broadcast %cst_420 : f32 to vector<16x1xf32>
    %715 = arith.addf %711, %714 : vector<16x1xf32>
    %716 = math.rsqrt %715 : vector<16x1xf32>
    %717 = vector.broadcast %716 : vector<16x1xf32> to vector<16x32xf32>
    %718 = arith.mulf %713, %717 : vector<16x32xf32>
    %719 = vector.broadcast %699 : vector<1x32xf32> to vector<16x32xf32>
    %720 = arith.mulf %718, %719 : vector<16x32xf32>
    %721 = vector.broadcast %700 : vector<1x32xf32> to vector<16x32xf32>
    %722 = arith.addf %720, %721 : vector<16x32xf32>
    %723 = arith.truncf %722 : vector<16x32xf32> to vector<16x32xbf16>
    %c1_421 = arith.constant 1 : index
    %c0_422 = arith.constant 0 : index
    %c0_423 = arith.constant 0 : index
    %724 = vector.load %arg7[%c1_421, %c0_422, %c0_423] : memref<2x32x64xbf16, #tpu.memory_space<vmem>>, vector<1x32x64xbf16>
    %725 = vector.shape_cast %724 : vector<1x32x64xbf16> to vector<32x64xbf16>
    %cst_424 = arith.constant dense<0.000000e+00> : vector<16x64xf32>
    %726 = tpu.matmul %723, %725, %cst_424 {dimension_numbers = #tpu.dot_dimension_numbers<[1], [0], [0], [1], [0, 0, 1, 1], [], []>} : vector<16x32xbf16>, vector<32x64xbf16>, vector<16x64xf32> -> vector<16x64xf32>
    %c12_425 = arith.constant 12 : index
    %c0_426 = arith.constant 0 : index
    %727 = vector.load %arg9[%c12_425, %c0_426] : memref<18x128xf32, #tpu.memory_space<vmem>>, vector<1x64xf32>
    %728 = vector.broadcast %727 : vector<1x64xf32> to vector<16x64xf32>
    %729 = arith.addf %726, %728 : vector<16x64xf32>
    %cst_427 = arith.constant 5.000000e-01 : f32
    %730 = vector.broadcast %cst_427 : f32 to vector<16x64xf32>
    %731 = arith.mulf %730, %729 : vector<16x64xf32>
    %cst_428 = arith.constant 4.471500e-02 : f32
    %732 = vector.broadcast %cst_428 : f32 to vector<16x64xf32>
    %733 = arith.mulf %732, %729 : vector<16x64xf32>
    %734 = arith.mulf %733, %729 : vector<16x64xf32>
    %735 = arith.mulf %734, %729 : vector<16x64xf32>
    %736 = arith.addf %729, %735 : vector<16x64xf32>
    %cst_429 = arith.constant 0.797884583 : f32
    %737 = vector.broadcast %cst_429 : f32 to vector<16x64xf32>
    %738 = arith.mulf %737, %736 : vector<16x64xf32>
    %739 = math.tanh %738 : vector<16x64xf32>
    %cst_430 = arith.constant 1.000000e+00 : f32
    %740 = vector.broadcast %cst_430 : f32 to vector<16x64xf32>
    %741 = arith.addf %740, %739 : vector<16x64xf32>
    %742 = arith.mulf %731, %741 : vector<16x64xf32>
    %743 = arith.truncf %742 : vector<16x64xf32> to vector<16x64xbf16>
    %c1_431 = arith.constant 1 : index
    %c0_432 = arith.constant 0 : index
    %c0_433 = arith.constant 0 : index
    %744 = vector.load %arg8[%c1_431, %c0_432, %c0_433] : memref<2x64x32xbf16, #tpu.memory_space<vmem>>, vector<1x64x32xbf16>
    %745 = vector.shape_cast %744 : vector<1x64x32xbf16> to vector<64x32xbf16>
    %cst_434 = arith.constant dense<0.000000e+00> : vector<16x32xf32>
    %746 = tpu.matmul %743, %745, %cst_434 {dimension_numbers = #tpu.dot_dimension_numbers<[1], [0], [0], [1], [0, 0, 1, 1], [], []>} : vector<16x64xbf16>, vector<64x32xbf16>, vector<16x32xf32> -> vector<16x32xf32>
    %c13_435 = arith.constant 13 : index
    %c0_436 = arith.constant 0 : index
    %747 = vector.load %arg9[%c13_435, %c0_436] : memref<18x128xf32, #tpu.memory_space<vmem>>, vector<1x32xf32>
    %748 = vector.broadcast %747 : vector<1x32xf32> to vector<16x32xf32>
    %749 = arith.addf %746, %748 : vector<16x32xf32>
    %750 = arith.addf %749, %722 : vector<16x32xf32>
    %c14_437 = arith.constant 14 : index
    %c0_438 = arith.constant 0 : index
    %751 = vector.load %arg9[%c14_437, %c0_438] : memref<18x128xf32, #tpu.memory_space<vmem>>, vector<1x32xf32>
    %c15_439 = arith.constant 15 : index
    %c0_440 = arith.constant 0 : index
    %752 = vector.load %arg9[%c15_439, %c0_440] : memref<18x128xf32, #tpu.memory_space<vmem>>, vector<1x32xf32>
    %cst_441 = arith.constant dense<0.000000e+00> : vector<16xf32>
    %753 = vector.multi_reduction <add>, %750, %cst_441 [1] : vector<16x32xf32> to vector<16xf32>
    %754 = vector.shape_cast %753 : vector<16xf32> to vector<16x1xf32>
    %cst_442 = arith.constant 3.200000e+01 : f32
    %755 = vector.broadcast %cst_442 : f32 to vector<16x1xf32>
    %756 = arith.divf %754, %755 : vector<16x1xf32>
    %757 = vector.broadcast %756 : vector<16x1xf32> to vector<16x32xf32>
    %758 = arith.subf %750, %757 : vector<16x32xf32>
    %759 = arith.mulf %758, %758 : vector<16x32xf32>
    %cst_443 = arith.constant dense<0.000000e+00> : vector<16xf32>
    %760 = vector.multi_reduction <add>, %759, %cst_443 [1] : vector<16x32xf32> to vector<16xf32>
    %761 = vector.shape_cast %760 : vector<16xf32> to vector<16x1xf32>
    %cst_444 = arith.constant 3.200000e+01 : f32
    %762 = vector.broadcast %cst_444 : f32 to vector<16x1xf32>
    %763 = arith.divf %761, %762 : vector<16x1xf32>
    %764 = vector.broadcast %756 : vector<16x1xf32> to vector<16x32xf32>
    %765 = arith.subf %750, %764 : vector<16x32xf32>
    %cst_445 = arith.constant 9.99999996E-13 : f32
    %766 = vector.broadcast %cst_445 : f32 to vector<16x1xf32>
    %767 = arith.addf %763, %766 : vector<16x1xf32>
    %768 = math.rsqrt %767 : vector<16x1xf32>
    %769 = vector.broadcast %768 : vector<16x1xf32> to vector<16x32xf32>
    %770 = arith.mulf %765, %769 : vector<16x32xf32>
    %771 = vector.broadcast %751 : vector<1x32xf32> to vector<16x32xf32>
    %772 = arith.mulf %770, %771 : vector<16x32xf32>
    %773 = vector.broadcast %752 : vector<1x32xf32> to vector<16x32xf32>
    %774 = arith.addf %772, %773 : vector<16x32xf32>
    %775 = vector.extract_strided_slice %774 {offsets = [0, 0], sizes = [1, 32], strides = [1, 1]} : vector<16x32xf32> to vector<1x32xf32>
    %776 = vector.extract_strided_slice %774 {offsets = [8, 0], sizes = [1, 32], strides = [1, 1]} : vector<16x32xf32> to vector<1x32xf32>
    %777 = tpu.concatenate %775, %776 in 0 : vector<1x32xf32>, vector<1x32xf32> -> vector<2x32xf32>
    %778 = arith.truncf %777 : vector<2x32xf32> to vector<2x32xbf16>
    %c0_446 = arith.constant 0 : index
    %c0_447 = arith.constant 0 : index
    %779 = vector.load %arg10[%c0_446, %c0_447] : memref<32x32xbf16, #tpu.memory_space<vmem>>, vector<32x32xbf16>
    %cst_448 = arith.constant dense<0.000000e+00> : vector<2x32xf32>
    %780 = tpu.matmul %778, %779, %cst_448 {dimension_numbers = #tpu.dot_dimension_numbers<[1], [0], [0], [1], [0, 0, 1, 1], [], []>} : vector<2x32xbf16>, vector<32x32xbf16>, vector<2x32xf32> -> vector<2x32xf32>
    %c16_449 = arith.constant 16 : index
    %c0_450 = arith.constant 0 : index
    %781 = vector.load %arg9[%c16_449, %c0_450] : memref<18x128xf32, #tpu.memory_space<vmem>>, vector<1x32xf32>
    %782 = vector.broadcast %781 : vector<1x32xf32> to vector<2x32xf32>
    %783 = arith.addf %780, %782 : vector<2x32xf32>
    %784 = math.tanh %783 : vector<2x32xf32>
    %785 = arith.truncf %784 : vector<2x32xf32> to vector<2x32xbf16>
    %c0_451 = arith.constant 0 : index
    %c0_452 = arith.constant 0 : index
    %786 = vector.load %arg11[%c0_451, %c0_452] : memref<32x128xbf16, #tpu.memory_space<vmem>>, vector<32x128xbf16>
    %cst_453 = arith.constant dense<0.000000e+00> : vector<2x128xf32>
    %787 = tpu.matmul %785, %786, %cst_453 {dimension_numbers = #tpu.dot_dimension_numbers<[1], [0], [0], [1], [0, 0, 1, 1], [], []>} : vector<2x32xbf16>, vector<32x128xbf16>, vector<2x128xf32> -> vector<2x128xf32>
    %c17_454 = arith.constant 17 : index
    %c0_455 = arith.constant 0 : index
    %788 = vector.load %arg9[%c17_454, %c0_455] : memref<18x128xf32, #tpu.memory_space<vmem>>, vector<1x128xf32>
    %789 = vector.broadcast %788 : vector<1x128xf32> to vector<2x128xf32>
    %790 = arith.addf %787, %789 : vector<2x128xf32>
    %c0_456 = arith.constant 0 : index
    %c0_457 = arith.constant 0 : index
    %791 = vector.load %arg12[%c0_456, %c0_457] : memref<2x128xf32, #tpu.memory_space<vmem>>, vector<2x128xf32>
    tpu.vector_store %arg12[%c0_456, %c0_457], %790 {strides = array<i32>} : memref<2x128xf32, #tpu.memory_space<vmem>>, vector<2x128xf32>,
    return
  }
}

</mosaic_0001>

<bundles_post_ra>
// kernel: baseline_bert_classifier.1
= control target key start
LH: loop header
LB: loop body
LE: loop exit
PB: predicated region body
PF: predicated region fallthrough
CT: control target
= control target key end

     0   :  { %17 = vsyncpa [#allocation4], 0  ;;  %s6336_s0 = inlined_call_operand.vmem [shape: s32[2,8], index: 0, kind: input, shape index: {}]   ;;  %s6337_s1 = inlined_call_operand.vmem [shape: s32[2,8], index: 1, kind: input, shape index: {}]   ;;  %s6338_s2 = inlined_call_operand.vmem [shape: bf16[128,32], index: 2, kind: input, shape index: {}]   ;;  %s6339_s3 = inlined_call_operand.vmem [shape: f32[8,32], index: 3, kind: input, shape index: {}]   ;;  %s6340_s4 = inlined_call_operand.vmem [shape: bf16[24,32,8], index: 4, kind: input, shape index: {}]   ;;  %s6341_s5 = inlined_call_operand.vmem [shape: f32[24,1,8], index: 5, kind: input, shape index: {}]   ;;  %s6342_s6 = inlined_call_operand.vmem [shape: bf16[8,8,32], index: 6, kind: input, shape index: {}]   ;;  %s6343_s7 = inlined_call_operand.vmem [shape: bf16[2,32,64], index: 7, kind: input, shape index: {}]   ;;  %s6344_s8 = inlined_call_operand.vmem [shape: bf16[2,64,32], index: 8, kind: input, shape index: {}]   ;;  %s6345_s9 = inlined_call_operand.vmem [shape: f32[18,128], index: 9, kind: input, shape index: {}]   ;;  %s6346_s10 = inlined_call_operand.vmem [shape: bf16[32,32], index: 10, kind: input, shape index: {}]   ;;  %s6347_s11 = inlined_call_operand.vmem [shape: bf16[32,128], index: 11, kind: input, shape index: {}]   ;;  %s6348_s12 = inlined_call_operand.hbm [shape: f32[2,128], index: 12, kind: output, shape index: {}]  }
   0x1   :  { %18 = vsyncpa [#allocation6], 0 }
   0x2   :  { %19 = vsyncpa [#allocation3], 0  ;;  %s26_s23 = sshll.u32 %s6336_s0, 4  ;;  %s36_s26 = sshll.u32 %s6337_s1, 4  ;;  %s27_s23 = int_to_ptr.vmem [resolvable:$true] %s26_s23  ;;  %s37_s26 = int_to_ptr.vmem [resolvable:$true] %s36_s26 }
   0x3   :  { %s5197_s27 = scalar_lea.vmem %s27_s23, 32  ;;  %p5202_p1 = scmp.lt.s32.totalorder %s27_s23, %s27_s23 }
   0x4   :  { %p5198_p0 = scmp.ne.s32.totalorder %s27_s23, %s5197_s27  ;;  %p5203_p2 = scmp.lt.s32.totalorder %s5197_s27, %s5197_s27 }
   0x6   :  { %p5204_p3 = por %p5203_p2, %p5202_p1 }
   0x8   :  { %p5205_p4 = pnand %p5204_p3, %p5198_p0 }
   0xa   :  { %5208 = shalt.err (!%p5205_p4)
}
   0xb   :  { %s5247_s28 = smov [#allocation2]   ;;  %s5209_s29 = scalar_lea.vmem %s37_s26, 32 }
   0xc   :  { %29 = dma.vmem_to_smem %s27_s23, 32, %s5247_s28, [#allocation4]  }
   0xd   :  { %p5210_p5 = scmp.ne.s32.totalorder %s37_s26, %s5209_s29  ;;  %p5214_p6 = scmp.lt.s32.totalorder %s37_s26, %s37_s26 }
   0xe   :  { %p5215_p7 = scmp.lt.s32.totalorder %s5209_s29, %s5209_s29 }
  0x10   :  { %p5216_p8 = por %p5215_p7, %p5214_p6 }
  0x12   :  { %p5217_p9 = pnand %p5216_p8, %p5210_p5 }
  0x14   :  { %5220 = shalt.err (!%p5217_p9)
}
  0x15   :  { %s5248_s0 = smov [#allocation5]  }
  0x16   :  { %39 = dma.vmem_to_smem %s37_s26, 32, %s5248_s0, [#allocation6]  }
  0x17   :  { %5241 = dma.done.wait [#allocation4], 32  }
  0x18   :  { %5242 = vsyncadd [#allocation4], 4294967264 }
  0x19   :  { %5243 = dma.done.wait [#allocation6], 32  }
  0x1a   :  { %5244 = vsyncadd [#allocation6], 4294967264 }
  0x1b   :  { %66 = sfence }
  0x1c   :  { %v5031_v0 = vld [vmem:[%s6338_s2 + $0x38] sm:$0xff]   ;;  %v68_v1 = vlaneseq  ;;  %v5249_v2 = vmov 0.0   ;;  %v5032_v3 = vld [vmem:[%s6338_s2 + $0x30] sm:$0xff]   ;;  %vm5250_vm0 = vmmov 0   ;;  %v5033_v5 = vld [vmem:[%s6338_s2 + $0x28] sm:$0xff]   ;;  %s73_s17 = sld [smem:[#allocation2]] }
  0x1d   :  { %4613 = vmatprep.subr.bf16.mxu0 %v5249_v2  ;;  %4633 = vmatprep.subr.bf16.mxu1 %v5249_v2  ;;  %v5034_v7 = vld [vmem:[%s6338_s2 + $0x20] sm:$0xff]   ;;  %s4128_s20 = sld [smem:[#allocation2 + $0x1]]  ;;  %v5035_v9 = vld [vmem:[%s6338_s2 + $0x18] sm:$0xff]   ;;  %v5036_v13 = vld [vmem:[%s6338_s2 + $0x10] sm:$0xff]   ;;  %v5251_v45 = vmov 1.0|1.0  }
  0x1e   :  { %4614 = vmatpush3.bf16.msra.mxu0 %v5031_v0  ;;  %4629 = vmatprep.mubr.msk.bf16.mxu0 %vm5250_vm0, %v5249_v2  ;;  %v5337_v4 = vshrl.u32 %v68_v1, 7  ;;  %v5349_v8 = vand.u32 127, %v68_v1  ;;  %s4129_s21 = sld [smem:[#allocation2 + $0x2]]  ;;  %v5037_v22 = vld [vmem:[%s6338_s2 + $0x8] sm:$0xff]   ;;  %v5038_v30 = vld [vmem:[%s6338_s2] sm:$0xff]  }
  0x1f   :  { %4615 = vmatprep.subr.bf16.mxu0 %v5249_v2  ;;  %4637 = vmatprep.mubr.msk.bf16.mxu1 %vm5250_vm0, %v5249_v2  ;;  %s4130_s22 = sld [smem:[#allocation2 + $0x3]]  ;;  %v190_v46 = vld [vmem:[%s6339_s3] sm:$0xff]  ;;  %v5039_v1 = vld [vmem:[%s6340_s4 + $0x8] sm:$0xff]  }
  0x20   :  { %v5344_v6 = vadd.s32 8, %v5337_v4  ;;  %vm74_vm1 = vcmp.eq.s32.totalorder %v5337_v4, 0  ;;  %vm80_vm2 = vcmp.eq.s32.totalorder %v5337_v4, 1  ;;  %vm86_vm3 = vcmp.eq.s32.totalorder %v5337_v4, 2  ;;  %s4131_s25 = sld [smem:[#allocation2 + $0x4]]  ;;  %4634 = vmatpush3.bf16.msra.mxu1 %v5039_v1 }
  0x21   :  { %vm92_vm4 = vcmp.eq.s32.totalorder %v5337_v4, 3  ;;  %vm98_vm5 = vcmp.eq.s32.totalorder %v5337_v4, 4  ;;  %vm104_vm6 = vcmp.eq.s32.totalorder %v5337_v4, 5  ;;  %vm110_vm7 = vcmp.eq.s32.totalorder %v5337_v4, 6  ;;  %s5363_s26 = sld [smem:[#allocation2 + $0x5]]  ;;  %4635 = vmatprep.subr.bf16.mxu1 %v5249_v2 }
  0x22   :  { %4616 = vmatpush3.bf16.msra.mxu0 %v5032_v3  ;;  %vm123_vm8 = vcmp.eq.s32.totalorder %v5344_v6, 8  ;;  %vm129_vm9 = vcmp.eq.s32.totalorder %v5344_v6, 9  ;;  %v76_v10 = vstv %s73_s17  ;;  %s5366_s27 = sld [smem:[#allocation2 + $0x6]]  ;;  %vm135_vm10 = vcmp.eq.s32.totalorder %v5344_v6, 10  ;;  %v5040_v3 = vld [vmem:[%s6340_s4 + $0x18] sm:$0xff]  }
  0x23   :  { %4617 = vmatprep.subr.bf16.mxu0 %v5249_v2  ;;  %v77_v11 = vsel %vm74_vm1, %v76_v10, 0  ;;  %v82_v12 = vstv %s4128_s20  ;;  %s5372_s28 = sld [smem:[#allocation2 + $0x7]]  ;;  %vm116_vm11 = vcmp.eq.s32.totalorder %v5337_v4, 7  ;;  %vm141_vm12 = vcmp.eq.s32.totalorder %v5344_v6, 11  ;;  %v5041_v4 = vld [vmem:[%s6340_s4] sm:$0xff]  }
  0x24   :  { %v83_v14 = vsel %vm80_vm2, %v82_v12, %v77_v11  ;;  %v88_v15 = vstv %s4129_s21  ;;  %s4135_s1 = sld [smem:[#allocation2 + $0x80]]  ;;  %vm147_vm13 = vcmp.eq.s32.totalorder %v5344_v6, 12  ;;  %vm153_vm14 = vcmp.eq.s32.totalorder %v5344_v6, 13  ;;  %4636 = vmatpush3.bf16.msra.mxu1 %v5041_v4 }
  0x25   :  { %v89_v16 = vsel %vm86_vm3, %v88_v15, %v83_v14  ;;  %v94_v17 = vstv %s4130_s22  ;;  %s4136_s30 = sld [smem:[#allocation2 + $0x81]]  ;;  %vm159_vm15 = vcmp.eq.s32.totalorder %v5344_v6, 14  ;;  %vm165_vm1 = vcmp.eq.s32.totalorder %v5344_v6, 15  ;;  %4641 = vmatprep.subr.bf16.mxu1 %v5249_v2  ;;  %v4153_v15 = vld [vmem:[%s6345_s9] ss:$0 sm:$0xff] }
  0x26   :  { %4618 = vmatpush3.bf16.msra.mxu0 %v5033_v5  ;;  %v95_v18 = vsel %vm92_vm4, %v94_v17, %v89_v16  ;;  %v100_v19 = vstv %s4131_s25  ;;  %s4137_s13 = sld [smem:[#allocation2 + $0x82]]  ;;  %v5042_v5 = vld [vmem:[%s6340_s4 + $0x10] sm:$0xff]  }
  0x27   :  { %4619 = vmatprep.subr.bf16.mxu0 %v5249_v2  ;;  %v101_v20 = vsel %vm98_vm5, %v100_v19, %v95_v18  ;;  %v106_v21 = vstv %s5363_s26  ;;  %s4138_s14 = sld [smem:[#allocation2 + $0x83]]  ;;  %vm282_vm5 = vcmask 261120   ;;  %v4154_v19 = vld [vmem:[%s6345_s9 + $0x1] ss:$0 sm:$0xff] }
  0x28   :  { %v107_v23 = vsel %vm104_vm6, %v106_v21, %v101_v20  ;;  %v112_v24 = vstv %s5366_s27  ;;  %s4139_s17 = sld [smem:[#allocation2 + $0x84]]  ;;  %vm708_vm6 = vcmask 64512  }
  0x29   :  { %s4140_s18 = sld [smem:[#allocation2 + $0x85]]  ;;  %v113_v26 = vsel %vm110_vm7, %v112_v24, %v107_v23  ;;  %v118_v27 = vstv %s5372_s28  ;;  %v5043_v23 = vld [vmem:[%s6340_s4 + $0x48] sm:$0xff]   ;;  %v5044_v24 = vld [vmem:[%s6340_s4 + $0x98] sm:$0xff]   ;;  %vm325_vm7 = vcmp.eq.s32.totalorder %v5349_v8, 0 }
  0x2a   :  { %4620 = vmatpush3.bf16.msra.mxu0 %v5034_v7  ;;  %v124_v25 = vstv %s4135_s1  ;;  %s4141_s19 = sld [smem:[#allocation2 + $0x86]]  ;;  %v119_v35 = vsel %vm116_vm11, %v118_v27, %v113_v26  ;;  %v5045_v26 = vld [vmem:[%s6340_s4 + $0x40] sm:$0xff]   ;;  %v5046_v27 = vld [vmem:[%s6340_s4 + $0x90] sm:$0xff]   ;;  %vm432_vm11 = vcmp.eq.s32.totalorder %v5349_v8, 9 }
  0x2b   :  { %4621 = vmatprep.subr.bf16.mxu0 %v5249_v2  ;;  %v126_v28 = vsel %vm123_vm8, %v124_v25, 0  ;;  %v130_v29 = vstv %s4136_s30  ;;  %s4142_s20 = sld [smem:[#allocation2 + $0x87]]  ;;  %vm169_vm2 = vcmp.eq.s32.totalorder %v119_v35, %v5349_v8  ;;  %v5054_v35 = vld [vmem:[%s6340_s4 + $0x30] sm:$0xff]   ;;  %vm340_vm8 = vcmp.eq.s32.totalorder %v5349_v8, 1 }
  0x2c   :  { %v132_v31 = vsel %vm129_vm9, %v130_v29, %v126_v28  ;;  %v136_v32 = vstv %s4137_s13  ;;  %v5047_v28 = vld [vmem:[%s6340_s4 + $0x88] sm:$0xff]   ;;  %s322_s25 = sld [smem:[#allocation5]]  ;;  %vm417_vm9 = vcmp.eq.s32.totalorder %v5349_v8, 8 }
  0x2d   :  { %v138_v33 = vsel %vm135_vm10, %v136_v32, %v132_v31  ;;  %v142_v34 = vstv %s4138_s14  ;;  %v5048_v29 = vld [vmem:[%s6340_s4 + $0x28] sm:$0xff]   ;;  %v5050_v31 = vld [vmem:[%s6340_s4 + $0x20] sm:$0xff]   ;;  %s4155_s26 = sld [smem:[#allocation5 + $0x1]]  ;;  %vm351_vm10 = vcmp.eq.s32.totalorder %v5349_v8, 2 }
  0x2e   :  { %4622 = vmatpush3.bf16.msra.mxu0 %v5035_v9  ;;  %v144_v36 = vsel %vm141_vm12, %v142_v34, %v138_v33  ;;  %v148_v37 = vstv %s4139_s17  ;;  %v5051_v32 = vld [vmem:[%s6340_s4 + $0xa8] sm:$0xff]   ;;  %v5052_v33 = vld [vmem:[%s6340_s4 + $0xa0] sm:$0xff]   ;;  %v5053_v34 = vld [vmem:[%s6340_s4 + $0x38] sm:$0xff]   ;;  %s4156_s27 = sld [smem:[#allocation5 + $0x2]]  ;;  %vm362_vm12 = vcmp.eq.s32.totalorder %v5349_v8, 3 }
  0x2f   :  { %4623 = vmatprep.subr.bf16.mxu0 %v5249_v2  ;;  %v150_v38 = vsel %vm147_vm13, %v148_v37, %v144_v36  ;;  %v154_v39 = vstv %s4140_s18  ;;  %v5055_v36 = vld [vmem:[%s6340_s4 + $0xb8] sm:$0xff]   ;;  %v5056_v37 = vld [vmem:[%s6340_s4 + $0xb0] sm:$0xff]   ;;  %s4157_s28 = sld [smem:[#allocation5 + $0x3]]  ;;  %vm443_vm13 = vcmp.eq.s32.totalorder %v5349_v8, 10 }
  0x30   :  { %v156_v40 = vsel %vm153_vm14, %v154_v39, %v150_v38  ;;  %v160_v41 = vstv %s4141_s19  ;;  %s5667_s29 = sld [smem:[#allocation5 + $0x4]]  ;;  %vm373_vm14 = vcmp.eq.s32.totalorder %v5349_v8, 4 }
  0x31   :  { %v162_v42 = vsel %vm159_vm15, %v160_v41, %v156_v40  ;;  %v166_v43 = vstv %s4142_s20  ;;  %v4198_v40 = vld [vmem:[%s6341_s5 + $0x1] ss:$0 sm:$0xff]  ;;  %s4162_s0 = sld [smem:[#allocation5 + $0x80]]  ;;  %vm454_vm15 = vcmp.eq.s32.totalorder %v5349_v8, 11 }
  0x32   :  { %4624 = vmatpush3.bf16.msra.mxu0 %v5036_v13  ;;  %v168_v44 = vsel %vm165_vm1, %v166_v43, %v162_v42  ;;  %p323_p10 = scmp.gt.s32.totalorder %s322_s25, 0  ;;  %s5669_s1 = sld [smem:[#allocation5 + $0x5]]  ;;  %vm384_vm1 = vcmp.eq.s32.totalorder %v5349_v8, 5 }
  0x33   :  { %4625 = vmatprep.subr.bf16.mxu0 %v5249_v2  ;;  %vm170_vm3 = vcmp.eq.s32.totalorder %v168_v44, %v5349_v8  ;;  %p338_p11 = scmp.gt.s32.totalorder %s4155_s26, 0  ;;  %s5671_s30 = sld [smem:[#allocation5 + $0x6]] }
  0x34   :  { %vm4151_vm4 = vmpackc.low %vm170_vm3, %vm169_vm2  ;;  %s4163_s13 = sld [smem:[#allocation5 + $0x81]]  ;;  %p349_p12 = scmp.gt.s32.totalorder %s4156_s27, 0  ;;  %vm465_vm2 = vcmp.eq.s32.totalorder %v5349_v8, 12  ;;  %vm395_vm3 = vcmp.eq.s32.totalorder %v5349_v8, 6 }
  0x35   :  { %s324_s14 = scalar_select %p323_p10, 0.0, -1e+09 }
  0x36   :  { %4626 = vmatpush3.bf16.msra.mxu0 %v5037_v22  ;;  %s339_s15 = scalar_select %p338_p11, 0.0, -1e+09 }
  0x37   :  { %4627 = vmatprep.subr.bf16.mxu0 %v5249_v2  ;;  %s4164_s16 = sld [smem:[#allocation5 + $0x82]]  ;;  %p360_p13 = scmp.gt.s32.totalorder %s4157_s28, 0 }
  0x38   :  { %s5673_s17 = sld [smem:[#allocation5 + $0x7]]  ;;  %p371_p0 = scmp.gt.s32.totalorder %s5667_s29, 0 }
  0x39   :  { %p415_p1 = scmp.gt.s32.totalorder %s4162_s0, 0  ;;  %p382_p2 = scmp.gt.s32.totalorder %s5669_s1, 0 }
  0x3a   :  { %4628 = vmatpush3.bf16.msra.mxu0 %v5038_v30  ;;  %v5049_v30 = vld [vmem:[%s6340_s4 + $0x80] sm:$0xff]   ;;  %s5677_s18 = sld [smem:[#allocation5 + $0x83]]  ;;  %p430_p3 = scmp.gt.s32.totalorder %s4163_s13, 0 }
  0x3b   :  { %4663 = vmatprep.subr.bf16.mxu0 %v5249_v2  ;;  %s350_s19 = scalar_select %p349_p12, 0.0, -1e+09 }
  0x3c   :  { %s5679_s20 = sld [smem:[#allocation5 + $0x84]]  ;;  %p393_p6 = scmp.gt.s32.totalorder %s5671_s30, 0 }
  0x3d   :  { %4630 = vmatmul.mubr.msk.bf16.vlgmr.msra.gmra.mxu0 %vm4151_vm4, %v5251_v45  ;;  %s416_s21 = scalar_select %p415_p1, 0.0, -1e+09  ;;  %vm476_vm4 = vcmp.eq.s32.totalorder %v5349_v8, 13 }
  0x3e   :  { %4667 = vmatprep.mubr.msk.bf16.mxu0 %vm5250_vm0, %v5249_v2  ;;  %4664 = vmatpush3.bf16.msra.mxu0 %v5040_v3  ;;  %s5682_s22 = scalar_select %p360_p13, 0.0, -1e+09 }
  0x3f   :  { %4665 = vmatprep.subr.bf16.mxu0 %v5249_v2  ;;  %p441_p4 = scmp.gt.s32.totalorder %s4164_s16, 0  ;;  %s5684_s2 = sld [smem:[#allocation5 + $0x85]] }
  0x40   :  { %s431_s23 = scalar_select %p430_p3, 0.0, -1e+09 }
  0x41   :  { %s5689_s3 = scalar_select %p371_p0, 0.0, -1e+09 }
  0x42   :  { %4666 = vmatpush3.bf16.msra.mxu0 %v5042_v5  ;;  %v4170_v5 = vld [vmem:[%s6341_s5] ss:$0 sm:$0xff]  ;;  %p452_p5 = scmp.gt.s32.totalorder %s5677_s18, 0  ;;  %s5693_s24 = sld [smem:[#allocation5 + $0x86]] }
  0x43   :  { %4679 = vmatprep.subr.bf16.mxu0 %v5249_v2  ;;  %s442_s25 = scalar_select %p441_p4, 0.0, -1e+09 }
  0x44   :  { %p463_p7 = scmp.gt.s32.totalorder %s5679_s20, 0  ;;  %s5700_s26 = sld [smem:[#allocation5 + $0x87]] }
  0x45   :  { %s453_s27 = scalar_select %p452_p5, 0.0, -1e+09 }
  0x46   :  { %s383_s28 = scalar_select %p382_p2, 0.0, -1e+09 }
  0x47   :  { %p404_p8 = scmp.gt.s32.totalorder %s5673_s17, 0  ;;  %p474_p9 = scmp.gt.s32.totalorder %s5684_s2, 0 }
  0x48   :  { %s464_s29 = scalar_select %p463_p7, 0.0, -1e+09 }
  0x49   :  { %s394_s0 = scalar_select %p393_p6, 0.0, -1e+09 }
  0x4a   :  { %p485_p10 = scmp.gt.s32.totalorder %s5693_s24, 0  ;;  %p496_p11 = scmp.gt.s32.totalorder %s5700_s26, 0 }
  0x4b   :  { %s475_s1 = scalar_select %p474_p9, 0.0, -1e+09 }
  0x4c   :  { %s405_s13 = scalar_select %p404_p8, 0.0, -1e+09 }
  0x4d   :  { %s486_s30 = scalar_select %p485_p10, 0.0, -1e+09 }
  0xfd   :  { %v273_v47 = vpop.f32.mrf.mxu0 }
  0xfe   :  { %v274_v48 = vadd.f32 %v273_v47, %v190_v46 }
  0xff   :  { %v4631_v49 = vpop.f32.mrf.mxu0 }
 0x100   :  { %v283_v50 = vsel %vm282_vm5, %v274_v48, 0.0 }
 0x101   :  { %284 = vadd.xlane.f32.xlu0 %v283_v50  ;;  %v276_v51 = vpop.f32.mrf.mxu0 }
 0x102   :  { %v277_v52 = vadd.f32 %v276_v51, %v190_v46 }
 0x103   :  { %v4632_v53 = vpop.f32.mrf.mxu0 }
 0x104   :  { %v286_v54 = vsel %vm282_vm5, %v277_v52, 0.0  ;;  %v4216_v53 = vld [vmem:[%s6341_s5 + $0x9] ss:$0 sm:$0xff] }
 0x105   :  { %287 = vadd.xlane.f32.xlu0 %v286_v54 }
 0x18a   :  { %v285_v55 = vpop.xlane.xlu0 %284 }
 0x18b   :  { %v290_v56 = vmul.f32 0.03125, %v285_v55 }
 0x18d   :  { %v292_v57 = vsub.f32 %v274_v48, %v290_v56 }
 0x18e   :  { %v288_v58 = vpop.xlane.xlu0 %287 }
 0x18f   :  { %v291_v59 = vmul.f32 0.03125, %v288_v58  ;;  %v294_v60 = vmul.f32 %v292_v57, %v292_v57 }
 0x191   :  { %v293_v61 = vsub.f32 %v277_v52, %v291_v59  ;;  %v296_v62 = vsel %vm282_vm5, %v294_v60, 0.0  ;;  %v4179_v52 = vld [vmem:[%s6341_s5 + $0x4] ss:$0 sm:$0xff] }
 0x192   :  { %297 = vadd.xlane.f32.xlu1 %v296_v62 }
 0x193   :  { %v295_v63 = vmul.f32 %v293_v61, %v293_v61 }
 0x195   :  { %v299_v0 = vsel %vm282_vm5, %v295_v63, 0.0 }
 0x196   :  { %300 = vadd.xlane.f32.xlu1 %v299_v0 }
 0x21b   :  { %v298_v6 = vpop.xlane.xlu1 %297 }
 0x21c   :  { %v302_v7 = vmul.f32 0.03125, %v298_v6 }
 0x21e   :  { %v304_v9 = vadd.f32 1e-12, %v302_v7  ;;  %v4188_v7 = vld [vmem:[%s6341_s5 + $0x8] ss:$0 sm:$0xff] }
 0x21f   :  { %v301_v10 = vpop.xlane.xlu1 %300 }
 0x220   :  { %5103 = vrsqrt.f32 %v304_v9  ;;  %v303_v11 = vmul.f32 0.03125, %v301_v10  ;;  %v4226_v9 = vld [vmem:[%s6341_s5 + $0x2] ss:$0 sm:$0xff] }
 0x222   :  { %v305_v12 = vadd.f32 1e-12, %v303_v11 }
 0x224   :  { %5105 = vrsqrt.f32 %v305_v12 }
 0x22d   :  { %v5104_v13 = vpop.eup %5103 }
 0x22e   :  { %v308_v14 = vmul.f32 %v5104_v13, %v292_v57 }
 0x230   :  { %v314_v17 = vmul.f32 %v4153_v15, %v308_v14 }
 0x231   :  { %v5106_v16 = vpop.eup %5105 }
 0x232   :  { %v309_v18 = vmul.f32 %v5106_v16, %v293_v61  ;;  %v5459_v21 = vadd.f32 %v4154_v19, %v314_v17 }
 0x234   :  { %v315_v20 = vmul.f32 %v4153_v15, %v309_v18 }
 0x236   :  { %v5461_v22 = vadd.f32 %v4154_v19, %v315_v20 }
 0x238   :  { %v5471_v25 = vpack.c.bf16 %v5461_v22, %v5459_v21 }
 0x23a   :  { %4638 = vmatmul.mubr.msk.bf16.vlgmr.msra.gmra.mxu1 %vm282_vm5, %v5471_v25  ;;  %4668 = vmatmul.mubr.msk.bf16.vlgmr.msra.gmra.mxu0 %vm282_vm5, %v5471_v25 }
 0x23b   :  { %4642 = vmatpush3.bf16.msra.mxu1 %v5043_v23  ;;  %4680 = vmatpush3.bf16.msra.mxu0 %v5044_v24  ;;  %v5057_v24 = vld [vmem:[%s6340_s4 + $0x58] sm:$0xff]  }
 0x23c   :  { %4643 = vmatprep.subr.bf16.mxu1 %v5249_v2  ;;  %4681 = vmatprep.subr.bf16.mxu0 %v5249_v2 }
 0x23d   :  { %4645 = vmatprep.mubr.msk.bf16.mxu1 %vm5250_vm0, %v5249_v2  ;;  %4683 = vmatprep.mubr.msk.bf16.mxu0 %vm5250_vm0, %v5249_v2 }
 0x23f   :  { %4644 = vmatpush3.bf16.msra.mxu1 %v5045_v26  ;;  %4682 = vmatpush3.bf16.msra.mxu0 %v5046_v27 }
 0x240   :  { %4649 = vmatprep.subr.bf16.mxu1 %v5249_v2  ;;  %4693 = vmatprep.subr.bf16.mxu0 %v5249_v2 }
 0x242   :  { %4646 = vmatmul.mubr.msk.bf16.vlgmr.msra.gmra.mxu1 %vm282_vm5, %v5471_v25  ;;  %4684 = vmatmul.mubr.msk.bf16.vlgmr.msra.gmra.mxu0 %vm282_vm5, %v5471_v25 }
 0x243   :  { %4650 = vmatpush3.bf16.msra.mxu1 %v5047_v28  ;;  %4694 = vmatpush3.bf16.msra.mxu0 %v5048_v29 }
 0x244   :  { %4651 = vmatprep.subr.bf16.mxu1 %v5249_v2  ;;  %4695 = vmatprep.subr.bf16.mxu0 %v5249_v2 }
 0x245   :  { %4653 = vmatprep.mubr.msk.bf16.mxu1 %vm5250_vm0, %v5249_v2  ;;  %4697 = vmatprep.mubr.msk.bf16.mxu0 %vm5250_vm0, %v5249_v2 }
 0x247   :  { %4652 = vmatpush3.bf16.msra.mxu1 %v5049_v30  ;;  %4696 = vmatpush3.bf16.msra.mxu0 %v5050_v31  ;;  %v4244_v30 = vld [vmem:[%s6341_s5 + $0xa] ss:$0 sm:$0xff] }
 0x248   :  { %4709 = vmatprep.subr.bf16.mxu0 %v5249_v2  ;;  %4657 = vmatprep.subr.bf16.mxu1 %v5249_v2 }
 0x24a   :  { %4654 = vmatmul.mubr.msk.bf16.vlgmr.msra.gmra.mxu1 %vm282_vm5, %v5471_v25  ;;  %4698 = vmatmul.mubr.msk.bf16.vlgmr.msra.gmra.mxu0 %vm282_vm5, %v5471_v25 }
 0x24b   :  { %4710 = vmatpush3.bf16.msra.mxu0 %v5051_v32  ;;  %4713 = vmatprep.mubr.msk.bf16.mxu0 %vm5250_vm0, %v5249_v2  ;;  %v5058_v32 = vld [vmem:[%s6340_s4 + $0x50] sm:$0xff]  }
 0x24c   :  { %4711 = vmatprep.subr.bf16.mxu0 %v5249_v2  ;;  %4659 = vmatprep.mubr.msk.bf16.mxu1 %vm5250_vm0, %v5249_v2 }
 0x24f   :  { %4712 = vmatpush3.bf16.msra.mxu0 %v5052_v33 }
 0x250   :  { %4723 = vmatprep.subr.bf16.mxu0 %v5249_v2 }
 0x252   :  { %4714 = vmatmul.mubr.msk.bf16.vlgmr.msra.gmra.mxu0 %vm282_vm5, %v5471_v25 }
 0x253   :  { %4724 = vmatpush3.bf16.msra.mxu0 %v5053_v34  ;;  %4727 = vmatprep.mubr.msk.bf16.mxu0 %vm5250_vm0, %v5249_v2 }
 0x254   :  { %4725 = vmatprep.subr.bf16.mxu0 %v5249_v2 }
 0x257   :  { %4726 = vmatpush3.bf16.msra.mxu0 %v5054_v35 }
 0x258   :  { %4739 = vmatprep.subr.bf16.mxu0 %v5249_v2 }
 0x25a   :  { %4728 = vmatmul.mubr.msk.bf16.vlgmr.msra.gmra.mxu0 %vm282_vm5, %v5471_v25 }
 0x25b   :  { %4740 = vmatpush3.bf16.msra.mxu0 %v5055_v36  ;;  %4743 = vmatprep.mubr.msk.bf16.mxu0 %vm5250_vm0, %v5249_v2 }
 0x25c   :  { %4741 = vmatprep.subr.bf16.mxu0 %v5249_v2 }
 0x25f   :  { %4742 = vmatpush3.bf16.msra.mxu0 %v5056_v37 }
 0x260   :  { %4753 = vmatprep.subr.bf16.mxu0 %v5249_v2 }
 0x262   :  { %4744 = vmatmul.mubr.msk.bf16.vlgmr.msra.gmra.mxu0 %vm282_vm5, %v5471_v25 }
 0x263   :  { %4755 = vmatprep.mubr.msk.bf16.mxu0 %vm5250_vm0, %v5249_v2 }
 0x2fa   :  { %v567_v38 = vpop.f32.mrf.mxu1  ;;  %v816_v39 = vpop.f32.mrf.mxu0 }
 0x2fb   :  { %v5562_v45 = vadd.f32 %v4198_v40, %v816_v39  ;;  %v568_v13 = vadd.f32 %v4170_v5, %v567_v38  ;;  %v4254_v39 = vld [vmem:[%s6341_s5 + $0x3] ss:$0 sm:$0xff] }
 0x2fc   :  { %v4639_v41 = vpop.f32.mrf.mxu1  ;;  %v4669_v42 = vpop.f32.mrf.mxu0 }
 0x2fe   :  { %v570_v43 = vpop.f32.mrf.mxu1  ;;  %v819_v44 = vpop.f32.mrf.mxu0 }
 0x2ff   :  { %v5564_v46 = vadd.f32 %v4198_v40, %v819_v44  ;;  %v571_v12 = vadd.f32 %v4170_v5, %v570_v43 }
 0x300   :  { %v4640_v47 = vpop.f32.mrf.mxu1  ;;  %v4670_v48 = vpop.f32.mrf.mxu0 }
 0x301   :  { %v955_v49 = vpack.c.bf16 %v5564_v46, %v5562_v45  ;;  %v706_v26 = vpack.c.bf16 %v571_v12, %v568_v13  ;;  %v5060_v12 = vld [vmem:[%s6340_s4 + $0x60] sm:$0xff]   ;;  %v334_v45 = vstv %s324_s14  ;;  %v426_v13 = vstv %s416_s21  ;;  %s497_s14 = scalar_select %p496_p11, 0.0, -1e+09 }
 0x302   :  { %v633_v50 = vpop.f32.mrf.mxu1  ;;  %v948_v51 = vpop.f32.mrf.mxu0  ;;  %v335_v46 = vsel %vm325_vm7, %v334_v45, -1e+09  ;;  %vm406_vm7 = vcmp.eq.s32.totalorder %v5349_v8, 7 }
 0x303   :  { %v634_v58 = vadd.f32 %v4179_v52, %v633_v50  ;;  %v5574_v59 = vadd.f32 %v4216_v53, %v948_v51  ;;  %v4272_v50 = vld [vmem:[%s6341_s5 + $0xb] ss:$0 sm:$0xff] }
 0x304   :  { %v4647_v54 = vpop.f32.mrf.mxu1  ;;  %v4685_v55 = vpop.f32.mrf.mxu0 }
 0x306   :  { %v636_v56 = vpop.f32.mrf.mxu1  ;;  %v951_v57 = vpop.f32.mrf.mxu0 }
 0x307   :  { %v637_v60 = vadd.f32 %v4179_v52, %v636_v56  ;;  %v5576_v61 = vadd.f32 %v4216_v53, %v951_v57 }
 0x308   :  { %v4648_v62 = vpop.f32.mrf.mxu1  ;;  %v4686_v63 = vpop.f32.mrf.mxu0 }
 0x309   :  { %v707_v0 = vpack.c.bf16 %v637_v60, %v634_v58  ;;  %v1004_v1 = vpack.c.bf16 %v5576_v61, %v5574_v59 }
 0x30a   :  { %v699_v3 = vpop.f32.mrf.mxu1  ;;  %v1064_v4 = vpop.f32.mrf.mxu0 }
 0x30b   :  { %v713_v6 = vsel %vm708_vm6, %v707_v0, 0  ;;  %v700_v16 = vadd.f32 %v4188_v7, %v699_v3  ;;  %v5591_v17 = vadd.f32 %v4226_v9, %v1064_v4  ;;  %v4207_v0 = vld [vmem:[%s6341_s5 + $0x5] ss:$0 sm:$0xff] }
 0x30c   :  { %v4655_v10 = vpop.f32.mrf.mxu1  ;;  %4658 = vmatpush3.bf16.xpose.msra.mxu1 %v713_v6  ;;  %v4699_v11 = vpop.f32.mrf.mxu0 }
 0x30d   :  { %4671 = vmatprep.subr.bf16.mxu1 %v5249_v2  ;;  %v5059_v11 = vld [vmem:[%s6340_s4 + $0x68] sm:$0xff]  }
 0x30e   :  { %v702_v14 = vpop.f32.mrf.mxu1  ;;  %v1067_v15 = vpop.f32.mrf.mxu0 }
 0x30f   :  { %v703_v18 = vadd.f32 %v4188_v7, %v702_v14  ;;  %v5593_v19 = vadd.f32 %v4226_v9, %v1067_v15  ;;  %v356_v15 = vstv %s350_s19 }
 0x310   :  { %v4656_v20 = vpop.f32.mrf.mxu1  ;;  %v4700_v23 = vpop.f32.mrf.mxu0 }
 0x311   :  { %v756_v27 = vpack.c.bf16 %v703_v18, %v700_v16  ;;  %v1203_v28 = vpack.c.bf16 %v5593_v19, %v5591_v17  ;;  %v428_v16 = vsel %vm417_vm9, %v426_v13, -1e+09  ;;  %v437_v18 = vstv %s431_s23 }
 0x312   :  { %v1196_v29 = vpop.f32.mrf.mxu0  ;;  %v367_v23 = vstv %s5682_s22  ;;  %vm498_vm9 = vcmp.eq.s32.totalorder %v5349_v8, 15 }
 0x313   :  { %4660 = vmatmul.mubr.msk.bf16.vlgmr.msra.gmra.mxu1 %vm708_vm6, %v706_v26  ;;  %4754 = vmatpush3.bf16.msra.mxu0 %v756_v27  ;;  %v5611_v34 = vadd.f32 %v4244_v30, %v1196_v29  ;;  %v448_v26 = vstv %s442_s25  ;;  %v378_v29 = vstv %s5689_s3 }
 0x314   :  { %4672 = vmatpush3.bf16.msra.mxu1 %v5057_v24  ;;  %v4715_v31 = vpop.f32.mrf.mxu0  ;;  %4675 = vmatprep.mubr.msk.bf16.mxu1 %vm5250_vm0, %v5249_v2  ;;  %v439_v24 = vsel %vm432_vm11, %v437_v18, %v428_v16  ;;  %v5061_v16 = vld [vmem:[%s6340_s4 + $0x78] sm:$0xff]   ;;  %v5062_v18 = vld [vmem:[%s6340_s4 + $0x70] sm:$0xff]   ;;  %vm1698_vm11 = vcmask 1043456  }
 0x315   :  { %4673 = vmatprep.subr.bf16.mxu1 %v5249_v2  ;;  %4765 = vmatprep.subr.bf16.mxu0 %v5249_v2  ;;  %v459_v31 = vstv %s453_s27 }
 0x316   :  { %v1199_v33 = vpop.f32.mrf.mxu0 }
 0x317   :  { %v5613_v35 = vadd.f32 %v4244_v30, %v1199_v33  ;;  %v450_v30 = vsel %vm443_vm13, %v448_v26, %v439_v24  ;;  %v389_v33 = vstv %s383_s28 }
 0x318   :  { %4674 = vmatpush3.bf16.msra.mxu1 %v5058_v32  ;;  %v4716_v36 = vpop.f32.mrf.mxu0 }
 0x319   :  { %v1252_v37 = vpack.c.bf16 %v5613_v35, %v5611_v34  ;;  %4687 = vmatprep.subr.bf16.mxu1 %v5249_v2  ;;  %v461_v36 = vsel %vm454_vm15, %v459_v31, %v450_v30  ;;  %v1647_v34 = vld [vmem:[%s6342_s6] sm:$0xf] }
 0x31a   :  { %v1312_v38 = vpop.f32.mrf.mxu0  ;;  %v1747_v35 = vsel %vm1698_vm11, %v1647_v34, 0 }
 0x31b   :  { %4676 = vmatmul.mubr.msk.bf16.vlgmr.msra.gmra.mxu1 %vm282_vm5, %v5471_v25  ;;  %v5625_v42 = vadd.f32 %v4254_v39, %v1312_v38  ;;  %v470_v38 = vstv %s464_s29 }
 0x31c   :  { %v4729_v40 = vpop.f32.mrf.mxu0  ;;  %4689 = vmatprep.mubr.msk.bf16.mxu1 %vm5250_vm0, %v5249_v2 }
 0x31d   :  { %v400_v40 = vstv %s394_s0 }
 0x31e   :  { %v1315_v41 = vpop.f32.mrf.mxu0 }
 0x31f   :  { %v5627_v43 = vadd.f32 %v4254_v39, %v1315_v41  ;;  %v472_v41 = vsel %vm465_vm2, %v470_v38, %v461_v36 }
 0x320   :  { %v4730_v44 = vpop.f32.mrf.mxu0 }
 0x321   :  { %v1451_v47 = vpack.c.bf16 %v5627_v43, %v5625_v42  ;;  %v481_v44 = vstv %s475_s1 }
 0x322   :  { %v1444_v48 = vpop.f32.mrf.mxu0 }
 0x323   :  { %v5634_v53 = vadd.f32 %v4272_v50, %v1444_v48 }
 0x324   :  { %v4745_v51 = vpop.f32.mrf.mxu0 }
 0x325   :  { %v483_v51 = vsel %vm476_vm4, %v481_v44, %v472_v41 }
 0x326   :  { %v1447_v52 = vpop.f32.mrf.mxu0 }
 0x327   :  { %v5636_v54 = vadd.f32 %v4272_v50, %v1447_v52  ;;  %v411_v50 = vstv %s405_s13  ;;  %v492_v52 = vstv %s486_s30 }
 0x328   :  { %v4746_v55 = vpop.f32.mrf.mxu0 }
 0x329   :  { %v1500_v56 = vpack.c.bf16 %v5636_v54, %v5634_v53 }
 0x3d3   :  { %v5640_v57 = vpop.f32.mrf.mxu1 }
 0x3d5   :  { %v4661_v58 = vpop.f32.mrf.mxu1 }
 0x3d7   :  { %v5642_v60 = vpop.f32.mrf.mxu1 }
 0x3d9   :  { %v4662_v62 = vpop.f32.mrf.mxu1 }
 0x3db   :  { %v882_v63 = vpop.f32.mrf.mxu1 }
 0x3dc   :  { %v883_v5 = vadd.f32 %v4207_v0, %v882_v63  ;;  %v503_v63 = vstv %s497_s14 }
 0x3dd   :  { %v4677_v3 = vpop.f32.mrf.mxu1 }
 0x3df   :  { %v885_v4 = vpop.f32.mrf.mxu1 }
 0x3e0   :  { %v886_v6 = vadd.f32 %v4207_v0, %v885_v4 }
 0x3e1   :  { %v4678_v7 = vpop.f32.mrf.mxu1 }
 0x3e2   :  { %v956_v9 = vpack.c.bf16 %v886_v6, %v883_v5 }
 0x3e4   :  { %v961_v10 = vsel %vm708_vm6, %v956_v9, 0 }
 0x3e5   :  { %4688 = vmatpush3.bf16.xpose.msra.mxu1 %v961_v10 }
 0x3e6   :  { %4701 = vmatprep.subr.bf16.mxu1 %v5249_v2 }
 0x3ec   :  { %4690 = vmatmul.mubr.msk.bf16.vlgmr.msra.gmra.mxu1 %vm708_vm6, %v955_v49  ;;  %v345_v49 = vstv %s339_s15 }
 0x3ed   :  { %4702 = vmatpush3.bf16.msra.mxu1 %v5059_v11  ;;  %4705 = vmatprep.mubr.msk.bf16.mxu1 %vm5250_vm0, %v5249_v2  ;;  %v346_v14 = vsel %vm340_vm8, %v345_v49, %v335_v46  ;;  %vm487_vm8 = vcmp.eq.s32.totalorder %v5349_v8, 14  ;;  %v4235_v8 = vld [vmem:[%s6341_s5 + $0x6] ss:$0 sm:$0xff] }
 0x3ee   :  { %4703 = vmatprep.subr.bf16.mxu1 %v5249_v2  ;;  %v357_v20 = vsel %vm351_vm10, %v356_v15, %v346_v14  ;;  %v494_v62 = vsel %vm487_vm8, %v492_v52, %v483_v51  ;;  %vm1509_vm10 = vcmask 130048  }
 0x3ef   :  { %v368_v27 = vsel %vm362_vm12, %v367_v23, %v357_v20  ;;  %v5733_v5 = vsel %vm498_vm9, %v503_v63, %v494_v62  ;;  %vm2153_vm12 = vcmask 523264  }
 0x3f0   :  { %v379_v32 = vsel %vm373_vm14, %v378_v29, %v368_v27 }
 0x3f1   :  { %4704 = vmatpush3.bf16.msra.mxu1 %v5060_v12  ;;  %v390_v39 = vsel %vm384_vm1, %v389_v33, %v379_v32 }
 0x3f2   :  { %4717 = vmatprep.subr.bf16.mxu1 %v5249_v2  ;;  %v401_v48 = vsel %vm395_vm3, %v400_v40, %v390_v39 }
 0x3f3   :  { %v5728_v55 = vsel %vm406_vm7, %v411_v50, %v401_v48  ;;  %v4263_v50 = vld [vmem:[%s6341_s5 + $0x7] ss:$0 sm:$0xff] }
 0x3f4   :  { %4706 = vmatmul.mubr.msk.bf16.vlgmr.msra.gmra.mxu1 %vm282_vm5, %v5471_v25  ;;  %v1501_v27 = vadd.f32 %v5640_v57, %v5728_v55 }
 0x3f5   :  { %4719 = vmatprep.mubr.msk.bf16.mxu1 %vm5250_vm0, %v5249_v2 }
 0x3f6   :  { %v1510_v31 = vsel %vm1509_vm10, %v1501_v27, -inf }
 0x4ac   :  { %v997_v58 = vpop.f32.mrf.mxu1 }
 0x4ad   :  { %v1503_v0 = vadd.f32 %v997_v58, %v5728_v55 }
 0x4ae   :  { %v4691_v3 = vpop.f32.mrf.mxu1 }
 0x4af   :  { %v1516_v4 = vsel %vm1509_vm10, %v1503_v0, -inf }
 0x4b0   :  { %1517 = vmax.xlane.f32.xlu0 %v1516_v4  ;;  %v1000_v6 = vpop.f32.mrf.mxu1 }
 0x4b1   :  { %v1504_v7 = vadd.f32 %v1000_v6, %v5733_v5 }
 0x4b2   :  { %v4692_v9 = vpop.f32.mrf.mxu1 }
 0x4b3   :  { %v1519_v10 = vsel %vm1509_vm10, %v1504_v7, -inf }
 0x4b4   :  { %1520 = vmax.xlane.f32.xlu1 %v1519_v10  ;;  %v1130_v11 = vpop.f32.mrf.mxu1 }
 0x4b5   :  { %v1131_v46 = vadd.f32 %v4235_v8, %v1130_v11 }
 0x4b6   :  { %v4707_v12 = vpop.f32.mrf.mxu1 }
 0x4b8   :  { %v1133_v45 = vpop.f32.mrf.mxu1 }
 0x4b9   :  { %v1134_v49 = vadd.f32 %v4235_v8, %v1133_v45 }
 0x4ba   :  { %v4708_v13 = vpop.f32.mrf.mxu1 }
 0x4bb   :  { %v1204_v14 = vpack.c.bf16 %v1134_v49, %v1131_v46 }
 0x4bd   :  { %v1209_v15 = vsel %vm708_vm6, %v1204_v14, 0 }
 0x4be   :  { %4718 = vmatpush3.bf16.xpose.msra.mxu1 %v1209_v15 }
 0x4bf   :  { %4731 = vmatprep.subr.bf16.mxu1 %v5249_v2 }
 0x4c5   :  { %4720 = vmatmul.mubr.msk.bf16.vlgmr.msra.gmra.mxu1 %vm708_vm6, %v1203_v28 }
 0x4c6   :  { %4732 = vmatpush3.bf16.msra.mxu1 %v5061_v16  ;;  %4735 = vmatprep.mubr.msk.bf16.mxu1 %vm5250_vm0, %v5249_v2 }
 0x4c7   :  { %4733 = vmatprep.subr.bf16.mxu1 %v5249_v2 }
 0x4ca   :  { %4734 = vmatpush3.bf16.msra.mxu1 %v5062_v18 }
 0x4cb   :  { %4747 = vmatprep.subr.bf16.mxu1 %v5249_v2 }
 0x4cd   :  { %4736 = vmatmul.mubr.msk.bf16.vlgmr.msra.gmra.mxu1 %vm282_vm5, %v5471_v25  ;;  %v1502_v25 = vadd.f32 %v5642_v60, %v5733_v5 }
 0x4ce   :  { %4749 = vmatprep.mubr.msk.bf16.mxu1 %vm5250_vm0, %v5249_v2 }
 0x4cf   :  { %v1513_v33 = vsel %vm1509_vm10, %v1502_v25, -inf }
 0x539   :  { %v1518_v17 = vpop.xlane.xlu0 %1517 }
 0x53a   :  { %v1536_v19 = vsub.f32 %v1503_v0, %v1518_v17 }
 0x53c   :  { %v1546_v28 = vmul.f32 1.442695, %v1536_v19 }
 0x53d   :  { %v1521_v20 = vpop.xlane.xlu1 %1520 }
 0x53e   :  { %5107 = vpow2.f32 %v1546_v28  ;;  %v1537_v23 = vsub.f32 %v1504_v7, %v1521_v20 }
 0x540   :  { %v1548_v24 = vmul.f32 1.442695, %v1537_v23 }
 0x542   :  { %5109 = vpow2.f32 %v1548_v24 }
 0x54b   :  { %v5108_v26 = vpop.eup %5107 }
 0x54c   :  { %v1564_v29 = vsel %vm1509_vm10, %v5108_v26, 0.0 }
 0x54d   :  { %1565 = vadd.xlane.f32.xlu0 %v1564_v29 }
 0x54f   :  { %v5110_v30 = vpop.eup %5109 }
 0x550   :  { %v1567_v32 = vsel %vm1509_vm10, %v5110_v30, 0.0 }
 0x551   :  { %1511 = vmax.xlane.f32.xlu0 %v1510_v31  ;;  %1568 = vadd.xlane.f32.xlu1 %v1567_v32 }
 0x555   :  { %1514 = vmax.xlane.f32.xlu1 %v1513_v33 }
 0x585   :  { %v1245_v36 = vpop.f32.mrf.mxu1 }
 0x586   :  { %v1505_v38 = vadd.f32 %v1245_v36, %v5728_v55 }
 0x587   :  { %v4721_v57 = vpop.f32.mrf.mxu1 }
 0x588   :  { %v1522_v39 = vsel %vm1509_vm10, %v1505_v38, -inf }
 0x589   :  { %1523 = vmax.xlane.f32.xlu0 %v1522_v39  ;;  %v1248_v40 = vpop.f32.mrf.mxu1 }
 0x58a   :  { %v1506_v41 = vadd.f32 %v1248_v40, %v5733_v5 }
 0x58b   :  { %v4722_v60 = vpop.f32.mrf.mxu1 }
 0x58c   :  { %v1525_v44 = vsel %vm1509_vm10, %v1506_v41, -inf }
 0x58d   :  { %1526 = vmax.xlane.f32.xlu1 %v1525_v44  ;;  %v1378_v48 = vpop.f32.mrf.mxu1 }
 0x58e   :  { %v1379_v58 = vadd.f32 %v4263_v50, %v1378_v48 }
 0x58f   :  { %v4737_v51 = vpop.f32.mrf.mxu1 }
 0x591   :  { %v1381_v52 = vpop.f32.mrf.mxu1 }
 0x592   :  { %v1382_v62 = vadd.f32 %v4263_v50, %v1381_v52 }
 0x593   :  { %v4738_v63 = vpop.f32.mrf.mxu1 }
 0x594   :  { %v1452_v0 = vpack.c.bf16 %v1382_v62, %v1379_v58 }
 0x596   :  { %v1457_v3 = vsel %vm708_vm6, %v1452_v0, 0 }
 0x597   :  { %4748 = vmatpush3.bf16.xpose.msra.mxu1 %v1457_v3 }
 0x598   :  { %4759 = vmatprep.subr.bf16.mxu1 %v5249_v2 }
 0x59e   :  { %4750 = vmatmul.mubr.msk.bf16.vlgmr.msra.gmra.mxu1 %vm708_vm6, %v1451_v47 }
 0x59f   :  { %4760 = vmatpush3.bf16.msra.mxu1 %v1004_v1  ;;  %4761 = vmatprep.mubr.msk.bf16.mxu1 %vm5250_vm0, %v5249_v2 }
 0x5a0   :  { %4771 = vmatprep.subr.bf16.mxu1 %v5249_v2 }
 0x5d6   :  { %v1566_v4 = vpop.xlane.xlu0 %1565 }
 0x5d7   :  { %5111 = vrcp.f32 %v1566_v4 }
 0x5da   :  { %v1569_v6 = vpop.xlane.xlu1 %1568  ;;  %v1512_v59 = vpop.xlane.xlu0 %1511 }
 0x5db   :  { %5113 = vrcp.f32 %v1569_v6  ;;  %v1534_v61 = vsub.f32 %v1501_v27, %v1512_v59 }
 0x5dd   :  { %v1542_v8 = vmul.f32 1.442695, %v1534_v61 }
 0x5de   :  { %v1515_v1 = vpop.xlane.xlu1 %1514 }
 0x5df   :  { %v1535_v47 = vsub.f32 %v1502_v25, %v1515_v1  ;;  %5115 = vpow2.f32 %v1542_v8 }
 0x5e1   :  { %v1544_v46 = vmul.f32 1.442695, %v1535_v47 }
 0x5e3   :  { %5117 = vpow2.f32 %v1544_v46 }
 0x5e4   :  { %v5112_v7 = vpop.eup %5111 }
 0x5e5   :  { %v1592_v10 = vmul.f32 %v5112_v7, %v5108_v26 }
 0x5e8   :  { %v5114_v9 = vpop.eup %5113 }
 0x5e9   :  { %v1593_v11 = vmul.f32 %v5114_v9, %v5110_v30  ;;  %v4279_v9 = vld [vmem:[%s6342_s6 + $0x4] sm:$0xf] }
 0x5ea   :  { %v1700_v59 = vsel %vm1698_vm11, %v4279_v9, 0 }
 0x5eb   :  { %v1599_v42 = vpack.c.bf16 %v1593_v11, %v1592_v10 }
 0x5ec   :  { %v5116_v19 = vpop.eup %5115 }
 0x5ed   :  { %4762 = vmatmul.mubr.msk.bf16.vlgmr.msra.gmra.mxu1 %vm1509_vm10, %v1599_v42  ;;  %v1558_v26 = vsel %vm1509_vm10, %v5116_v19, 0.0 }
 0x5ee   :  { %4773 = vmatprep.mubr.msk.bf16.mxu1 %vm5250_vm0, %v5249_v2  ;;  %4772 = vmatpush3.bf16.msra.mxu1 %v1747_v35 }
 0x5ef   :  { %4783 = vmatprep.subr.bf16.mxu1 %v5249_v2 }
 0x5f0   :  { %v5118_v24 = vpop.eup %5117 }
 0x5f1   :  { %v1561_v25 = vsel %vm1509_vm10, %v5118_v24, 0.0 }
 0x612   :  { %v1524_v43 = vpop.xlane.xlu0 %1523 }
 0x613   :  { %v1538_v12 = vsub.f32 %v1505_v38, %v1524_v43 }
 0x615   :  { %v1550_v49 = vmul.f32 1.442695, %v1538_v12 }
 0x616   :  { %v1527_v45 = vpop.xlane.xlu1 %1526 }
 0x617   :  { %v1539_v13 = vsub.f32 %v1506_v41, %v1527_v45  ;;  %5119 = vpow2.f32 %v1550_v49 }
 0x619   :  { %v1552_v14 = vmul.f32 1.442695, %v1539_v13 }
 0x61b   :  { %5121 = vpow2.f32 %v1552_v14  ;;  %v4283_v14 = vld [vmem:[%s6342_s6 + $0x8] sm:$0xf] }
 0x624   :  { %v5120_v29 = vpop.eup %5119 }
 0x625   :  { %v1570_v30 = vsel %vm1509_vm10, %v5120_v29, 0.0 }
 0x628   :  { %v5122_v31 = vpop.eup %5121 }
 0x629   :  { %v1573_v32 = vsel %vm1509_vm10, %v5122_v31, 0.0 }
 0x65e   :  { %v1493_v15 = vpop.f32.mrf.mxu1 }
 0x65f   :  { %v1507_v16 = vadd.f32 %v1493_v15, %v5728_v55 }
 0x660   :  { %v4751_v18 = vpop.f32.mrf.mxu1 }
 0x661   :  { %v1528_v17 = vsel %vm1509_vm10, %v1507_v16, -inf  ;;  %v1841_v18 = vsel %vm1698_vm11, %v4283_v14, 0 }
 0x662   :  { %1529 = vmax.xlane.f32.xlu0 %v1528_v17  ;;  %v1496_v28 = vpop.f32.mrf.mxu1 }
 0x663   :  { %v1508_v20 = vadd.f32 %v1496_v28, %v5733_v5 }
 0x664   :  { %v4752_v23 = vpop.f32.mrf.mxu1 }
 0x665   :  { %v1531_v27 = vsel %vm1509_vm10, %v1508_v20, -inf }
 0x666   :  { %1559 = vadd.xlane.f32.xlu0 %v1558_v26  ;;  %1532 = vmax.xlane.f32.xlu1 %v1531_v27 }
 0x66a   :  { %1571 = vadd.xlane.f32.xlu0 %v1570_v30  ;;  %1562 = vadd.xlane.f32.xlu1 %v1561_v25  ;;  %v4286_v25 = vld [vmem:[%s6342_s6 + $0xc] sm:$0xf] }
 0x66e   :  { %1574 = vadd.xlane.f32.xlu1 %v1573_v32 }
 0x6ad   :  { %v1685_v33 = vpop.f32.mrf.mxu1 }
 0x6af   :  { %v4763_v36 = vpop.f32.mrf.mxu1 }
 0x6b1   :  { %v1688_v38 = vpop.f32.mrf.mxu1 }
 0x6b2   :  { %v1692_v57 = vpack.c.bf16 %v1688_v38, %v1685_v33 }
 0x6b3   :  { %v4764_v39 = vpop.f32.mrf.mxu1 }
 0x6eb   :  { %v1530_v40 = vpop.xlane.xlu0 %1529 }
 0x6ec   :  { %v1540_v41 = vsub.f32 %v1507_v16, %v1530_v40 }
 0x6ee   :  { %v1554_v60 = vmul.f32 1.442695, %v1540_v41 }
 0x6ef   :  { %v1533_v44 = vpop.xlane.xlu1 %1532  ;;  %v1560_v48 = vpop.xlane.xlu0 %1559 }
 0x6f0   :  { %5123 = vpow2.f32 %v1554_v60  ;;  %v1541_v50 = vsub.f32 %v1508_v20, %v1533_v44 }
 0x6f1   :  { %5125 = vrcp.f32 %v1560_v48 }
 0x6f2   :  { %v1556_v51 = vmul.f32 1.442695, %v1541_v50 }
 0x6f3   :  { %v1563_v52 = vpop.xlane.xlu1 %1562  ;;  %v1572_v4 = vpop.xlane.xlu0 %1571 }
 0x6f4   :  { %5127 = vpow2.f32 %v1556_v51 }
 0x6f5   :  { %5129 = vrcp.f32 %v1563_v52 }
 0x6f7   :  { %v1575_v63 = vpop.xlane.xlu1 %1574 }
 0x6f8   :  { %5131 = vrcp.f32 %v1575_v63 }
 0x6f9   :  { %5133 = vrcp.f32 %v1572_v4 }
 0x6fd   :  { %v5124_v58 = vpop.eup %5123 }
 0x6fe   :  { %v1576_v62 = vsel %vm1509_vm10, %v5124_v58, 0.0  ;;  %v5126_v0 = vpop.eup %5125 }
 0x6ff   :  { %1577 = vadd.xlane.f32.xlu0 %v1576_v62  ;;  %v1590_v10 = vmul.f32 %v5126_v0, %v5116_v19 }
 0x701   :  { %v5128_v3 = vpop.eup %5127 }
 0x702   :  { %v1579_v6 = vsel %vm1509_vm10, %v5128_v3, 0.0  ;;  %v5130_v7 = vpop.eup %5129 }
 0x703   :  { %1580 = vadd.xlane.f32.xlu1 %v1579_v6  ;;  %v1591_v11 = vmul.f32 %v5130_v7, %v5118_v24 }
 0x705   :  { %v1598_v42 = vpack.c.bf16 %v1591_v11, %v1590_v10  ;;  %v5132_v61 = vpop.eup %5131 }
 0x706   :  { %v5134_v1 = vpop.eup %5133  ;;  %v1595_v43 = vmul.f32 %v5132_v61, %v5122_v31  ;;  %v1937_v31 = vsel %vm1698_vm11, %v4286_v25, 0  ;;  %v5065_v25 = vld [vmem:[%s6344_s8 + $0x18] sm:$0xff]  }
 0x707   :  { %4756 = vmatmul.mubr.msk.bf16.vlgmr.msra.gmra.mxu0 %vm1509_vm10, %v1598_v42  ;;  %v1594_v47 = vmul.f32 %v5134_v1, %v5120_v29 }
 0x708   :  { %4766 = vmatpush3.bf16.msra.mxu0 %v1700_v59  ;;  %4767 = vmatprep.mubr.msk.bf16.mxu0 %vm5250_vm0, %v5249_v2 }
 0x709   :  { %4777 = vmatprep.subr.bf16.mxu0 %v5249_v2  ;;  %v1600_v8 = vpack.c.bf16 %v1595_v43, %v1594_v47 }
 0x70f   :  { %4768 = vmatmul.mubr.msk.bf16.vlgmr.msra.gmra.mxu0 %vm708_vm6, %v1692_v57 }
 0x710   :  { %4778 = vmatpush3.bf16.msra.mxu0 %v1252_v37  ;;  %4779 = vmatprep.mubr.msk.bf16.mxu0 %vm5250_vm0, %v5249_v2 }
 0x711   :  { %4789 = vmatprep.subr.bf16.mxu0 %v5249_v2 }
 0x717   :  { %4780 = vmatmul.mubr.msk.bf16.vlgmr.msra.gmra.mxu0 %vm1509_vm10, %v1600_v8 }
 0x718   :  { %4790 = vmatpush3.bf16.msra.mxu0 %v1500_v56  ;;  %4791 = vmatprep.mubr.msk.bf16.mxu0 %vm5250_vm0, %v5249_v2 }
 0x719   :  { %4801 = vmatprep.subr.bf16.mxu0 %v5249_v2 }
 0x788   :  { %v1578_v37 = vpop.xlane.xlu0 %1577 }
 0x789   :  { %5135 = vrcp.f32 %v1578_v37 }
 0x78c   :  { %v1581_v12 = vpop.xlane.xlu1 %1580 }
 0x78d   :  { %5137 = vrcp.f32 %v1581_v12 }
 0x796   :  { %v5136_v53 = vpop.eup %5135 }
 0x797   :  { %v1596_v56 = vmul.f32 %v5136_v53, %v5124_v58 }
 0x79a   :  { %v5138_v54 = vpop.eup %5137 }
 0x79b   :  { %v1597_v45 = vmul.f32 %v5138_v54, %v5128_v3  ;;  %v4288_v3 = vld [vmem:[%s6345_s9 + $0x2] ss:$0 sm:$0xff] }
 0x79d   :  { %v1601_v46 = vpack.c.bf16 %v1597_v45, %v1596_v56  ;;  %v5064_v45 = vld [vmem:[%s6343_s7] sm:$0xff]  }
 0x79f   :  { %4792 = vmatmul.mubr.msk.bf16.vlgmr.msra.gmra.mxu0 %vm1509_vm10, %v1601_v46 }
 0x7a0   :  { %4805 = vmatprep.mubr.msk.bf16.mxu0 %vm5250_vm0, %v5249_v2 }
 0x7c7   :  { %v1639_v49 = vpop.f32.mrf.mxu0 }
 0x7c9   :  { %v4757_v13 = vpop.f32.mrf.mxu0 }
 0x7cb   :  { %v1642_v15 = vpop.f32.mrf.mxu0 }
 0x7cc   :  { %v1646_v16 = vpack.c.bf16 %v1642_v15, %v1639_v49 }
 0x7cd   :  { %v4758_v17 = vpop.f32.mrf.mxu0 }
 0x7ce   :  { %4774 = vmatmul.mubr.msk.bf16.vlgmr.msra.gmra.mxu1 %vm708_vm6, %v1646_v16 }
 0x7cf   :  { %v1736_v19 = vpop.f32.mrf.mxu0  ;;  %4784 = vmatpush3.bf16.msra.mxu1 %v1841_v18  ;;  %4785 = vmatprep.mubr.msk.bf16.mxu1 %vm5250_vm0, %v5249_v2 }
 0x7d0   :  { %4795 = vmatprep.subr.bf16.mxu1 %v5249_v2 }
 0x7d1   :  { %v4769_v28 = vpop.f32.mrf.mxu0 }
 0x7d3   :  { %v1739_v20 = vpop.f32.mrf.mxu0 }
 0x7d5   :  { %v4770_v23 = vpop.f32.mrf.mxu0 }
 0x7d7   :  { %v1827_v24 = vpop.f32.mrf.mxu0 }
 0x7d9   :  { %v4781_v26 = vpop.f32.mrf.mxu0 }
 0x7db   :  { %v1830_v27 = vpop.f32.mrf.mxu0 }
 0x7dc   :  { %v1834_v29 = vpack.c.bf16 %v1830_v27, %v1827_v24  ;;  %v4290_v24 = vld [vmem:[%s6345_s9 + $0x4] ss:$0 sm:$0xff] }
 0x7dd   :  { %v4782_v30 = vpop.f32.mrf.mxu0 }
 0x7de   :  { %4786 = vmatmul.mubr.msk.bf16.vlgmr.msra.gmra.mxu1 %vm708_vm6, %v1834_v29 }
 0x7df   :  { %4797 = vmatprep.mubr.msk.bf16.mxu1 %vm5250_vm0, %v5249_v2  ;;  %4796 = vmatpush3.bf16.msra.mxu1 %v1937_v31  ;;  %v5066_v31 = vld [vmem:[%s6344_s8 + $0x10] sm:$0xff]  }
 0x7e0   :  { %4809 = vmatprep.subr.bf16.mxu1 %v5249_v2 }
 0x85f   :  { %v1923_v32 = vpop.f32.mrf.mxu0 }
 0x861   :  { %v4793_v33 = vpop.f32.mrf.mxu0 }
 0x862   :  { %v5068_v33 = vld [vmem:[%s6344_s8] sm:$0xff]  }
 0x863   :  { %v1926_v36 = vpop.f32.mrf.mxu0 }
 0x864   :  { %v1930_v38 = vpack.c.bf16 %v1926_v36, %v1923_v32  ;;  %v5067_v32 = vld [vmem:[%s6344_s8 + $0x8] sm:$0xff]   ;;  %v4291_v36 = vld [vmem:[%s6345_s9 + $0x5] ss:$0 sm:$0xff] }
 0x865   :  { %v4794_v57 = vpop.f32.mrf.mxu0 }
 0x866   :  { %4798 = vmatmul.mubr.msk.bf16.vlgmr.msra.gmra.mxu1 %vm708_vm6, %v1930_v38 }
 0x867   :  { %4817 = vmatprep.mubr.msk.bf16.mxu1 %vm5250_vm0, %v5249_v2  ;;  %4810 = vmatpush3.bf16.msra.mxu1 %v5065_v25 }
 0x868   :  { %4811 = vmatprep.subr.bf16.mxu1 %v5249_v2 }
 0x86b   :  { %4812 = vmatpush3.bf16.msra.mxu1 %v5066_v31 }
 0x86c   :  { %4813 = vmatprep.subr.bf16.mxu1 %v5249_v2 }
 0x86f   :  { %4814 = vmatpush3.bf16.msra.mxu1 %v5067_v32  ;;  %v4301_v32 = vld [vmem:[%s6345_s9 + $0x7] ss:$0 sm:$0xff] }
 0x870   :  { %4815 = vmatprep.subr.bf16.mxu1 %v5249_v2 }
 0x873   :  { %4816 = vmatpush3.bf16.msra.mxu1 %v5068_v33 }
 0x874   :  { %4837 = vmatprep.subr.bf16.mxu1 %v5249_v2 }
 0x88e   :  { %v1783_v39 = vpop.f32.mrf.mxu1 }
 0x88f   :  { %v1784_v44 = vadd.f32 %v1783_v39, %v1736_v19  ;;  %v4289_v19 = vld [vmem:[%s6345_s9 + $0x3] ss:$0 sm:$0xff] }
 0x890   :  { %v4775_v40 = vpop.f32.mrf.mxu1 }
 0x892   :  { %v1786_v41 = vpop.f32.mrf.mxu1 }
 0x893   :  { %v1787_v52 = vadd.f32 %v1786_v41, %v1739_v20 }
 0x894   :  { %v4776_v60 = vpop.f32.mrf.mxu1 }
 0x89e   :  { %v1877_v48 = vpop.f32.mrf.mxu1 }
 0x89f   :  { %v1884_v50 = vadd.f32 %v1877_v48, %v1784_v44 }
 0x8a0   :  { %v4787_v51 = vpop.f32.mrf.mxu1 }
 0x8a2   :  { %v1880_v58 = vpop.f32.mrf.mxu1 }
 0x8a3   :  { %v1885_v62 = vadd.f32 %v1880_v58, %v1787_v52 }
 0x8a4   :  { %v4788_v63 = vpop.f32.mrf.mxu1 }
 0x926   :  { %v1973_v0 = vpop.f32.mrf.mxu1 }
 0x927   :  { %v1980_v4 = vadd.f32 %v1973_v0, %v1884_v50 }
 0x928   :  { %v4799_v6 = vpop.f32.mrf.mxu1 }
 0x929   :  { %v1987_v7 = vadd.f32 %v4288_v3, %v1980_v4 }
 0x92a   :  { %v1976_v9 = vpop.f32.mrf.mxu1 }
 0x92b   :  { %v1981_v10 = vadd.f32 %v1976_v9, %v1885_v62  ;;  %v1989_v11 = vadd.f32 %v1987_v7, %v5459_v21 }
 0x92c   :  { %v4800_v42 = vpop.f32.mrf.mxu1 }
 0x92d   :  { %v1988_v59 = vadd.f32 %v4288_v3, %v1981_v10  ;;  %v1993_v61 = vsel %vm282_vm5, %v1989_v11, 0.0 }
 0x92e   :  { %1994 = vadd.xlane.f32.xlu0 %v1993_v61 }
 0x92f   :  { %v1990_v1 = vadd.f32 %v1988_v59, %v5461_v22  ;;  %v5063_v22 = vld [vmem:[%s6343_s7 + $0x8] sm:$0xff]  }
 0x930   :  { %4802 = vmatpush3.bf16.msra.mxu0 %v5063_v22 }
 0x931   :  { %v1996_v43 = vsel %vm282_vm5, %v1990_v1, 0.0  ;;  %4803 = vmatprep.subr.bf16.mxu0 %v5249_v2 }
 0x932   :  { %1997 = vadd.xlane.f32.xlu1 %v1996_v43 }
 0x934   :  { %4804 = vmatpush3.bf16.msra.mxu0 %v5064_v45 }
 0x935   :  { %4821 = vmatprep.subr.bf16.mxu0 %v5249_v2 }
 0x9b7   :  { %v1995_v47 = vpop.xlane.xlu0 %1994 }
 0x9b8   :  { %v1999_v8 = vmul.f32 0.03125, %v1995_v47 }
 0x9ba   :  { %v2001_v34 = vsub.f32 %v1989_v11, %v1999_v8 }
 0x9bb   :  { %v1998_v35 = vpop.xlane.xlu1 %1997 }
 0x9bc   :  { %v2000_v37 = vmul.f32 0.03125, %v1998_v35  ;;  %v2003_v12 = vmul.f32 %v2001_v34, %v2001_v34 }
 0x9be   :  { %v2002_v53 = vsub.f32 %v1990_v1, %v2000_v37  ;;  %v2005_v54 = vsel %vm282_vm5, %v2003_v12, 0.0  ;;  %v4295_v1 = vld [vmem:[%s6345_s9 + $0x6] ss:$0 sm:$0xff] }
 0x9bf   :  { %2006 = vadd.xlane.f32.xlu0 %v2005_v54 }
 0x9c0   :  { %v2004_v21 = vmul.f32 %v2002_v53, %v2002_v53 }
 0x9c2   :  { %v2008_v56 = vsel %vm282_vm5, %v2004_v21, 0.0 }
 0x9c3   :  { %2009 = vadd.xlane.f32.xlu1 %v2008_v56 }
 0xa48   :  { %v2007_v46 = vpop.xlane.xlu0 %2006 }
 0xa49   :  { %v2011_v49 = vmul.f32 0.03125, %v2007_v46 }
 0xa4b   :  { %v2013_v13 = vadd.f32 1e-12, %v2011_v49 }
 0xa4c   :  { %v2010_v14 = vpop.xlane.xlu1 %2009 }
 0xa4d   :  { %5139 = vrsqrt.f32 %v2013_v13  ;;  %v2012_v15 = vmul.f32 0.03125, %v2010_v14 }
 0xa4f   :  { %v2014_v16 = vadd.f32 1e-12, %v2012_v15 }
 0xa51   :  { %5141 = vrsqrt.f32 %v2014_v16 }
 0xa5a   :  { %v5140_v18 = vpop.eup %5139 }
 0xa5b   :  { %v2017_v17 = vmul.f32 %v5140_v18, %v2001_v34 }
 0xa5d   :  { %v2023_v23 = vmul.f32 %v4289_v19, %v2017_v17  ;;  %v5069_v17 = vld [vmem:[%s6340_s4 + $0xc8] sm:$0xff]  }
 0xa5e   :  { %v5142_v28 = vpop.eup %5141 }
 0xa5f   :  { %v2018_v20 = vmul.f32 %v5142_v28, %v2002_v53  ;;  %v2029_v27 = vadd.f32 %v4290_v24, %v2023_v23  ;;  %v5071_v28 = vld [vmem:[%s6340_s4 + $0xc0] sm:$0xff]  }
 0xa61   :  { %v2024_v26 = vmul.f32 %v4289_v19, %v2018_v20  ;;  %v5070_v19 = vld [vmem:[%s6340_s4 + $0x148] sm:$0xff]   ;;  %v5072_v20 = vld [vmem:[%s6340_s4 + $0x140] sm:$0xff]  }
 0xa63   :  { %v2030_v29 = vadd.f32 %v4290_v24, %v2024_v26 }
 0xa65   :  { %v2031_v30 = vpack.c.bf16 %v2030_v29, %v2029_v27 }
 0xa67   :  { %4806 = vmatmul.mubr.msk.bf16.vlgmr.msra.gmra.mxu0 %vm282_vm5, %v2031_v30 }
 0xa68   :  { %4825 = vmatprep.mubr.msk.bf16.mxu0 %vm5250_vm0, %v5249_v2  ;;  %4822 = vmatpush3.bf16.msra.mxu0 %v5069_v17 }
 0xa69   :  { %4823 = vmatprep.subr.bf16.mxu0 %v5249_v2 }
 0xa6c   :  { %4824 = vmatpush3.bf16.msra.mxu0 %v5071_v28 }
 0xa6d   :  { %4829 = vmatprep.subr.bf16.mxu0 %v5249_v2 }
 0xb27   :  { %v2090_v38 = vpop.f32.mrf.mxu0 }
 0xb28   :  { %v2091_v57 = vadd.f32 %v4291_v36, %v2090_v38 }
 0xb29   :  { %v4807_v39 = vpop.f32.mrf.mxu0 }
 0xb2a   :  { %v2099_v40 = vmul.f32 0.044715, %v2091_v57  ;;  %v2097_v9 = vmul.f32 0.5, %v2091_v57 }
 0xb2b   :  { %v2093_v41 = vpop.f32.mrf.mxu0 }
 0xb2c   :  { %v2101_v60 = vmul.f32 %v2099_v40, %v2091_v57  ;;  %v2094_v44 = vadd.f32 %v4291_v36, %v2093_v41 }
 0xb2d   :  { %v4808_v48 = vpop.f32.mrf.mxu0 }
 0xb2e   :  { %v2103_v50 = vmul.f32 %v2101_v60, %v2091_v57  ;;  %v2100_v51 = vmul.f32 0.044715, %v2094_v44  ;;  %v2098_v10 = vmul.f32 0.5, %v2094_v44  ;;  %v5073_v60 = vld [vmem:[%s6340_s4 + $0x108] sm:$0xff]  }
 0xb30   :  { %v2105_v52 = vadd.f32 %v2103_v50, %v2091_v57  ;;  %v2102_v58 = vmul.f32 %v2100_v51, %v2094_v44  ;;  %v4302_v57 = vld [vmem:[%s6345_s9 + $0x8] ss:$0 sm:$0xff]  ;;  %v5075_v50 = vld [vmem:[%s6340_s4 + $0x100] sm:$0xff]   ;;  %v5076_v51 = vld [vmem:[%s6340_s4 + $0xd0] sm:$0xff]  }
 0xb32   :  { %v2107_v62 = vmul.f32 0.7978846, %v2105_v52  ;;  %v2104_v63 = vmul.f32 %v2102_v58, %v2094_v44  ;;  %v5077_v52 = vld [vmem:[%s6340_s4 + $0x158] sm:$0xff]   ;;  %v5078_v58 = vld [vmem:[%s6340_s4 + $0x150] sm:$0xff]  }
 0xb34   :  { %5143 = vtanh.f32 %v2107_v62  ;;  %v2106_v0 = vadd.f32 %v2104_v63, %v2094_v44  ;;  %v5074_v44 = vld [vmem:[%s6340_s4 + $0xd8] sm:$0xff]   ;;  %v5079_v62 = vld [vmem:[%s6340_s4 + $0xe8] sm:$0xff]   ;;  %v5080_v63 = vld [vmem:[%s6340_s4 + $0xe0] sm:$0xff]  }
 0xb36   :  { %v2108_v3 = vmul.f32 0.7978846, %v2106_v0  ;;  %v5081_v0 = vld [vmem:[%s6340_s4 + $0x168] sm:$0xff]  }
 0xb38   :  { %5145 = vtanh.f32 %v2108_v3  ;;  %v5082_v3 = vld [vmem:[%s6340_s4 + $0x160] sm:$0xff]  }
 0xb41   :  { %v5144_v4 = vpop.eup %5143 }
 0xb42   :  { %v2111_v6 = vadd.f32 1.0, %v5144_v4  ;;  %v5083_v4 = vld [vmem:[%s6340_s4 + $0xf8] sm:$0xff]  }
 0xb44   :  { %v2113_v42 = vmul.f32 %v2111_v6, %v2097_v9  ;;  %v5084_v6 = vld [vmem:[%s6340_s4 + $0xf0] sm:$0xff]  }
 0xb45   :  { %v5146_v7 = vpop.eup %5145  ;;  %v5086_v9 = vld [vmem:[%s6340_s4 + $0x170] sm:$0xff]  }
 0xb46   :  { %v2112_v11 = vadd.f32 1.0, %v5146_v7  ;;  %v5085_v7 = vld [vmem:[%s6340_s4 + $0x178] sm:$0xff]  }
 0xb48   :  { %v2114_v59 = vmul.f32 %v2112_v11, %v2098_v10 }
 0xb4a   :  { %v2115_v61 = vpack.c.bf16 %v2114_v59, %v2113_v42  ;;  %v4326_v42 = vld [vmem:[%s6341_s5 + $0x14] ss:$0 sm:$0xff] }
 0xb4c   :  { %4818 = vmatmul.mubr.msk.bf16.vlgmr.msra.gmra.mxu1 %vm2153_vm12, %v2115_v61 }
 0xb4d   :  { %4841 = vmatprep.mubr.msk.bf16.mxu1 %vm5250_vm0, %v5249_v2  ;;  %4838 = vmatpush3.bf16.msra.mxu1 %v5070_v19 }
 0xb4e   :  { %4839 = vmatprep.subr.bf16.mxu1 %v5249_v2 }
 0xb51   :  { %4840 = vmatpush3.bf16.msra.mxu1 %v5072_v20 }
 0xb52   :  { %4851 = vmatprep.subr.bf16.mxu1 %v5249_v2 }
 0xc0c   :  { %v2191_v43 = vpop.f32.mrf.mxu1 }
 0xc0d   :  { %v2192_v47 = vadd.f32 %v4295_v1, %v2191_v43 }
 0xc0e   :  { %v4819_v8 = vpop.f32.mrf.mxu1 }
 0xc0f   :  { %v2198_v34 = vadd.f32 %v2192_v47, %v2029_v27 }
 0xc10   :  { %v2194_v35 = vpop.f32.mrf.mxu1 }
 0xc11   :  { %v2195_v37 = vadd.f32 %v4295_v1, %v2194_v35  ;;  %v2202_v12 = vsel %vm282_vm5, %v2198_v34, 0.0 }
 0xc12   :  { %2203 = vadd.xlane.f32.xlu0 %v2202_v12  ;;  %v4820_v53 = vpop.f32.mrf.mxu1 }
 0xc13   :  { %v2199_v54 = vadd.f32 %v2195_v37, %v2030_v29 }
 0xc15   :  { %v2205_v21 = vsel %vm282_vm5, %v2199_v54, 0.0 }
 0xc16   :  { %2206 = vadd.xlane.f32.xlu1 %v2205_v21  ;;  %v4336_v21 = vld [vmem:[%s6341_s5 + $0xd] ss:$0 sm:$0xff] }
 0xc9b   :  { %v2204_v56 = vpop.xlane.xlu0 %2203 }
 0xc9c   :  { %v2208_v22 = vmul.f32 0.03125, %v2204_v56 }
 0xc9e   :  { %v2210_v45 = vsub.f32 %v2198_v34, %v2208_v22 }
 0xc9f   :  { %v2207_v46 = vpop.xlane.xlu1 %2206 }
 0xca0   :  { %v2209_v49 = vmul.f32 0.03125, %v2207_v46  ;;  %v2212_v13 = vmul.f32 %v2210_v45, %v2210_v45 }
 0xca2   :  { %v2211_v14 = vsub.f32 %v2199_v54, %v2209_v49  ;;  %v2214_v15 = vsel %vm282_vm5, %v2212_v13, 0.0  ;;  %v4317_v54 = vld [vmem:[%s6341_s5 + $0x10] ss:$0 sm:$0xff] }
 0xca3   :  { %2215 = vadd.xlane.f32.xlu0 %v2214_v15 }
 0xca4   :  { %v2213_v16 = vmul.f32 %v2211_v14, %v2211_v14 }
 0xca6   :  { %v2217_v18 = vsel %vm282_vm5, %v2213_v16, 0.0 }
 0xca7   :  { %2218 = vadd.xlane.f32.xlu1 %v2217_v18 }
 0xd2c   :  { %v2216_v23 = vpop.xlane.xlu0 %2215 }
 0xd2d   :  { %v2220_v24 = vmul.f32 0.03125, %v2216_v23  ;;  %v4308_v23 = vld [vmem:[%s6341_s5 + $0xc] ss:$0 sm:$0xff] }
 0xd2f   :  { %v2222_v26 = vadd.f32 1e-12, %v2220_v24  ;;  %v4354_v24 = vld [vmem:[%s6341_s5 + $0x15] ss:$0 sm:$0xff] }
 0xd30   :  { %v2219_v27 = vpop.xlane.xlu1 %2218 }
 0xd31   :  { %5147 = vrsqrt.f32 %v2222_v26  ;;  %v2221_v29 = vmul.f32 0.03125, %v2219_v27 }
 0xd33   :  { %v2223_v30 = vadd.f32 1e-12, %v2221_v29 }
 0xd35   :  { %5149 = vrsqrt.f32 %v2223_v30 }
 0xd3e   :  { %v5148_v25 = vpop.eup %5147 }
 0xd3f   :  { %v2226_v31 = vmul.f32 %v5148_v25, %v2210_v45 }
 0xd41   :  { %v2232_v36 = vmul.f32 %v4301_v32, %v2226_v31 }
 0xd42   :  { %v5150_v33 = vpop.eup %5149 }
 0xd43   :  { %v2227_v38 = vmul.f32 %v5150_v33, %v2211_v14  ;;  %v5926_v40 = vadd.f32 %v4302_v57, %v2232_v36  ;;  %v5087_v33 = vld [vmem:[%s6340_s4 + $0x118] sm:$0xff]  }
 0xd45   :  { %v2233_v39 = vmul.f32 %v4301_v32, %v2227_v38 }
 0xd47   :  { %v5928_v41 = vadd.f32 %v4302_v57, %v2233_v39  ;;  %v4364_v39 = vld [vmem:[%s6341_s5 + $0xe] ss:$0 sm:$0xff] }
 0xd49   :  { %v5938_v48 = vpack.c.bf16 %v5928_v41, %v5926_v40 }
 0xd4b   :  { %4826 = vmatmul.mubr.msk.bf16.vlgmr.msra.gmra.mxu0 %vm282_vm5, %v5938_v48  ;;  %4842 = vmatmul.mubr.msk.bf16.vlgmr.msra.gmra.mxu1 %vm282_vm5, %v5938_v48 }
 0xd4c   :  { %4830 = vmatpush3.bf16.msra.mxu0 %v5073_v60  ;;  %4852 = vmatpush3.bf16.msra.mxu1 %v5074_v44  ;;  %v5088_v44 = vld [vmem:[%s6340_s4 + $0x110] sm:$0xff]  }
 0xd4d   :  { %4831 = vmatprep.subr.bf16.mxu0 %v5249_v2  ;;  %4853 = vmatprep.subr.bf16.mxu1 %v5249_v2 }
 0xd4e   :  { %4833 = vmatprep.mubr.msk.bf16.mxu0 %vm5250_vm0, %v5249_v2  ;;  %4855 = vmatprep.mubr.msk.bf16.mxu1 %vm5250_vm0, %v5249_v2 }
 0xd50   :  { %4832 = vmatpush3.bf16.msra.mxu0 %v5075_v50  ;;  %4854 = vmatpush3.bf16.msra.mxu1 %v5076_v51 }
 0xd51   :  { %4867 = vmatprep.subr.bf16.mxu1 %v5249_v2  ;;  %4845 = vmatprep.subr.bf16.mxu0 %v5249_v2 }
 0xd53   :  { %4834 = vmatmul.mubr.msk.bf16.vlgmr.msra.gmra.mxu0 %vm282_vm5, %v5938_v48  ;;  %4856 = vmatmul.mubr.msk.bf16.vlgmr.msra.gmra.mxu1 %vm282_vm5, %v5938_v48 }
 0xd54   :  { %4868 = vmatpush3.bf16.msra.mxu1 %v5077_v52  ;;  %4871 = vmatprep.mubr.msk.bf16.mxu1 %vm5250_vm0, %v5249_v2 }
 0xd55   :  { %4869 = vmatprep.subr.bf16.mxu1 %v5249_v2  ;;  %4847 = vmatprep.mubr.msk.bf16.mxu0 %vm5250_vm0, %v5249_v2 }
 0xd58   :  { %4870 = vmatpush3.bf16.msra.mxu1 %v5078_v58 }
 0xd59   :  { %4881 = vmatprep.subr.bf16.mxu1 %v5249_v2 }
 0xd5b   :  { %4872 = vmatmul.mubr.msk.bf16.vlgmr.msra.gmra.mxu1 %vm282_vm5, %v5938_v48 }
 0xd5c   :  { %4882 = vmatpush3.bf16.msra.mxu1 %v5079_v62  ;;  %4885 = vmatprep.mubr.msk.bf16.mxu1 %vm5250_vm0, %v5249_v2 }
 0xd5d   :  { %4883 = vmatprep.subr.bf16.mxu1 %v5249_v2 }
 0xd60   :  { %4884 = vmatpush3.bf16.msra.mxu1 %v5080_v63 }
 0xd61   :  { %4897 = vmatprep.subr.bf16.mxu1 %v5249_v2 }
 0xd63   :  { %4886 = vmatmul.mubr.msk.bf16.vlgmr.msra.gmra.mxu1 %vm282_vm5, %v5938_v48 }
 0xd64   :  { %4898 = vmatpush3.bf16.msra.mxu1 %v5081_v0  ;;  %4901 = vmatprep.mubr.msk.bf16.mxu1 %vm5250_vm0, %v5249_v2  ;;  %v4382_v0 = vld [vmem:[%s6341_s5 + $0x16] ss:$0 sm:$0xff] }
 0xd65   :  { %4899 = vmatprep.subr.bf16.mxu1 %v5249_v2 }
 0xd68   :  { %4900 = vmatpush3.bf16.msra.mxu1 %v5082_v3 }
 0xd69   :  { %4911 = vmatprep.subr.bf16.mxu1 %v5249_v2 }
 0xd6b   :  { %4902 = vmatmul.mubr.msk.bf16.vlgmr.msra.gmra.mxu1 %vm282_vm5, %v5938_v48 }
 0xd6c   :  { %4912 = vmatpush3.bf16.msra.mxu1 %v5083_v4  ;;  %4915 = vmatprep.mubr.msk.bf16.mxu1 %vm5250_vm0, %v5249_v2 }
 0xd6d   :  { %4913 = vmatprep.subr.bf16.mxu1 %v5249_v2 }
 0xd70   :  { %4914 = vmatpush3.bf16.msra.mxu1 %v5084_v6 }
 0xd71   :  { %4927 = vmatprep.subr.bf16.mxu1 %v5249_v2 }
 0xd73   :  { %4916 = vmatmul.mubr.msk.bf16.vlgmr.msra.gmra.mxu1 %vm282_vm5, %v5938_v48 }
 0xd74   :  { %4928 = vmatpush3.bf16.msra.mxu1 %v5085_v7  ;;  %4931 = vmatprep.mubr.msk.bf16.mxu1 %vm5250_vm0, %v5249_v2 }
 0xd75   :  { %4929 = vmatprep.subr.bf16.mxu1 %v5249_v2 }
 0xd78   :  { %4930 = vmatpush3.bf16.msra.mxu1 %v5086_v9 }
 0xd79   :  { %4941 = vmatprep.subr.bf16.mxu1 %v5249_v2 }
 0xd7b   :  { %4932 = vmatmul.mubr.msk.bf16.vlgmr.msra.gmra.mxu1 %vm282_vm5, %v5938_v48 }
 0xd7c   :  { %4943 = vmatprep.mubr.msk.bf16.mxu1 %vm5250_vm0, %v5249_v2 }
 0xe0b   :  { %v2303_v10 = vpop.f32.mrf.mxu0  ;;  %v2435_v11 = vpop.f32.mrf.mxu1 }
 0xe0c   :  { %v2436_v47 = vadd.f32 %v4326_v42, %v2435_v11  ;;  %v2304_v30 = vadd.f32 %v4308_v23, %v2303_v10 }
 0xe0d   :  { %v4827_v59 = vpop.f32.mrf.mxu0  ;;  %v4843_v61 = vpop.f32.mrf.mxu1 }
 0xe0f   :  { %v2306_v1 = vpop.f32.mrf.mxu0  ;;  %v2438_v43 = vpop.f32.mrf.mxu1 }
 0xe10   :  { %v2439_v8 = vadd.f32 %v4326_v42, %v2438_v43  ;;  %v2307_v27 = vadd.f32 %v4308_v23, %v2306_v1  ;;  %v4392_v42 = vld [vmem:[%s6341_s5 + $0xf] ss:$0 sm:$0xff] }
 0xe11   :  { %v4828_v34 = vpop.f32.mrf.mxu0  ;;  %v4844_v35 = vpop.f32.mrf.mxu1 }
 0xe12   :  { %v2491_v37 = vpack.c.bf16 %v2439_v8, %v2436_v47  ;;  %v2442_v36 = vpack.c.bf16 %v2307_v27, %v2304_v30  ;;  %v4410_v35 = vld [vmem:[%s6341_s5 + $0x17] ss:$0 sm:$0xff]  ;;  %v5089_v27 = vld [vmem:[%s6340_s4 + $0x128] sm:$0xff]  }
 0xe13   :  { %v2369_v12 = vpop.f32.mrf.mxu0  ;;  %v2551_v53 = vpop.f32.mrf.mxu1 }
 0xe14   :  { %4942 = vmatpush3.bf16.msra.mxu1 %v2491_v37  ;;  %v2370_v49 = vadd.f32 %v4317_v54, %v2369_v12  ;;  %v6036_v13 = vadd.f32 %v4336_v21, %v2551_v53 }
 0xe15   :  { %v4835_v56 = vpop.f32.mrf.mxu0  ;;  %v4857_v22 = vpop.f32.mrf.mxu1  ;;  %4953 = vmatprep.subr.bf16.mxu1 %v5249_v2 }
 0xe17   :  { %v2372_v45 = vpop.f32.mrf.mxu0  ;;  %v2554_v46 = vpop.f32.mrf.mxu1 }
 0xe18   :  { %v2373_v14 = vadd.f32 %v4317_v54, %v2372_v45  ;;  %v6038_v15 = vadd.f32 %v4336_v21, %v2554_v46 }
 0xe19   :  { %v4836_v16 = vpop.f32.mrf.mxu0  ;;  %v4858_v18 = vpop.f32.mrf.mxu1 }
 0xe1a   :  { %v2443_v17 = vpack.c.bf16 %v2373_v14, %v2370_v49  ;;  %v2690_v19 = vpack.c.bf16 %v6038_v15, %v6036_v13  ;;  %v4345_v16 = vld [vmem:[%s6341_s5 + $0x11] ss:$0 sm:$0xff] }
 0xe1b   :  { %v2683_v28 = vpop.f32.mrf.mxu1 }
 0xe1c   :  { %v2448_v20 = vsel %vm708_vm6, %v2443_v17, 0  ;;  %v6050_v25 = vadd.f32 %v4354_v24, %v2683_v28 }
 0xe1d   :  { %4846 = vmatpush3.bf16.xpose.msra.mxu0 %v2448_v20  ;;  %v4873_v26 = vpop.f32.mrf.mxu1 }
 0xe1e   :  { %4859 = vmatprep.subr.bf16.mxu0 %v5249_v2 }
 0xe1f   :  { %v2686_v29 = vpop.f32.mrf.mxu1 }
 0xe20   :  { %v6052_v31 = vadd.f32 %v4354_v24, %v2686_v29  ;;  %v5090_v29 = vld [vmem:[%s6340_s4 + $0x120] sm:$0xff]  }
 0xe21   :  { %v4874_v32 = vpop.f32.mrf.mxu1 }
 0xe22   :  { %v2739_v38 = vpack.c.bf16 %v6052_v31, %v6050_v25 }
 0xe23   :  { %v2799_v57 = vpop.f32.mrf.mxu1 }
 0xe24   :  { %4848 = vmatmul.mubr.msk.bf16.vlgmr.msra.gmra.mxu0 %vm708_vm6, %v2442_v36  ;;  %v6069_v51 = vadd.f32 %v4364_v39, %v2799_v57 }
 0xe25   :  { %4860 = vmatpush3.bf16.msra.mxu0 %v5087_v33  ;;  %v4887_v60 = vpop.f32.mrf.mxu1  ;;  %4863 = vmatprep.mubr.msk.bf16.mxu0 %vm5250_vm0, %v5249_v2 }
 0xe26   :  { %4861 = vmatprep.subr.bf16.mxu0 %v5249_v2  ;;  %v4373_v60 = vld [vmem:[%s6341_s5 + $0x12] ss:$0 sm:$0xff] }
 0xe27   :  { %v2802_v50 = vpop.f32.mrf.mxu1 }
 0xe28   :  { %v6071_v52 = vadd.f32 %v4364_v39, %v2802_v50 }
 0xe29   :  { %4862 = vmatpush3.bf16.msra.mxu0 %v5088_v44  ;;  %v4888_v58 = vpop.f32.mrf.mxu1 }
 0xe2a   :  { %v2938_v62 = vpack.c.bf16 %v6071_v52, %v6069_v51  ;;  %4875 = vmatprep.subr.bf16.mxu0 %v5249_v2 }
 0xe2b   :  { %v2931_v63 = vpop.f32.mrf.mxu1 }
 0xe2c   :  { %4864 = vmatmul.mubr.msk.bf16.vlgmr.msra.gmra.mxu0 %vm282_vm5, %v5938_v48  ;;  %v6083_v6 = vadd.f32 %v4382_v0, %v2931_v63 }
 0xe2d   :  { %v4903_v3 = vpop.f32.mrf.mxu1  ;;  %4877 = vmatprep.mubr.msk.bf16.mxu0 %vm5250_vm0, %v5249_v2 }
 0xe2f   :  { %v2934_v4 = vpop.f32.mrf.mxu1 }
 0xe30   :  { %v6085_v7 = vadd.f32 %v4382_v0, %v2934_v4 }
 0xe31   :  { %v4904_v9 = vpop.f32.mrf.mxu1 }
 0xe32   :  { %v2987_v10 = vpack.c.bf16 %v6085_v7, %v6083_v6  ;;  %v5091_v9 = vld [vmem:[%s6340_s4 + $0x138] sm:$0xff]   ;;  %v4416_v6 = vld [vmem:[%s6342_s6 + $0x10] sm:$0xf] }
 0xe33   :  { %v3047_v11 = vpop.f32.mrf.mxu1  ;;  %v3481_v7 = vsel %vm1698_vm11, %v4416_v6, 0 }
 0xe34   :  { %v6092_v1 = vadd.f32 %v4392_v42, %v3047_v11  ;;  %v5092_v11 = vld [vmem:[%s6340_s4 + $0x130] sm:$0xff]  }
 0xe35   :  { %v4917_v59 = vpop.f32.mrf.mxu1 }
 0xe37   :  { %v3050_v61 = vpop.f32.mrf.mxu1 }
 0xe38   :  { %v6094_v43 = vadd.f32 %v4392_v42, %v3050_v61 }
 0xe39   :  { %v4918_v47 = vpop.f32.mrf.mxu1 }
 0xe3a   :  { %v3186_v8 = vpack.c.bf16 %v6094_v43, %v6092_v1 }
 0xe3b   :  { %v3179_v34 = vpop.f32.mrf.mxu1 }
 0xe3c   :  { %v6101_v53 = vadd.f32 %v4410_v35, %v3179_v34 }
 0xe3d   :  { %v4933_v37 = vpop.f32.mrf.mxu1 }
 0xe3f   :  { %v3182_v12 = vpop.f32.mrf.mxu1 }
 0xe40   :  { %v6103_v54 = vadd.f32 %v4410_v35, %v3182_v12 }
 0xe41   :  { %v4934_v21 = vpop.f32.mrf.mxu1 }
 0xe42   :  { %v3235_v56 = vpack.c.bf16 %v6103_v54, %v6101_v53 }
 0xee4   :  { %v6107_v22 = vpop.f32.mrf.mxu0 }
 0xee5   :  { %v3236_v34 = vadd.f32 %v6107_v22, %v5728_v55 }
 0xee6   :  { %v4849_v45 = vpop.f32.mrf.mxu0 }
 0xee7   :  { %v3244_v12 = vsel %vm1509_vm10, %v3236_v34, -inf }
 0xee8   :  { %v6109_v46 = vpop.f32.mrf.mxu0 }
 0xeea   :  { %v4850_v49 = vpop.f32.mrf.mxu0 }
 0xeec   :  { %v2617_v14 = vpop.f32.mrf.mxu0 }
 0xeed   :  { %v2618_v28 = vadd.f32 %v4345_v16, %v2617_v14 }
 0xeee   :  { %v4865_v18 = vpop.f32.mrf.mxu0 }
 0xef0   :  { %v2620_v17 = vpop.f32.mrf.mxu0 }
 0xef1   :  { %v2621_v20 = vadd.f32 %v4345_v16, %v2620_v17 }
 0xef2   :  { %v4866_v23 = vpop.f32.mrf.mxu0 }
 0xef3   :  { %v2691_v24 = vpack.c.bf16 %v2621_v20, %v2618_v28  ;;  %v4401_v23 = vld [vmem:[%s6341_s5 + $0x13] ss:$0 sm:$0xff] }
 0xef5   :  { %v2696_v26 = vsel %vm708_vm6, %v2691_v24, 0 }
 0xef6   :  { %4876 = vmatpush3.bf16.xpose.msra.mxu0 %v2696_v26 }
 0xef7   :  { %4889 = vmatprep.subr.bf16.mxu0 %v5249_v2 }
 0xefd   :  { %4878 = vmatmul.mubr.msk.bf16.vlgmr.msra.gmra.mxu0 %vm708_vm6, %v2690_v19 }
 0xefe   :  { %4890 = vmatpush3.bf16.msra.mxu0 %v5089_v27  ;;  %4893 = vmatprep.mubr.msk.bf16.mxu0 %vm5250_vm0, %v5249_v2 }
 0xeff   :  { %4891 = vmatprep.subr.bf16.mxu0 %v5249_v2 }
 0xf02   :  { %4892 = vmatpush3.bf16.msra.mxu0 %v5090_v29 }
 0xf03   :  { %4905 = vmatprep.subr.bf16.mxu0 %v5249_v2 }
 0xf05   :  { %4894 = vmatmul.mubr.msk.bf16.vlgmr.msra.gmra.mxu0 %vm282_vm5, %v5938_v48 }
 0xf06   :  { %4907 = vmatprep.mubr.msk.bf16.mxu0 %vm5250_vm0, %v5249_v2 }
 0xfbd   :  { %v2732_v13 = vpop.f32.mrf.mxu0 }
 0xfbe   :  { %v3238_v15 = vadd.f32 %v2732_v13, %v5728_v55 }
 0xfbf   :  { %v4879_v19 = vpop.f32.mrf.mxu0 }
 0xfc0   :  { %v3250_v30 = vsel %vm1509_vm10, %v3238_v15, -inf }
 0xfc1   :  { %3251 = vmax.xlane.f32.xlu0 %v3250_v30  ;;  %v2735_v32 = vpop.f32.mrf.mxu0 }
 0xfc2   :  { %v3239_v33 = vadd.f32 %v2735_v32, %v5733_v5 }
 0xfc3   :  { %v4880_v36 = vpop.f32.mrf.mxu0 }
 0xfc4   :  { %v3253_v57 = vsel %vm1509_vm10, %v3239_v33, -inf }
 0xfc5   :  { %3254 = vmax.xlane.f32.xlu1 %v3253_v57  ;;  %v2865_v39 = vpop.f32.mrf.mxu0 }
 0xfc6   :  { %v2866_v58 = vadd.f32 %v4373_v60, %v2865_v39 }
 0xfc7   :  { %v4895_v44 = vpop.f32.mrf.mxu0 }
 0xfc9   :  { %v2868_v50 = vpop.f32.mrf.mxu0 }
 0xfca   :  { %v2869_v63 = vadd.f32 %v4373_v60, %v2868_v50 }
 0xfcb   :  { %v4896_v0 = vpop.f32.mrf.mxu0 }
 0xfcc   :  { %v2939_v3 = vpack.c.bf16 %v2869_v63, %v2866_v58 }
 0xfce   :  { %v2944_v4 = vsel %vm708_vm6, %v2939_v3, 0 }
 0xfcf   :  { %4906 = vmatpush3.bf16.xpose.msra.mxu0 %v2944_v4 }
 0xfd0   :  { %4919 = vmatprep.subr.bf16.mxu0 %v5249_v2 }
 0xfd6   :  { %4908 = vmatmul.mubr.msk.bf16.vlgmr.msra.gmra.mxu0 %vm708_vm6, %v2938_v62 }
 0xfd7   :  { %4920 = vmatpush3.bf16.msra.mxu0 %v5091_v9  ;;  %4923 = vmatprep.mubr.msk.bf16.mxu0 %vm5250_vm0, %v5249_v2 }
 0xfd8   :  { %4921 = vmatprep.subr.bf16.mxu0 %v5249_v2 }
 0xfdb   :  { %4922 = vmatpush3.bf16.msra.mxu0 %v5092_v11 }
 0xfdc   :  { %4935 = vmatprep.subr.bf16.mxu0 %v5249_v2 }
 0xfde   :  { %4924 = vmatmul.mubr.msk.bf16.vlgmr.msra.gmra.mxu0 %vm282_vm5, %v5938_v48  ;;  %v3237_v48 = vadd.f32 %v6109_v46, %v5733_v5 }
 0xfdf   :  { %4937 = vmatprep.mubr.msk.bf16.mxu0 %vm5250_vm0, %v5249_v2 }
 0xfe0   :  { %v3247_v45 = vsel %vm1509_vm10, %v3237_v48, -inf }
0x104a   :  { %v3252_v51 = vpop.xlane.xlu0 %3251 }
0x104b   :  { %v3270_v52 = vsub.f32 %v3238_v15, %v3252_v51 }
0x104d   :  { %v3280_v62 = vmul.f32 1.442695, %v3270_v52 }
0x104e   :  { %v3255_v42 = vpop.xlane.xlu1 %3254 }
0x104f   :  { %5151 = vpow2.f32 %v3280_v62  ;;  %v3271_v59 = vsub.f32 %v3239_v33, %v3255_v42 }
0x1051   :  { %v3282_v61 = vmul.f32 1.442695, %v3271_v59 }
0x1053   :  { %5153 = vpow2.f32 %v3282_v61 }
0x105c   :  { %v5152_v47 = vpop.eup %5151 }
0x105d   :  { %v3298_v35 = vsel %vm1509_vm10, %v5152_v47, 0.0 }
0x105e   :  { %3299 = vadd.xlane.f32.xlu0 %v3298_v35 }
0x1060   :  { %v5154_v37 = vpop.eup %5153 }
0x1061   :  { %v3301_v21 = vsel %vm1509_vm10, %v5154_v37, 0.0 }
0x1062   :  { %3245 = vmax.xlane.f32.xlu0 %v3244_v12  ;;  %3302 = vadd.xlane.f32.xlu1 %v3301_v21 }
0x1066   :  { %3248 = vmax.xlane.f32.xlu1 %v3247_v45 }
0x1096   :  { %v2980_v49 = vpop.f32.mrf.mxu0 }
0x1097   :  { %v3240_v14 = vadd.f32 %v2980_v49, %v5728_v55 }
0x1098   :  { %v4909_v22 = vpop.f32.mrf.mxu0 }
0x1099   :  { %v3256_v16 = vsel %vm1509_vm10, %v3240_v14, -inf }
0x109a   :  { %3257 = vmax.xlane.f32.xlu0 %v3256_v16  ;;  %v2983_v18 = vpop.f32.mrf.mxu0 }
0x109b   :  { %v3241_v17 = vadd.f32 %v2983_v18, %v5733_v5 }
0x109c   :  { %v4910_v46 = vpop.f32.mrf.mxu0 }
0x109d   :  { %v3259_v28 = vsel %vm1509_vm10, %v3241_v17, -inf }
0x109e   :  { %3260 = vmax.xlane.f32.xlu1 %v3259_v28  ;;  %v3113_v20 = vpop.f32.mrf.mxu0 }
0x109f   :  { %v3114_v27 = vadd.f32 %v4401_v23, %v3113_v20 }
0x10a0   :  { %v4925_v24 = vpop.f32.mrf.mxu0 }
0x10a2   :  { %v3116_v26 = vpop.f32.mrf.mxu0 }
0x10a3   :  { %v3117_v29 = vadd.f32 %v4401_v23, %v3116_v26 }
0x10a4   :  { %v4926_v13 = vpop.f32.mrf.mxu0 }
0x10a5   :  { %v3187_v15 = vpack.c.bf16 %v3117_v29, %v3114_v27 }
0x10a7   :  { %v3192_v19 = vsel %vm708_vm6, %v3187_v15, 0 }
0x10a8   :  { %4936 = vmatpush3.bf16.xpose.msra.mxu0 %v3192_v19 }
0x10a9   :  { %4947 = vmatprep.subr.bf16.mxu0 %v5249_v2 }
0x10af   :  { %4938 = vmatmul.mubr.msk.bf16.vlgmr.msra.gmra.mxu0 %vm708_vm6, %v3186_v8 }
0x10b0   :  { %4948 = vmatpush3.bf16.msra.mxu0 %v2739_v38  ;;  %4949 = vmatprep.mubr.msk.bf16.mxu0 %vm5250_vm0, %v5249_v2 }
0x10b1   :  { %4959 = vmatprep.subr.bf16.mxu0 %v5249_v2 }
0x10e7   :  { %v3300_v30 = vpop.xlane.xlu0 %3299 }
0x10e8   :  { %5155 = vrcp.f32 %v3300_v30 }
0x10eb   :  { %v3303_v32 = vpop.xlane.xlu1 %3302  ;;  %v3246_v25 = vpop.xlane.xlu0 %3245 }
0x10ec   :  { %5157 = vrcp.f32 %v3303_v32  ;;  %v3268_v31 = vsub.f32 %v3236_v34, %v3246_v25  ;;  %v4418_v32 = vld [vmem:[%s6342_s6 + $0x14] sm:$0xf] }
0x10ee   :  { %v3276_v60 = vmul.f32 1.442695, %v3268_v31 }
0x10ef   :  { %v3249_v38 = vpop.xlane.xlu1 %3248 }
0x10f0   :  { %v3269_v8 = vsub.f32 %v3237_v48, %v3249_v38  ;;  %5159 = vpow2.f32 %v3276_v60 }
0x10f2   :  { %v3278_v58 = vmul.f32 1.442695, %v3269_v8 }
0x10f4   :  { %5161 = vpow2.f32 %v3278_v58 }
0x10f5   :  { %v5156_v33 = vpop.eup %5155 }
0x10f6   :  { %v3326_v57 = vmul.f32 %v5156_v33, %v5152_v47 }
0x10f9   :  { %v5158_v36 = vpop.eup %5157 }
0x10fa   :  { %v3327_v39 = vmul.f32 %v5158_v36, %v5154_v37 }
0x10fc   :  { %v3333_v1 = vpack.c.bf16 %v3327_v39, %v3326_v57  ;;  %v3434_v39 = vsel %vm1698_vm11, %v4418_v32, 0 }
0x10fd   :  { %v5160_v52 = vpop.eup %5159 }
0x10fe   :  { %4950 = vmatmul.mubr.msk.bf16.vlgmr.msra.gmra.mxu0 %vm1509_vm10, %v3333_v1  ;;  %v3292_v47 = vsel %vm1509_vm10, %v5160_v52, 0.0 }
0x10ff   :  { %4961 = vmatprep.mubr.msk.bf16.mxu0 %vm5250_vm0, %v5249_v2  ;;  %4960 = vmatpush3.bf16.msra.mxu0 %v3481_v7 }
0x1100   :  { %4971 = vmatprep.subr.bf16.mxu0 %v5249_v2 }
0x1101   :  { %v5162_v61 = vpop.eup %5161 }
0x1123   :  { %v3258_v43 = vpop.xlane.xlu0 %3257 }
0x1124   :  { %v3272_v44 = vsub.f32 %v3240_v14, %v3258_v43 }
0x1126   :  { %v3284_v63 = vmul.f32 1.442695, %v3272_v44 }
0x1127   :  { %v3261_v50 = vpop.xlane.xlu1 %3260 }
0x1128   :  { %v3273_v0 = vsub.f32 %v3241_v17, %v3261_v50  ;;  %5163 = vpow2.f32 %v3284_v63  ;;  %v4422_v63 = vld [vmem:[%s6342_s6 + $0x18] sm:$0xf] }
0x112a   :  { %v3286_v3 = vmul.f32 1.442695, %v3273_v0 }
0x112c   :  { %5165 = vpow2.f32 %v3286_v3 }
0x1135   :  { %v5164_v35 = vpop.eup %5163 }
0x1136   :  { %v3304_v37 = vsel %vm1509_vm10, %v5164_v35, 0.0 }
0x1139   :  { %v5166_v48 = vpop.eup %5165 }
0x113a   :  { %v3307_v12 = vsel %vm1509_vm10, %v5166_v48, 0.0 }
0x116f   :  { %v3228_v4 = vpop.f32.mrf.mxu0 }
0x1170   :  { %v3242_v9 = vadd.f32 %v3228_v4, %v5728_v55  ;;  %v3295_v55 = vsel %vm1509_vm10, %v5162_v61, 0.0  ;;  %v3575_v4 = vsel %vm1698_vm11, %v4422_v63, 0 }
0x1171   :  { %v4939_v11 = vpop.f32.mrf.mxu0 }
0x1172   :  { %v3262_v51 = vsel %vm1509_vm10, %v3242_v9, -inf }
0x1173   :  { %3263 = vmax.xlane.f32.xlu0 %v3262_v51  ;;  %v3231_v62 = vpop.f32.mrf.mxu0 }
0x1174   :  { %v3243_v42 = vadd.f32 %v3231_v62, %v5733_v5 }
0x1175   :  { %v4940_v59 = vpop.f32.mrf.mxu0 }
0x1176   :  { %v3265_v34 = vsel %vm1509_vm10, %v3243_v42, -inf }
0x1177   :  { %3293 = vadd.xlane.f32.xlu0 %v3292_v47  ;;  %3266 = vmax.xlane.f32.xlu1 %v3265_v34 }
0x117b   :  { %3305 = vadd.xlane.f32.xlu0 %v3304_v37  ;;  %3296 = vadd.xlane.f32.xlu1 %v3295_v55 }
0x117f   :  { %3308 = vadd.xlane.f32.xlu1 %v3307_v12 }
0x11be   :  { %v3420_v5 = vpop.f32.mrf.mxu0 }
0x11c0   :  { %v4951_v21 = vpop.f32.mrf.mxu0 }
0x11c2   :  { %v3423_v45 = vpop.f32.mrf.mxu0 }
0x11c3   :  { %v3427_v49 = vpack.c.bf16 %v3423_v45, %v3420_v5 }
0x11c4   :  { %v4952_v14 = vpop.f32.mrf.mxu0 }
0x11fc   :  { %v3264_v22 = vpop.xlane.xlu0 %3263 }
0x11fd   :  { %v3274_v16 = vsub.f32 %v3242_v9, %v3264_v22 }
0x11ff   :  { %v3288_v18 = vmul.f32 1.442695, %v3274_v16 }
0x1200   :  { %v3267_v17 = vpop.xlane.xlu1 %3266  ;;  %v3294_v46 = vpop.xlane.xlu0 %3293 }
0x1201   :  { %5167 = vpow2.f32 %v3288_v18  ;;  %v3275_v28 = vsub.f32 %v3243_v42, %v3267_v17 }
0x1202   :  { %5169 = vrcp.f32 %v3294_v46 }
0x1203   :  { %v3290_v20 = vmul.f32 1.442695, %v3275_v28 }
0x1204   :  { %v3297_v23 = vpop.xlane.xlu1 %3296  ;;  %v3306_v15 = vpop.xlane.xlu0 %3305 }
0x1205   :  { %5171 = vpow2.f32 %v3290_v20 }
0x1206   :  { %5173 = vrcp.f32 %v3297_v23 }
0x1208   :  { %v3309_v27 = vpop.xlane.xlu1 %3308 }
0x1209   :  { %5175 = vrcp.f32 %v3309_v27  ;;  %v4427_v27 = vld [vmem:[%s6345_s9 + $0x9] ss:$0 sm:$0xff] }
0x120a   :  { %5177 = vrcp.f32 %v3306_v15 }
0x120e   :  { %v5168_v24 = vpop.eup %5167 }
0x120f   :  { %v3310_v26 = vsel %vm1509_vm10, %v5168_v24, 0.0  ;;  %v5170_v29 = vpop.eup %5169 }
0x1210   :  { %3311 = vadd.xlane.f32.xlu0 %v3310_v26  ;;  %v3324_v33 = vmul.f32 %v5170_v29, %v5160_v52 }
0x1212   :  { %v5172_v13 = vpop.eup %5171 }
0x1213   :  { %v3313_v19 = vsel %vm1509_vm10, %v5172_v13, 0.0  ;;  %v5174_v30 = vpop.eup %5173 }
0x1214   :  { %3314 = vadd.xlane.f32.xlu1 %v3313_v19  ;;  %v3325_v36 = vmul.f32 %v5174_v30, %v5162_v61 }
0x1216   :  { %v3332_v57 = vpack.c.bf16 %v3325_v36, %v3324_v33  ;;  %v5176_v1 = vpop.eup %5175 }
0x1217   :  { %v5178_v25 = vpop.eup %5177  ;;  %v3329_v31 = vmul.f32 %v5176_v1, %v5166_v48 }
0x1218   :  { %4944 = vmatmul.mubr.msk.bf16.vlgmr.msra.gmra.mxu1 %vm1509_vm10, %v3332_v57  ;;  %v3328_v38 = vmul.f32 %v5178_v25, %v5164_v35  ;;  %v4425_v35 = vld [vmem:[%s6342_s6 + $0x1c] sm:$0xf] }
0x1219   :  { %4954 = vmatpush3.bf16.msra.mxu1 %v3434_v39  ;;  %4955 = vmatprep.mubr.msk.bf16.mxu1 %vm5250_vm0, %v5249_v2  ;;  %v3671_v37 = vsel %vm1698_vm11, %v4425_v35, 0  ;;  %v5097_v35 = vld [vmem:[%s6344_s8 + $0x28] sm:$0xff]  }
0x121a   :  { %4965 = vmatprep.subr.bf16.mxu1 %v5249_v2  ;;  %v3334_v43 = vpack.c.bf16 %v3329_v31, %v3328_v38 }
0x1220   :  { %4956 = vmatmul.mubr.msk.bf16.vlgmr.msra.gmra.mxu1 %vm708_vm6, %v3427_v49 }
0x1221   :  { %4966 = vmatpush3.bf16.msra.mxu1 %v2987_v10  ;;  %4967 = vmatprep.mubr.msk.bf16.mxu1 %vm5250_vm0, %v5249_v2 }
0x1222   :  { %4977 = vmatprep.subr.bf16.mxu1 %v5249_v2 }
0x1228   :  { %4968 = vmatmul.mubr.msk.bf16.vlgmr.msra.gmra.mxu1 %vm1509_vm10, %v3334_v43 }
0x1229   :  { %4978 = vmatpush3.bf16.msra.mxu1 %v3235_v56  ;;  %4979 = vmatprep.mubr.msk.bf16.mxu1 %vm5250_vm0, %v5249_v2 }
0x122a   :  { %4989 = vmatprep.subr.bf16.mxu1 %v5249_v2 }
0x1299   :  { %v3312_v10 = vpop.xlane.xlu0 %3311 }
0x129a   :  { %5179 = vrcp.f32 %v3312_v10 }
0x129d   :  { %v3315_v8 = vpop.xlane.xlu1 %3314 }
0x129e   :  { %5181 = vrcp.f32 %v3315_v8 }
0x12a7   :  { %v5180_v53 = vpop.eup %5179 }
0x12a8   :  { %v3330_v56 = vmul.f32 %v5180_v53, %v5168_v24 }
0x12ab   :  { %v5182_v54 = vpop.eup %5181 }
0x12ac   :  { %v3331_v60 = vmul.f32 %v5182_v54, %v5172_v13  ;;  %v5094_v54 = vld [vmem:[%s6343_s7 + $0x10] sm:$0xff]  }
0x12ae   :  { %v3335_v44 = vpack.c.bf16 %v3331_v60, %v3330_v56 }
0x12b0   :  { %4980 = vmatmul.mubr.msk.bf16.vlgmr.msra.gmra.mxu1 %vm1509_vm10, %v3335_v44 }
0x12b1   :  { %4993 = vmatprep.mubr.msk.bf16.mxu1 %vm5250_vm0, %v5249_v2 }
0x12d8   :  { %v3373_v50 = vpop.f32.mrf.mxu1 }
0x12da   :  { %v4945_v58 = vpop.f32.mrf.mxu1 }
0x12dc   :  { %v3376_v0 = vpop.f32.mrf.mxu1 }
0x12dd   :  { %v3380_v3 = vpack.c.bf16 %v3376_v0, %v3373_v50 }
0x12de   :  { %v4946_v9 = vpop.f32.mrf.mxu1 }
0x12df   :  { %4962 = vmatmul.mubr.msk.bf16.vlgmr.msra.gmra.mxu0 %vm708_vm6, %v3380_v3 }
0x12e0   :  { %v3470_v11 = vpop.f32.mrf.mxu1  ;;  %4972 = vmatpush3.bf16.msra.mxu0 %v3575_v4  ;;  %4973 = vmatprep.mubr.msk.bf16.mxu0 %vm5250_vm0, %v5249_v2  ;;  %v4428_v4 = vld [vmem:[%s6345_s9 + $0xa] ss:$0 sm:$0xff] }
0x12e1   :  { %4983 = vmatprep.subr.bf16.mxu0 %v5249_v2 }
0x12e2   :  { %v4957_v51 = vpop.f32.mrf.mxu1 }
0x12e4   :  { %v3473_v52 = vpop.f32.mrf.mxu1 }
0x12e6   :  { %v4958_v62 = vpop.f32.mrf.mxu1 }
0x12e8   :  { %v3561_v42 = vpop.f32.mrf.mxu1 }
0x12ea   :  { %v4969_v59 = vpop.f32.mrf.mxu1 }
0x12ec   :  { %v3564_v61 = vpop.f32.mrf.mxu1 }
0x12ed   :  { %v3568_v47 = vpack.c.bf16 %v3564_v61, %v3561_v42 }
0x12ee   :  { %v4970_v34 = vpop.f32.mrf.mxu1 }
0x12ef   :  { %4974 = vmatmul.mubr.msk.bf16.vlgmr.msra.gmra.mxu0 %vm708_vm6, %v3568_v47  ;;  %v5095_v47 = vld [vmem:[%s6344_s8 + $0x38] sm:$0xff]   ;;  %v5096_v34 = vld [vmem:[%s6344_s8 + $0x30] sm:$0xff]  }
0x12f0   :  { %4985 = vmatprep.mubr.msk.bf16.mxu0 %vm5250_vm0, %v5249_v2  ;;  %4984 = vmatpush3.bf16.msra.mxu0 %v3671_v37  ;;  %v5098_v37 = vld [vmem:[%s6344_s8 + $0x20] sm:$0xff]  }
0x12f1   :  { %4997 = vmatprep.subr.bf16.mxu0 %v5249_v2 }
0x1370   :  { %v3657_v55 = vpop.f32.mrf.mxu1 }
0x1372   :  { %v4981_v48 = vpop.f32.mrf.mxu1 }
0x1374   :  { %v3660_v12 = vpop.f32.mrf.mxu1 }
0x1375   :  { %v3664_v5 = vpack.c.bf16 %v3660_v12, %v3657_v55  ;;  %v4434_v55 = vld [vmem:[%s6345_s9 + $0xc] ss:$0 sm:$0xff] }
0x1376   :  { %v4982_v21 = vpop.f32.mrf.mxu1 }
0x1377   :  { %4986 = vmatmul.mubr.msk.bf16.vlgmr.msra.gmra.mxu0 %vm708_vm6, %v3664_v5  ;;  %vm3978_vm6 = vcmask 1040384  }
0x1378   :  { %5005 = vmatprep.mubr.msk.bf16.mxu0 %vm5250_vm0, %v5249_v2  ;;  %4998 = vmatpush3.bf16.msra.mxu0 %v5095_v47 }
0x1379   :  { %4999 = vmatprep.subr.bf16.mxu0 %v5249_v2 }
0x137c   :  { %5000 = vmatpush3.bf16.msra.mxu0 %v5096_v34 }
0x137d   :  { %5001 = vmatprep.subr.bf16.mxu0 %v5249_v2 }
0x1380   :  { %5002 = vmatpush3.bf16.msra.mxu0 %v5097_v35 }
0x1381   :  { %5003 = vmatprep.subr.bf16.mxu0 %v5249_v2 }
0x1384   :  { %5004 = vmatpush3.bf16.msra.mxu0 %v5098_v37  ;;  %v4453_v37 = vld [vmem:[%s6345_s9 + $0xf] ss:$0 sm:$0xff] }
0x139f   :  { %v3517_v45 = vpop.f32.mrf.mxu0 }
0x13a0   :  { %v3518_v16 = vadd.f32 %v3517_v45, %v3470_v11 }
0x13a1   :  { %v4963_v49 = vpop.f32.mrf.mxu0 }
0x13a3   :  { %v3520_v14 = vpop.f32.mrf.mxu0 }
0x13a4   :  { %v3521_v28 = vadd.f32 %v3520_v14, %v3473_v52  ;;  %v4429_v52 = vld [vmem:[%s6345_s9 + $0xb] ss:$0 sm:$0xff] }
0x13a5   :  { %v4964_v22 = vpop.f32.mrf.mxu0 }
0x13af   :  { %v3611_v18 = vpop.f32.mrf.mxu0 }
0x13b0   :  { %v3618_v17 = vadd.f32 %v3611_v18, %v3518_v16 }
0x13b1   :  { %v4975_v46 = vpop.f32.mrf.mxu0 }
0x13b3   :  { %v3614_v20 = vpop.f32.mrf.mxu0 }
0x13b4   :  { %v3619_v23 = vadd.f32 %v3614_v20, %v3521_v28 }
0x13b5   :  { %v4976_v24 = vpop.f32.mrf.mxu0 }
0x1437   :  { %v3707_v26 = vpop.f32.mrf.mxu0 }
0x1438   :  { %v3714_v29 = vadd.f32 %v3707_v26, %v3618_v17 }
0x1439   :  { %v4987_v13 = vpop.f32.mrf.mxu0 }
0x143a   :  { %v3721_v15 = vadd.f32 %v4427_v27, %v3714_v29 }
0x143b   :  { %v3710_v19 = vpop.f32.mrf.mxu0 }
0x143c   :  { %v3715_v30 = vadd.f32 %v3710_v19, %v3619_v23  ;;  %v3723_v32 = vadd.f32 %v3721_v15, %v5926_v40 }
0x143d   :  { %v4988_v33 = vpop.f32.mrf.mxu0 }
0x143e   :  { %v3722_v36 = vadd.f32 %v4427_v27, %v3715_v30  ;;  %v3727_v57 = vsel %vm282_vm5, %v3723_v32, 0.0 }
0x143f   :  { %3728 = vadd.xlane.f32.xlu0 %v3727_v57 }
0x1440   :  { %v3724_v39 = vadd.f32 %v3722_v36, %v5928_v41  ;;  %v5093_v41 = vld [vmem:[%s6343_s7 + $0x18] sm:$0xff]   ;;  %v4446_v36 = vld [vmem:[%s6345_s9 + $0xd] ss:$0 sm:$0xff] }
0x1441   :  { %4990 = vmatpush3.bf16.msra.mxu1 %v5093_v41 }
0x1442   :  { %v3730_v1 = vsel %vm282_vm5, %v3724_v39, 0.0  ;;  %4991 = vmatprep.subr.bf16.mxu1 %v5249_v2 }
0x1443   :  { %3731 = vadd.xlane.f32.xlu1 %v3730_v1 }
0x1445   :  { %4992 = vmatpush3.bf16.msra.mxu1 %v5094_v54 }
0x1446   :  { %5009 = vmatprep.subr.bf16.mxu1 %v5249_v2 }
0x14c8   :  { %v3729_v25 = vpop.xlane.xlu0 %3728 }
0x14c9   :  { %v3733_v31 = vmul.f32 0.03125, %v3729_v25 }
0x14cb   :  { %v3735_v38 = vsub.f32 %v3723_v32, %v3733_v31 }
0x14cc   :  { %v3732_v43 = vpop.xlane.xlu1 %3731 }
0x14cd   :  { %v3734_v6 = vmul.f32 0.03125, %v3732_v43  ;;  %v3737_v7 = vmul.f32 %v3735_v38, %v3735_v38 }
0x14cf   :  { %v3736_v10 = vsub.f32 %v3724_v39, %v3734_v6  ;;  %v3739_v8 = vsel %vm282_vm5, %v3737_v7, 0.0 }
0x14d0   :  { %3740 = vadd.xlane.f32.xlu0 %v3739_v8 }
0x14d1   :  { %v3738_v40 = vmul.f32 %v3736_v10, %v3736_v10 }
0x14d3   :  { %v3742_v53 = vsel %vm282_vm5, %v3738_v40, 0.0 }
0x14d4   :  { %3743 = vadd.xlane.f32.xlu1 %v3742_v53 }
0x1559   :  { %v3741_v56 = vpop.xlane.xlu0 %3740 }
0x155a   :  { %v3745_v60 = vmul.f32 0.03125, %v3741_v56 }
0x155c   :  { %v3747_v44 = vadd.f32 1e-12, %v3745_v60 }
0x155d   :  { %v3744_v50 = vpop.xlane.xlu1 %3743 }
0x155e   :  { %5183 = vrsqrt.f32 %v3747_v44  ;;  %v3746_v58 = vmul.f32 0.03125, %v3744_v50 }
0x1560   :  { %v3748_v63 = vadd.f32 1e-12, %v3746_v58 }
0x1562   :  { %5185 = vrsqrt.f32 %v3748_v63  ;;  %v5099_v63 = vld [vmem:[%s6346_s10 + $0x8] sm:$0xff]  }
0x156b   :  { %v5184_v0 = vpop.eup %5183 }
0x156c   :  { %v3751_v3 = vmul.f32 %v5184_v0, %v3735_v38  ;;  %v5100_v0 = vld [vmem:[%s6346_s10] sm:$0xff]  }
0x156e   :  { %v3757_v51 = vmul.f32 %v4428_v4, %v3751_v3 }
0x156f   :  { %v5186_v9 = vpop.eup %5185 }
0x1570   :  { %v3752_v11 = vmul.f32 %v5186_v9, %v3736_v10  ;;  %v3763_v42 = vadd.f32 %v4429_v52, %v3757_v51 }
0x1572   :  { %v3758_v62 = vmul.f32 %v4428_v4, %v3752_v11 }
0x1574   :  { %v3764_v59 = vadd.f32 %v4429_v52, %v3758_v62 }
0x1576   :  { %v3765_v61 = vpack.c.bf16 %v3764_v59, %v3763_v42 }
0x1578   :  { %4994 = vmatmul.mubr.msk.bf16.vlgmr.msra.gmra.mxu1 %vm282_vm5, %v3765_v61  ;;  %v4452_v61 = vld [vmem:[%s6345_s9 + $0xe] ss:$0 sm:$0xff] }
0x1579   :  { %5013 = vmatprep.mubr.msk.bf16.mxu1 %vm5250_vm0, %v5249_v2  ;;  %5010 = vmatpush3.bf16.msra.mxu1 %v5099_v63 }
0x157a   :  { %5011 = vmatprep.subr.bf16.mxu1 %v5249_v2 }
0x157d   :  { %5012 = vmatpush3.bf16.msra.mxu1 %v5100_v0 }
0x157e   :  { %5017 = vmatprep.subr.bf16.mxu1 %v5249_v2 }
0x1638   :  { %v3825_v48 = vpop.f32.mrf.mxu1 }
0x1639   :  { %v3826_v12 = vadd.f32 %v4434_v55, %v3825_v48 }
0x163a   :  { %v4995_v5 = vpop.f32.mrf.mxu1 }
0x163b   :  { %v3834_v21 = vmul.f32 0.044715, %v3826_v12  ;;  %v3832_v13 = vmul.f32 0.5, %v3826_v12 }
0x163c   :  { %v3828_v45 = vpop.f32.mrf.mxu1 }
0x163d   :  { %v3836_v49 = vmul.f32 %v3834_v21, %v3826_v12  ;;  %v3829_v14 = vadd.f32 %v4434_v55, %v3828_v45  ;;  %v5101_v45 = vld [vmem:[%s6347_s11 + $0x8] sm:$0xff]  }
0x163e   :  { %v4996_v22 = vpop.f32.mrf.mxu1 }
0x163f   :  { %v3838_v16 = vmul.f32 %v3836_v49, %v3826_v12  ;;  %v3835_v18 = vmul.f32 0.044715, %v3829_v14  ;;  %v3833_v15 = vmul.f32 0.5, %v3829_v14  ;;  %v5102_v49 = vld [vmem:[%s6347_s11] sm:$0xff]   ;;  %s5252_s11 = smov [#allocation7]  }
0x1640   :  { %s4118_s1 = sshll.u32 %s5252_s11, 4  ;;  %s4119_s1 = int_to_ptr.vmem [resolvable:$true] %s4118_s1 }
0x1641   :  { %v3840_v17 = vadd.f32 %v3838_v16, %v3826_v12  ;;  %v3837_v46 = vmul.f32 %v3835_v18, %v3829_v14  ;;  %s5221_s13 = scalar_lea.vmem %s4119_s1, 32  ;;  %p5226_p13 = scmp.lt.s32.totalorder %s4119_s1, %s4119_s1 }
0x1642   :  { %p5222_p12 = scmp.ne.s32.totalorder %s4119_s1, %s5221_s13  ;;  %p5227_p0 = scmp.lt.s32.totalorder %s5221_s13, %s5221_s13 }
0x1643   :  { %v3842_v28 = vmul.f32 0.7978846, %v3840_v17  ;;  %v3839_v20 = vmul.f32 %v3837_v46, %v3829_v14 }
0x1644   :  { %p5228_p1 = por %p5227_p0, %p5226_p13 }
0x1645   :  { %5187 = vtanh.f32 %v3842_v28  ;;  %v3841_v23 = vadd.f32 %v3839_v20, %v3829_v14  ;;  %v4454_v14 = vld [vmem:[%s6345_s9 + $0x10] ss:$0 sm:$0xff] }
0x1646   :  { %p5229_p2 = pnand %p5228_p1, %p5222_p12 }
0x1647   :  { %v3843_v24 = vmul.f32 0.7978846, %v3841_v23 }
0x1649   :  { %5189 = vtanh.f32 %v3843_v24 }
0x1652   :  { %v5188_v26 = vpop.eup %5187 }
0x1653   :  { %v3846_v27 = vadd.f32 1.0, %v5188_v26 }
0x1655   :  { %v3848_v30 = vmul.f32 %v3846_v27, %v3832_v13 }
0x1656   :  { %v5190_v29 = vpop.eup %5189 }
0x1657   :  { %v3847_v19 = vadd.f32 1.0, %v5190_v29 }
0x1659   :  { %v3849_v32 = vmul.f32 %v3847_v19, %v3833_v15 }
0x165b   :  { %v3850_v33 = vpack.c.bf16 %v3849_v32, %v3848_v30 }
0x165d   :  { %5006 = vmatmul.mubr.msk.bf16.vlgmr.msra.gmra.mxu0 %vm2153_vm12, %v3850_v33 }
0x171d   :  { %v3926_v57 = vpop.f32.mrf.mxu0 }
0x171e   :  { %v3927_v39 = vadd.f32 %v4446_v36, %v3926_v57 }
0x171f   :  { %v5007_v1 = vpop.f32.mrf.mxu0 }
0x1720   :  { %v3933_v25 = vadd.f32 %v3927_v39, %v3763_v42 }
0x1721   :  { %v3929_v31 = vpop.f32.mrf.mxu0 }
0x1722   :  { %v3930_v38 = vadd.f32 %v4446_v36, %v3929_v31  ;;  %v3937_v43 = vsel %vm282_vm5, %v3933_v25, 0.0 }
0x1723   :  { %3938 = vadd.xlane.f32.xlu1 %v3937_v43  ;;  %v5008_v6 = vpop.f32.mrf.mxu0 }
0x1724   :  { %v3934_v7 = vadd.f32 %v3930_v38, %v3764_v59 }
0x1726   :  { %v3940_v10 = vsel %vm282_vm5, %v3934_v7, 0.0 }
0x1727   :  { %3941 = vadd.xlane.f32.xlu0 %v3940_v10 }
0x17ac   :  { %v3939_v8 = vpop.xlane.xlu1 %3938 }
0x17ad   :  { %v3943_v40 = vmul.f32 0.03125, %v3939_v8 }
0x17af   :  { %v3945_v53 = vsub.f32 %v3933_v25, %v3943_v40 }
0x17b0   :  { %v3942_v41 = vpop.xlane.xlu0 %3941 }
0x17b1   :  { %v3944_v54 = vmul.f32 0.03125, %v3942_v41  ;;  %v3947_v56 = vmul.f32 %v3945_v53, %v3945_v53 }
0x17b3   :  { %v3946_v60 = vsub.f32 %v3934_v7, %v3944_v54  ;;  %v3949_v44 = vsel %vm282_vm5, %v3947_v56, 0.0 }
0x17b4   :  { %3950 = vadd.xlane.f32.xlu1 %v3949_v44 }
0x17b5   :  { %v3948_v50 = vmul.f32 %v3946_v60, %v3946_v60 }
0x17b7   :  { %v3952_v58 = vsel %vm282_vm5, %v3948_v50, 0.0 }
0x17b8   :  { %3953 = vadd.xlane.f32.xlu0 %v3952_v58 }
0x183d   :  { %v3951_v3 = vpop.xlane.xlu1 %3950 }
0x183e   :  { %v3955_v4 = vmul.f32 0.03125, %v3951_v3 }
0x1840   :  { %v3957_v9 = vadd.f32 1e-12, %v3955_v4 }
0x1841   :  { %v3954_v11 = vpop.xlane.xlu0 %3953 }
0x1842   :  { %5191 = vrsqrt.f32 %v3957_v9  ;;  %v3956_v51 = vmul.f32 0.03125, %v3954_v11 }
0x1844   :  { %v3958_v52 = vadd.f32 1e-12, %v3956_v51 }
0x1846   :  { %5193 = vrsqrt.f32 %v3958_v52 }
0x184f   :  { %v5192_v62 = vpop.eup %5191 }
0x1850   :  { %v3961_v42 = vmul.f32 %v5192_v62, %v3945_v53 }
0x1852   :  { %v3967_v34 = vmul.f32 %v4452_v61, %v3961_v42 }
0x1853   :  { %v5194_v59 = vpop.eup %5193 }
0x1854   :  { %v3962_v47 = vmul.f32 %v5194_v59, %v3946_v60  ;;  %v3973_v48 = vadd.f32 %v4453_v37, %v3967_v34 }
0x1856   :  { %v3968_v35 = vmul.f32 %v4452_v61, %v3962_v47 }
0x1858   :  { %v3974_v55 = vadd.f32 %v4453_v37, %v3968_v35 }
0x185a   :  { %v3976_v12 = vrot.slane %v3974_v55, 7 }
0x185c   :  { %v3979_v5 = vsel %vm3978_vm6, %v3973_v48, %v3976_v12 }
0x185d   :  { %v3980_v21 = vpack.c.bf16 %v3979_v5, %v3979_v5 }
0x185f   :  { %5014 = vmatmul.mubr.msk.bf16.vlgmr.msra.gmra.mxu1 %vm282_vm5, %v3980_v21 }
0x1860   :  { %5021 = vmatprep.mubr.msk.bf16.mxu1 %vm5250_vm0, %v5249_v2  ;;  %5018 = vmatpush3.bf16.msra.mxu1 %v5101_v45 }
0x1861   :  { %5019 = vmatprep.subr.bf16.mxu1 %v5249_v2  ;;  %v4458_v2 = vld [vmem:[%s6345_s9 + $0x11] ss:$0 sm:$0xff] }
0x1864   :  { %5020 = vmatpush3.bf16.msra.mxu1 %v5102_v49 }
0x191f   :  { %v4039_v22 = vpop.f32.mrf.mxu1 }
0x1920   :  { %v4040_v16 = vadd.f32 %v4454_v14, %v4039_v22 }
0x1921   :  { %v5015_v18 = vpop.f32.mrf.mxu1 }
0x1922   :  { %5195 = vtanh.f32 %v4040_v16 }
0x1923   :  { %v4042_v17 = vpop.f32.mrf.mxu1 }
0x1925   :  { %v5016_v46 = vpop.f32.mrf.mxu1 }
0x192f   :  { %v5196_v28 = vpop.eup %5195 }
0x1930   :  { %v4046_v20 = vpack.c.bf16 %v5196_v28, %v5196_v28 }
0x1932   :  { %5022 = vmatmul.mubr.msk.bf16.vlgmr.msra.gmra.mxu1 %vm282_vm5, %v4046_v20 }
0x19f2   :  { %v4105_v23 = vpop.f32.mrf.mxu1 }
0x19f3   :  { %v4106_v24 = vadd.f32 %v4458_v2, %v4105_v23 }
0x19f4   :  { %v5023_v26 = vpop.f32.mrf.mxu1 }
0x19f5   :  { %4111 = vst [vmem:[#allocation7] sm:$0x3] %v4106_v24 }
0x19f6   :  { %v4108_v27 = vpop.f32.mrf.mxu1 }
0x19f7   :  { %5232 = shalt.err (!%p5229_p2)
}
0x19f8   :  { %4121 = dma.vmem_to_hbm [thread:$0]  %s4119_s1, 32, %s6348_s12, [#allocation3]   ;;  %v5024_v29 = vpop.f32.mrf.mxu1 }
0x19f9   :  { %5245 = dma.done.wait [#allocation3], 32  }
0x19fa   :  { %5246 = vsyncadd [#allocation3], 4294967264 }
0x19fb   :  { %4125 = vsyncpa [#allocation3], 1 }
0x19fc   :  { %4126 = vsyncpa [#allocation4], 1 }
0x19fd   :  { %4127 = vsyncpa [#allocation6], 1 }

</bundles_post_ra>
